<compile_context>
chip_gen: v7x
topology: tpu7x:2x2x1
jax: 0.10.0
libtpu: 0.0.40
codegen_flags: <defaults>
</compile_context>

<pallas_src>
import functools

import jax
import jax.numpy as jnp
from jax.experimental import pallas as pl
from jax.experimental.pallas import tpu as pltpu


def _round_up(x, m):
    return (x + m - 1) // m * m


def _compiler_params(**kwargs):
    cp = getattr(pltpu, "CompilerParams", None)
    if cp is None:  # older JAX spelling
        cp = getattr(pltpu, "TPUCompilerParams")
    return cp(**kwargs)


def _vmem_limit_bytes():
    # Cap the scoped VMEM request at physical capacity minus headroom so the
    # same code is legal on v5e/v6e (128 MiB) and v7x (64 MiB).
    try:
        cap = int(pltpu.get_tpu_info().vmem_capacity_bytes)
    except Exception:
        cap = 64 << 20  # conservative: v7x physical VMEM per TensorCore
    return max(min(cap - (8 << 20), 96 << 20), 32 << 20)


def _ensemble_fused_kernel(x_ref, w_ref, b_ref, out_ref, *,
                           ensemble_size, sel_lanes, tile_n):
    """Single-N-tile path: selector folded into one lane-dense matmul.

    w_ref lane layout: [0, sel_lanes)                 selector cols (zero-padded)
                       [sel_lanes + e*tile_n, +tile_n) submodel e output cols
    """
    x = x_ref[...]                                                       # (TB, D_in)
    fused = jnp.dot(x, w_ref[...], preferred_element_type=jnp.float32)   # (TB, N_all) f32
    fused = fused + b_ref[...].astype(jnp.float32)

    # ---- selector logits; softmax dropped (monotone => identical argmax) ----
    logits = fused[:, :sel_lanes]                                        # (TB, sel_lanes)
    lane = jax.lax.broadcasted_iota(jnp.int32, logits.shape, 1)
    logits = jnp.where(lane < ensemble_size, logits, -jnp.inf)           # mask padded lanes
    lmax = jnp.max(logits, axis=1, keepdims=True)
    # first maximal index (torch.argmax semantics)
    best = jnp.min(jnp.where(logits >= lmax, lane, sel_lanes),
                   axis=1, keepdims=True)                                # (TB, 1) int32

    # ---- gather-by-argmax: unrolled select+add over aligned 128-lane blocks ----
    acc = jnp.zeros((x.shape[0], tile_n), jnp.float32)
    for e in range(ensemble_size):
        blk = fused[:, sel_lanes + e * tile_n: sel_lanes + (e + 1) * tile_n]
        acc = acc + jnp.where(best == e, blk, 0.0)
    out_ref[...] = acc.astype(out_ref.dtype)


def _ensemble_tiled_kernel(x_ref, wsel_ref, bsel_ref, wf_ref, bf_ref, out_ref,
                           best_ref, *, ensemble_size, tile_n):
    """Multi-N-tile path: selector/argmax computed once per batch tile (j == 0),
    cached in VMEM scratch and reused for the remaining D_out tiles."""
    x = x_ref[...]

    @pl.when(pl.program_id(1) == 0)
    def _():
        logits = jnp.dot(x, wsel_ref[...], preferred_element_type=jnp.float32)
        logits = logits + bsel_ref[...].astype(jnp.float32)              # (TB, E)
        lmax = jnp.max(logits, axis=1, keepdims=True)
        eidx = jax.lax.broadcasted_iota(jnp.int32, logits.shape, 1)
        best_ref[...] = jnp.min(jnp.where(logits >= lmax, eidx, ensemble_size),
                                axis=1, keepdims=True)                   # (TB, 1)

    fused = jnp.dot(x, wf_ref[...], preferred_element_type=jnp.float32)  # (TB, E*tile_n)
    fused = fused + bf_ref[...].astype(jnp.float32)
    best = best_ref[...]
    acc = jnp.zeros((x.shape[0], tile_n), jnp.float32)
    for e in range(ensemble_size):
        blk = fused[:, e * tile_n:(e + 1) * tile_n]
        acc = acc + jnp.where(best == e, blk, 0.0)
    out_ref[...] = acc.astype(out_ref.dtype)


@functools.partial(jax.jit, static_argnames=("tile_b",))
def ensemble_forward(x, wsel, bsel, w_stack, b_stack, *, tile_b=256):
    """x: (B, D_in); wsel: (D_in, E); bsel: (E,) or (1, E);
    w_stack: (E, D_in, D_out); b_stack: (E, D_out).  Returns (B, D_out)."""
    B, D_in = x.shape
    E, _, D_out = w_stack.shape
    dtype = x.dtype
    f32 = jnp.float32

    # ---- output-feature tiling: always lane-dense 128-wide tiles (pad D_out) ----
    tile_n = 128
    D_out_pad = _round_up(D_out, tile_n)
    n_tiles = D_out_pad // tile_n

    # ---- batch tiling (pad batch to a tile multiple; padded rows discarded) ----
    tile_b = min(tile_b, _round_up(B, 8))
    B_pad = _round_up(B, tile_b)
    if B_pad != B:
        x = jnp.pad(x, ((0, B_pad - B), (0, 0)))

    # ---- pre-pack stacked submodel weights (fused with the call under jit) ----
    w_sub = jnp.transpose(w_stack, (1, 0, 2)).astype(dtype)              # (D_in, E, D_out)
    w_sub = jnp.pad(w_sub, ((0, 0), (0, 0), (0, D_out_pad - D_out)))     # (D_in, E, D_out_pad)
    b_sub = jnp.pad(b_stack.astype(f32), ((0, 0), (0, D_out_pad - D_out)))  # (E, D_out_pad)
    bsel2 = bsel.reshape(1, E).astype(f32)
    wsel2 = wsel.astype(dtype)

    vmem_limit = _vmem_limit_bytes()

    if n_tiles == 1:
        # -------- fold path: ONE matmul per grid step (selector + all submodels) --------
        sel_lanes = _round_up(E, 128)
        w_sel_blk = jnp.zeros((D_in, sel_lanes), dtype).at[:, :E].set(wsel2)
        b_sel_blk = jnp.zeros((1, sel_lanes), f32).at[:, :E].set(bsel2)
        w_all = jnp.concatenate([w_sel_blk, w_sub.reshape(D_in, E * tile_n)], axis=1)
        b_all = jnp.concatenate([b_sel_blk, b_sub.reshape(1, E * tile_n)], axis=1)
        n_all = sel_lanes + E * tile_n

        kernel = functools.partial(_ensemble_fused_kernel, ensemble_size=E,
                                   sel_lanes=sel_lanes, tile_n=tile_n)
        out = pl.pallas_call(
            kernel,
            out_shape=jax.ShapeDtypeStruct((B_pad, tile_n), dtype),
            grid=(B_pad // tile_b,),
            in_specs=[
                pl.BlockSpec((tile_b, D_in), lambda i: (i, 0)),    # x batch tile
                pl.BlockSpec((D_in, n_all), lambda i: (0, 0)),     # fused selector+submodel W
                pl.BlockSpec((1, n_all), lambda i: (0, 0)),        # fused bias (f32)
            ],
            out_specs=pl.BlockSpec((tile_b, tile_n), lambda i: (i, 0)),
            compiler_params=_compiler_params(
                dimension_semantics=("parallel",),
                vmem_limit_bytes=vmem_limit,
            ),
        )(x, w_all, b_all)
    else:
        # -------- tiled path: selector/argmax hoisted out of the D_out-tile loop --------
        w_fused = (w_sub.reshape(D_in, E, n_tiles, tile_n)
                   .transpose(0, 2, 1, 3)                          # (D_in, n_tiles, E, tile_n)
                   .reshape(D_in, n_tiles * E * tile_n))
        b_fused = (b_sub.reshape(E, n_tiles, tile_n)
                   .transpose(1, 0, 2)
                   .reshape(1, n_tiles * E * tile_n))

        kernel = functools.partial(_ensemble_tiled_kernel, ensemble_size=E, tile_n=tile_n)
        out = pl.pallas_call(
            kernel,
            out_shape=jax.ShapeDtypeStruct((B_pad, D_out_pad), dtype),
            grid=(B_pad // tile_b, n_tiles),
            in_specs=[
                pl.BlockSpec((tile_b, D_in), lambda i, j: (i, 0)),        # x batch tile
                pl.BlockSpec((D_in, E), lambda i, j: (0, 0)),             # selector W
                pl.BlockSpec((1, E), lambda i, j: (0, 0)),                # selector b
                pl.BlockSpec((D_in, E * tile_n), lambda i, j: (0, j)),    # fused submodel W tile
                pl.BlockSpec((1, E * tile_n), lambda i, j: (0, j)),       # fused submodel b tile
            ],
            out_specs=pl.BlockSpec((tile_b, tile_n), lambda i, j: (i, j)),
            scratch_shapes=[pltpu.VMEM((tile_b, 1), jnp.int32)],          # cached argmax
            compiler_params=_compiler_params(
                dimension_semantics=("parallel", "arbitrary"),
                vmem_limit_bytes=vmem_limit,
            ),
        )(x, wsel2, bsel2, w_fused, b_fused)

    return out[:B, :D_out]


def ensemble_reference(x, wsel, bsel, w_stack, b_stack):
    hi = jax.lax.Precision.HIGHEST
    logits = jnp.dot(x, wsel, precision=hi) + bsel.reshape(1, -1)         # (B, E)
    weights = jax.nn.softmax(logits, axis=1)
    outs = jnp.einsum("bd,edo->beo", x, w_stack, precision=hi) + b_stack[None]
    best = jnp.argmax(weights, axis=1)                                    # (B,)
    return jnp.take_along_axis(outs, best[:, None, None], axis=1)[:, 0, :]


# TODO(synk): return_all=True path (per-submodel outputs + softmax weights) not
# implemented; only the default gather-by-argmax forward is kernelized.

if __name__ == "__main__":
    key = jax.random.PRNGKey(0)

    def make_case(k, B, D_in, D_out, E):
        k_x, k_ws, k_bs, k_w, k_b = jax.random.split(k, 5)
        x = jax.random.normal(k_x, (B, D_in), jnp.float32)
        wsel = jax.random.normal(k_ws, (D_in, E), jnp.float32) * 0.1
        bsel = jax.random.normal(k_bs, (1, E), jnp.float32) * 0.1
        w_stack = jax.random.normal(k_w, (E, D_in, D_out), jnp.float32) * 0.1
        b_stack = jax.random.normal(k_b, (E, D_out), jnp.float32) * 0.1
        return x, wsel, bsel, w_stack, b_stack

    k1, k2 = jax.random.split(key)

    # Case 1: D_out < 128 -> single-N-tile fold path (selector fused into one matmul).
    args1 = make_case(k1, 512, 64, 32, 4)
    out1 = ensemble_forward(*args1, tile_b=256)
    jax.block_until_ready(out1)
    ref1 = ensemble_reference(*args1)
    assert out1.shape == ref1.shape
    assert float(jnp.max(jnp.abs(out1 - ref1))) < 1e-2, float(jnp.max(jnp.abs(out1 - ref1)))

    # Case 2: D_out > 128 -> multi-N-tile path (selector hoisted + cached per batch tile).
    args2 = make_case(k2, 192, 64, 256, 3)
    out2 = ensemble_forward(*args2, tile_b=128)
    jax.block_until_ready(out2)
    ref2 = ensemble_reference(*args2)
    assert out2.shape == ref2.shape
    assert float(jnp.max(jnp.abs(out2 - ref2))) < 1e-2, float(jnp.max(jnp.abs(out2 - ref2)))

    print("KERNEL_OK")
</pallas_src>

<mosaic_0001>
module attributes {stable_mosaic.version = 11 : i64} {
  func.func @_ensemble_fused_kernel(%arg0: i32, %arg1: memref<256x64xf32, #tpu.memory_space<vmem>>, %arg2: memref<64x640xf32, #tpu.memory_space<vmem>>, %arg3: memref<1x640xf32, #tpu.memory_space<vmem>>, %arg4: memref<256x128xf32, #tpu.memory_space<vmem>>) attributes {dimension_semantics = [#tpu.dimension_semantics<parallel>], iteration_bounds = array<i64: 2>, scalar_prefetch = 0 : i64, scratch_operands = 0 : i64, tpu.core_type = #tpu.core_type<tc>, window_params = [{transform_indices = @transform_0, window_bounds = array<i64: 256, 64>}, {pipeline_mode = #tpu.pipeline_mode<synchronous>, transform_indices = @transform_1, window_bounds = array<i64: 64, 640>}, {pipeline_mode = #tpu.pipeline_mode<synchronous>, transform_indices = @transform_2, window_bounds = array<i64: 1, 640>}, {transform_indices = @transform_3, window_bounds = array<i64: 256, 128>}]} {
    %c0 = arith.constant 0 : index
    %c0_0 = arith.constant 0 : index
    %0 = vector.load %arg1[%c0, %c0_0] : memref<256x64xf32, #tpu.memory_space<vmem>>, vector<256x64xf32>
    %c0_1 = arith.constant 0 : index
    %c0_2 = arith.constant 0 : index
    %1 = vector.load %arg2[%c0_1, %c0_2] : memref<64x640xf32, #tpu.memory_space<vmem>>, vector<64x640xf32>
    %cst = arith.constant dense<0.000000e+00> : vector<256x640xf32>
    %2 = tpu.matmul %0, %1, %cst {dimension_numbers = #tpu.dot_dimension_numbers<[1], [0], [0], [1], [0, 0, 1, 1], [], []>} : vector<256x64xf32>, vector<64x640xf32>, vector<256x640xf32> -> vector<256x640xf32>
    %c0_3 = arith.constant 0 : index
    %c0_4 = arith.constant 0 : index
    %3 = vector.load %arg3[%c0_3, %c0_4] : memref<1x640xf32, #tpu.memory_space<vmem>>, vector<1x640xf32>
    %4 = vector.broadcast %3 : vector<1x640xf32> to vector<256x640xf32>
    %5 = arith.addf %2, %4 : vector<256x640xf32>
    %6 = vector.extract_strided_slice %5 {offsets = [0, 0], sizes = [256, 128], strides = [1, 1]} : vector<256x640xf32> to vector<256x128xf32>
    %7 = tpu.iota {dimensions = array<i32: 1>} : vector<256x128xi32>
    %c4_i32 = arith.constant 4 : i32
    %8 = vector.broadcast %c4_i32 : i32 to vector<256x128xi32>
    %9 = arith.cmpi slt, %7, %8 : vector<256x128xi32>
    %cst_5 = arith.constant 0xFF800000 : f32
    %10 = vector.broadcast %cst_5 : f32 to vector<256x128xf32>
    %11 = arith.select %9, %6, %10 : vector<256x128xi1>, vector<256x128xf32>
    %cst_6 = arith.constant dense<0xFF800000> : vector<256xf32>
    %12 = vector.multi_reduction <maximumf>, %11, %cst_6 [1] : vector<256x128xf32> to vector<256xf32>
    %13 = vector.shape_cast %12 : vector<256xf32> to vector<256x1xf32>
    %14 = vector.broadcast %13 : vector<256x1xf32> to vector<256x128xf32>
    %15 = arith.cmpf oge, %11, %14 : vector<256x128xf32>
    %c128_i32 = arith.constant 128 : i32
    %16 = vector.broadcast %c128_i32 : i32 to vector<256x128xi32>
    %17 = arith.select %15, %7, %16 : vector<256x128xi1>, vector<256x128xi32>
    %cst_7 = arith.constant dense<2147483647> : vector<256xi32>
    %18 = vector.multi_reduction <minsi>, %17, %cst_7 [1] : vector<256x128xi32> to vector<256xi32>
    %19 = vector.shape_cast %18 : vector<256xi32> to vector<256x1xi32>
    %cst_8 = arith.constant 0.000000e+00 : f32
    %20 = vector.broadcast %cst_8 : f32 to vector<256x128xf32>
    %21 = vector.extract_strided_slice %5 {offsets = [0, 128], sizes = [256, 128], strides = [1, 1]} : vector<256x640xf32> to vector<256x128xf32>
    %c0_i32 = arith.constant 0 : i32
    %22 = vector.broadcast %c0_i32 : i32 to vector<256x1xi32>
    %23 = arith.cmpi eq, %19, %22 : vector<256x1xi32>
    %cst_9 = arith.constant 0.000000e+00 : f32
    %24 = vector.shape_cast %23 : vector<256x1xi1> to vector<256x1xi1>
    %25 = vector.broadcast %24 : vector<256x1xi1> to vector<256x128xi1>
    %26 = vector.broadcast %cst_9 : f32 to vector<256x128xf32>
    %27 = arith.select %25, %21, %26 : vector<256x128xi1>, vector<256x128xf32>
    %28 = arith.addf %20, %27 : vector<256x128xf32>
    %29 = vector.extract_strided_slice %5 {offsets = [0, 256], sizes = [256, 128], strides = [1, 1]} : vector<256x640xf32> to vector<256x128xf32>
    %c1_i32 = arith.constant 1 : i32
    %30 = vector.broadcast %c1_i32 : i32 to vector<256x1xi32>
    %31 = arith.cmpi eq, %19, %30 : vector<256x1xi32>
    %cst_10 = arith.constant 0.000000e+00 : f32
    %32 = vector.shape_cast %31 : vector<256x1xi1> to vector<256x1xi1>
    %33 = vector.broadcast %32 : vector<256x1xi1> to vector<256x128xi1>
    %34 = vector.broadcast %cst_10 : f32 to vector<256x128xf32>
    %35 = arith.select %33, %29, %34 : vector<256x128xi1>, vector<256x128xf32>
    %36 = arith.addf %28, %35 : vector<256x128xf32>
    %37 = vector.extract_strided_slice %5 {offsets = [0, 384], sizes = [256, 128], strides = [1, 1]} : vector<256x640xf32> to vector<256x128xf32>
    %c2_i32 = arith.constant 2 : i32
    %38 = vector.broadcast %c2_i32 : i32 to vector<256x1xi32>
    %39 = arith.cmpi eq, %19, %38 : vector<256x1xi32>
    %cst_11 = arith.constant 0.000000e+00 : f32
    %40 = vector.shape_cast %39 : vector<256x1xi1> to vector<256x1xi1>
    %41 = vector.broadcast %40 : vector<256x1xi1> to vector<256x128xi1>
    %42 = vector.broadcast %cst_11 : f32 to vector<256x128xf32>
    %43 = arith.select %41, %37, %42 : vector<256x128xi1>, vector<256x128xf32>
    %44 = arith.addf %36, %43 : vector<256x128xf32>
    %45 = vector.extract_strided_slice %5 {offsets = [0, 512], sizes = [256, 128], strides = [1, 1]} : vector<256x640xf32> to vector<256x128xf32>
    %c3_i32 = arith.constant 3 : i32
    %46 = vector.broadcast %c3_i32 : i32 to vector<256x1xi32>
    %47 = arith.cmpi eq, %19, %46 : vector<256x1xi32>
    %cst_12 = arith.constant 0.000000e+00 : f32
    %48 = vector.shape_cast %47 : vector<256x1xi1> to vector<256x1xi1>
    %49 = vector.broadcast %48 : vector<256x1xi1> to vector<256x128xi1>
    %50 = vector.broadcast %cst_12 : f32 to vector<256x128xf32>
    %51 = arith.select %49, %45, %50 : vector<256x128xi1>, vector<256x128xf32>
    %52 = arith.addf %44, %51 : vector<256x128xf32>
    %c0_13 = arith.constant 0 : index
    %c0_14 = arith.constant 0 : index
    %53 = vector.load %arg4[%c0_13, %c0_14] : memref<256x128xf32, #tpu.memory_space<vmem>>, vector<256x128xf32>
    tpu.vector_store %arg4[%c0_13, %c0_14], %52 {strides = array<i32>} : memref<256x128xf32, #tpu.memory_space<vmem>>, vector<256x128xf32>,
    return
  }
  func.func @transform_0(%arg0: i32) -> (i32, i32) {
    %c0_i32 = arith.constant 0 : i32
    %c0_i32_0 = arith.constant 0 : i32
    return %arg0, %c0_i32 : i32, i32
  }
  func.func @transform_1(%arg0: i32) -> (i32, i32) {
    %c0_i32 = arith.constant 0 : i32
    %c0_i32_0 = arith.constant 0 : i32
    %c0_i32_1 = arith.constant 0 : i32
    return %c0_i32, %c0_i32_0 : i32, i32
  }
  func.func @transform_2(%arg0: i32) -> (i32, i32) {
    %c0_i32 = arith.constant 0 : i32
    %c0_i32_0 = arith.constant 0 : i32
    %c0_i32_1 = arith.constant 0 : i32
    return %c0_i32, %c0_i32_0 : i32, i32
  }
  func.func @transform_3(%arg0: i32) -> (i32, i32) {
    %c0_i32 = arith.constant 0 : i32
    %c0_i32_0 = arith.constant 0 : i32
    return %arg0, %c0_i32 : i32, i32
  }
}

</mosaic_0001>

<bundles_post_ra>
// kernel: ensemble_forward.1
= control target key start
LH: loop header
LB: loop body
LE: loop exit
PB: predicated region body
PF: predicated region fallthrough
CT: control target
= control target key end

     0   :  { %s2754_s12 = smov 0   ;;  %s4956_s0 = inlined_call_operand.vmem [shape: f32[512,64], index: 0, kind: input, shape index: {}]   ;;  %s4957_s1 = inlined_call_operand.vmem [shape: f32[64,640], index: 1, kind: input, shape index: {}]   ;;  %s4958_s2 = inlined_call_operand.vmem [shape: f32[1,640], index: 2, kind: input, shape index: {}]   ;;  %s4959_s3 = inlined_call_operand.vmem [shape: f32[512,128], index: 3, kind: output, shape index: {}]  }
   0x1 LB: > { %s2448_s13 = sadd.s32 4294967295, %s2731_s12   ;;  %p2452_p0 = scmp.ge.s32.totalorder %s2731_s12, 1  ;;  %s2731_s12 = sphi %s2754_s12, %s13_s12  }
   0x2   : > { %p138_p1 = scmp.lt.s32.totalorder %s2731_s12, 3 }
   0x4   : > { %p139_p2 = pnand %p2452_p0, %p138_p1 }
   0x6   : > { %142 = sbr.rel (%p139_p2) target bundleno = 812 (0x32c), region = 32 }
   0xd   : > { %v207_v0 = vld [vmem:[%s4957_s1 + $0x8] sm:$0xff]  ;;  %v212_v1 = vld [vmem:[%s4957_s1 + $0x30] sm:$0xff]  ;;  %v206_v2 = vld [vmem:[%s4957_s1] sm:$0xff]  ;;  %s2453_s20 = sshll.u32 %s2448_s13, 5  ;;  %v4960_v7 = vmov 0.0   ;;  %vm273_vm0 = vcmask 523264  }
   0xe   : > { %v2659_v3 = vpack.c.bf16 %v212_v1, %v207_v0  ;;  %v211_v4 = vld [vmem:[%s4957_s1 + $0x28] sm:$0xff]  ;;  %v217_v5 = vld [vmem:[%s4957_s1 + $0x58] sm:$0xff]  ;;  %v222_v6 = vld [vmem:[%s4957_s1 + $0x80] sm:$0xff]  ;;  %434 = vmatprep.mubr.f32.mxu0 %v4960_v7  ;;  %578 = vmatprep.mubr.f32.mxu1 %v4960_v7  ;;  %p163_p3 = scmp.lt.s32.totalorder %s2453_s20, 63 }
   0xf   : > { %v2661_v8 = vpack.c.bf16 %v211_v4, %v206_v2  ;;  %v2663_v9 = vpack.c.bf16 %v222_v6, %v217_v5  ;;  %v216_v10 = vld [vmem:[%s4957_s1 + $0x50] sm:$0xff]  ;;  %v221_v11 = vld [vmem:[%s4957_s1 + $0x78] sm:$0xff]  ;;  %v227_v12 = vld [vmem:[%s4957_s1 + $0xa8] sm:$0xff] }
  0x10   : > { %2660 = vmatprep.subr.bf16.mxu0 %v2659_v3  ;;  %2707 = vmatprep.subr.bf16.mxu1 %v2659_v3  ;;  %v232_v13 = vld [vmem:[%s4957_s1 + $0xd0] sm:$0xff]  ;;  %v2665_v14 = vpack.c.bf16 %v221_v11, %v216_v10  ;;  %v226_v16 = vld [vmem:[%s4957_s1 + $0xa0] sm:$0xff]  ;;  %v231_v17 = vld [vmem:[%s4957_s1 + $0xc8] sm:$0xff]  ;;  %s5456_s20 = smov (!%p163_p3, %s2453_s20), 63 }
  0x11   : > { %2662 = vmatpush1.bf16.msra.mxu0 %v2661_v8  ;;  %2711 = vmatpush1.bf16.msra.mxu1 %v2661_v8  ;;  %v2667_v15 = vpack.c.bf16 %v232_v13, %v227_v12  ;;  %v237_v18 = vld [vmem:[%s4957_s1 + $0xf8] sm:$0xff]  ;;  %v242_v19 = vld [vmem:[%s4957_s1 + $0x120] sm:$0xff]  ;;  %v2669_v20 = vpack.c.bf16 %v231_v17, %v226_v16  ;;  %v236_v22 = vld [vmem:[%s4957_s1 + $0xf0] sm:$0xff]  ;;  %s2454_s22 = sshll.u32 %s5456_s20, 3 }
  0x12   : > { %2664 = vmatprep.subr.bf16.mxu0 %v2663_v9  ;;  %2708 = vmatprep.subr.bf16.mxu1 %v2663_v9  ;;  %v2671_v21 = vpack.c.bf16 %v242_v19, %v237_v18  ;;  %v241_v23 = vld [vmem:[%s4957_s1 + $0x118] sm:$0xff]  ;;  %s2821_s25 = scalar_lea.vmem %s4956_s0, %s2454_s22  ;;  %v214_v58 = vld [vmem:[%s4957_s1 + $0x40] sm:$0xff]  ;;  %v208_v59 = vld [vmem:[%s4957_s1 + $0x10] sm:$0xff]  ;;  %v248_v18 = vlaneseq  ;;  %s4720_s5 = scalar_lea.vmem %s4959_s3, %s2454_s22 }
  0x13   : > { %v2673_v24 = vpack.c.bf16 %v241_v23, %v236_v22  ;;  %v2824_v25 = vld [vmem:[%s2821_s25] sm:$0xff]  ;;  %v2836_v27 = vld [vmem:[%s2821_s25 + $0x8] sm:$0xff]  ;;  %v2847_v29 = vld [vmem:[%s2821_s25 + $0x10] sm:$0xff] }
  0x14   : > { %v2827_v26 = vld [vmem:[%s2821_s25 + $0xc0] sm:$0xff]  ;;  %v2839_v28 = vld [vmem:[%s2821_s25 + $0xc8] sm:$0xff]  ;;  %v2851_v30 = vld [vmem:[%s2821_s25 + $0xd0] sm:$0xff]  ;;  %v3064_v19 = vshrl.u32 %v248_v18, 7  ;;  %v3075_v22 = vand.u32 127, %v248_v18 }
  0x15   : > { %2666 = vmatpush1.bf16.msra.mxu0 %v2665_v14  ;;  %2712 = vmatpush1.bf16.msra.mxu1 %v2665_v14  ;;  %v2859_v31 = vld [vmem:[%s2821_s25 + $0x18] sm:$0xff]  ;;  %v2871_v33 = vld [vmem:[%s2821_s25 + $0x20] sm:$0xff]  ;;  %v2883_v35 = vld [vmem:[%s2821_s25 + $0x28] sm:$0xff] }
  0x16   : > { %2668 = vmatprep.subr.bf16.mxu0 %v2667_v15  ;;  %2709 = vmatprep.subr.bf16.mxu1 %v2667_v15  ;;  %v2863_v32 = vld [vmem:[%s2821_s25 + $0xd8] sm:$0xff]  ;;  %v2875_v34 = vld [vmem:[%s2821_s25 + $0xe0] sm:$0xff]  ;;  %v2887_v36 = vld [vmem:[%s2821_s25 + $0xe8] sm:$0xff]  ;;  %4987 = vst [vmem:[#allocation2_spill] sm:$0xff] %v3064_v19  ;;  %vm1111_vm1 = vcmp.lt.s32.totalorder %v3075_v22, 4 }
  0x17   : > { %v2895_v37 = vld [vmem:[%s2821_s25 + $0x30] sm:$0xff]  ;;  %v2907_v39 = vld [vmem:[%s2821_s25 + $0x38] sm:$0xff]  ;;  %v2919_v41 = vld [vmem:[%s2821_s25 + $0x40] sm:$0xff] }
  0x18   : > { %v2899_v38 = vld [vmem:[%s2821_s25 + $0xf0] sm:$0xff]  ;;  %v2911_v40 = vld [vmem:[%s2821_s25 + $0xf8] sm:$0xff]  ;;  %v2926_v42 = vld [vmem:[%s2821_s25 + $0x48] sm:$0xff] }
  0x19   : > { %2670 = vmatpush1.bf16.msra.mxu0 %v2669_v20  ;;  %2713 = vmatpush1.bf16.msra.mxu1 %v2669_v20  ;;  %v2932_v43 = vld [vmem:[%s2821_s25 + $0x50] sm:$0xff]  ;;  %v2938_v44 = vld [vmem:[%s2821_s25 + $0x58] sm:$0xff]  ;;  %v2944_v45 = vld [vmem:[%s2821_s25 + $0x60] sm:$0xff]  ;;  %v250_v20 = vsub.s32 0, %v3064_v19 }
  0x1a   : > { %2672 = vmatprep.subr.bf16.mxu0 %v2671_v21  ;;  %2710 = vmatprep.subr.bf16.mxu1 %v2671_v21  ;;  %v2950_v46 = vld [vmem:[%s2821_s25 + $0x68] sm:$0xff]  ;;  %v2956_v47 = vld [vmem:[%s2821_s25 + $0x70] sm:$0xff]  ;;  %v2962_v48 = vld [vmem:[%s2821_s25 + $0x78] sm:$0xff] }
  0x1b   : > { %v2968_v49 = vld [vmem:[%s2821_s25 + $0x80] sm:$0xff]  ;;  %v2974_v50 = vld [vmem:[%s2821_s25 + $0x88] sm:$0xff]  ;;  %v2980_v51 = vld [vmem:[%s2821_s25 + $0x90] sm:$0xff] }
  0x1c   : > { %v2986_v52 = vld [vmem:[%s2821_s25 + $0x98] sm:$0xff]  ;;  %v2992_v53 = vld [vmem:[%s2821_s25 + $0xa0] sm:$0xff]  ;;  %v2998_v54 = vld [vmem:[%s2821_s25 + $0xa8] sm:$0xff] }
  0x1d   : > { %2674 = vmatpush1.bf16.msra.mxu0 %v2673_v24  ;;  %2714 = vmatpush1.bf16.msra.mxu1 %v2673_v24  ;;  %v3004_v55 = vld [vmem:[%s2821_s25 + $0xb0] sm:$0xff]  ;;  %v3010_v56 = vld [vmem:[%s2821_s25 + $0xb8] sm:$0xff]  ;;  %v219_v62 = vld [vmem:[%s4957_s1 + $0x68] sm:$0xff] }
  0x1e   : > { %v209_v57 = vld [vmem:[%s4957_s1 + $0x18] sm:$0xff]  ;;  %v224_v63 = vld [vmem:[%s4957_s1 + $0x90] sm:$0xff]  ;;  %v218_v2 = vld [vmem:[%s4957_s1 + $0x60] sm:$0xff] }
  0x1f   : > { %v2675_v60 = vpack.c.bf16 %v214_v58, %v209_v57  ;;  %v213_v61 = vld [vmem:[%s4957_s1 + $0x38] sm:$0xff]  ;;  %v2679_v1 = vpack.c.bf16 %v224_v63, %v219_v62  ;;  %v223_v3 = vld [vmem:[%s4957_s1 + $0x88] sm:$0xff]  ;;  %v234_v5 = vld [vmem:[%s4957_s1 + $0xe0] sm:$0xff] }
  0x20   : > { %2457 = vmatmul.mubr.msk.f32.vlgmr.msra.gmra.mrb[0].mxu0 %vm273_vm0, %v2824_v25  ;;  %2481 = vmatmul.mubr.msk.f32.vlgmr.msra.gmra.mrb[0].mxu1 %vm273_vm0, %v2827_v26  ;;  %v2677_v0 = vpack.c.bf16 %v213_v61, %v208_v59  ;;  %v229_v4 = vld [vmem:[%s4957_s1 + $0xb8] sm:$0xff]  ;;  %v2681_v6 = vpack.c.bf16 %v223_v3, %v218_v2  ;;  %v228_v9 = vld [vmem:[%s4957_s1 + $0xb0] sm:$0xff]  ;;  %v239_v11 = vld [vmem:[%s4957_s1 + $0x108] sm:$0xff] }
  0x21   : > { %440 = vmatprep.mubr.f32.mxu0 %v4960_v7  ;;  %584 = vmatprep.mubr.f32.mxu1 %v4960_v7  ;;  %v2683_v8 = vpack.c.bf16 %v234_v5, %v229_v4  ;;  %v233_v10 = vld [vmem:[%s4957_s1 + $0xd8] sm:$0xff]  ;;  %v244_v12 = vld [vmem:[%s4957_s1 + $0x130] sm:$0xff]  ;;  %v238_v15 = vld [vmem:[%s4957_s1 + $0x100] sm:$0xff] }
  0x22   : > { %2676 = vmatprep.subr.bf16.mxu1 %v2675_v60  ;;  %v2685_v13 = vpack.c.bf16 %v233_v10, %v228_v9  ;;  %v2687_v14 = vpack.c.bf16 %v244_v12, %v239_v11  ;;  %v243_v16 = vld [vmem:[%s4957_s1 + $0x128] sm:$0xff]  ;;  %v246_v21 = vld [vmem:[%s4958_s2] sm:$0x1f] }
  0x23   : > { %2678 = vmatpush1.bf16.msra.mxu1 %v2677_v0  ;;  %v2689_v17 = vpack.c.bf16 %v243_v16, %v238_v15  ;;  %v3078_v23 = vrot.slane %v246_v21, %v250_v20 }
  0x24   : > { %2458 = vmatmul.mubr.msk.f32.gmra.mrb[2].mxu0 %vm273_vm0, %v2836_v27  ;;  %2482 = vmatmul.mubr.msk.f32.gmra.mrb[2].mxu1 %vm273_vm0, %v2839_v28 }
  0x25   : > { %446 = vmatprep.mubr.f32.mxu0 %v4960_v7  ;;  %590 = vmatprep.mubr.f32.mxu1 %v4960_v7 }
  0x26   : > { %2680 = vmatprep.subr.bf16.mxu1 %v2679_v1 }
  0x27   : > { %2682 = vmatpush1.bf16.msra.mxu1 %v2681_v6 }
  0x28   : > { %2459 = vmatmul.mubr.msk.f32.gmra.mrb[4].mxu0 %vm273_vm0, %v2847_v29  ;;  %2483 = vmatmul.mubr.msk.f32.gmra.mrb[4].mxu1 %vm273_vm0, %v2851_v30 }
  0x29   : > { %452 = vmatprep.mubr.f32.mxu0 %v4960_v7  ;;  %596 = vmatprep.mubr.f32.mxu1 %v4960_v7 }
  0x2a   : > { %2684 = vmatprep.subr.bf16.mxu1 %v2683_v8 }
  0x2b   : > { %2686 = vmatpush1.bf16.msra.mxu1 %v2685_v13 }
  0x2c   : > { %2460 = vmatmul.mubr.msk.f32.gmra.mrb[6].mxu0 %vm273_vm0, %v2859_v31  ;;  %2484 = vmatmul.mubr.msk.f32.gmra.mrb[6].mxu1 %vm273_vm0, %v2863_v32 }
  0x2d   : > { %458 = vmatprep.mubr.f32.mxu0 %v4960_v7  ;;  %602 = vmatprep.mubr.f32.mxu1 %v4960_v7 }
  0x2e   : > { %2688 = vmatprep.subr.bf16.mxu1 %v2687_v14 }
  0x2f   : > { %2690 = vmatpush1.bf16.msra.mxu1 %v2689_v17 }
  0x30   : > { %2461 = vmatmul.mubr.msk.f32.gmra.mrb[8].mxu0 %vm273_vm0, %v2871_v33  ;;  %2485 = vmatmul.mubr.msk.f32.gmra.mrb[8].mxu1 %vm273_vm0, %v2875_v34 }
  0x31   : > { %464 = vmatprep.mubr.f32.mxu0 %v4960_v7  ;;  %608 = vmatprep.mubr.f32.mxu1 %v4960_v7 }
  0x34   : > { %2462 = vmatmul.mubr.msk.f32.gmra.mrb[10].mxu0 %vm273_vm0, %v2883_v35  ;;  %2486 = vmatmul.mubr.msk.f32.gmra.mrb[10].mxu1 %vm273_vm0, %v2887_v36 }
  0x35   : > { %470 = vmatprep.mubr.f32.mxu0 %v4960_v7  ;;  %614 = vmatprep.mubr.f32.mxu1 %v4960_v7 }
  0x38   : > { %2463 = vmatmul.mubr.msk.f32.gmra.mrb[12].mxu0 %vm273_vm0, %v2895_v37  ;;  %2487 = vmatmul.mubr.msk.f32.gmra.mrb[12].mxu1 %vm273_vm0, %v2899_v38 }
  0x39   : > { %476 = vmatprep.mubr.f32.mxu0 %v4960_v7  ;;  %620 = vmatprep.mubr.f32.mxu1 %v4960_v7 }
  0x3c   : > { %2464 = vmatmul.mubr.msk.f32.gmra.mrb[14].mxu0 %vm273_vm0, %v2907_v39  ;;  %2488 = vmatmul.mubr.msk.f32.gmra.mrb[14].mxu1 %vm273_vm0, %v2911_v40 }
  0x3d   : > { %482 = vmatprep.mubr.f32.mxu0 %v4960_v7  ;;  %691 = vmatprep.mubr.f32.mxu1 %v4960_v7 }
  0x40   : > { %2465 = vmatmul.mubr.msk.f32.gmra.mrb[16].mxu0 %vm273_vm0, %v2919_v41  ;;  %2489 = vmatmul.mubr.msk.f32.vlgmr.msra.gmra.mrb[16].mxu1 %vm273_vm0, %v2824_v25 }
  0x41   : > { %488 = vmatprep.mubr.f32.mxu0 %v4960_v7  ;;  %697 = vmatprep.mubr.f32.mxu1 %v4960_v7 }
  0x44   : > { %2466 = vmatmul.mubr.msk.f32.gmra.mrb[18].mxu0 %vm273_vm0, %v2926_v42  ;;  %2490 = vmatmul.mubr.msk.f32.gmra.mrb[18].mxu1 %vm273_vm0, %v2836_v27 }
  0x45   : > { %494 = vmatprep.mubr.f32.mxu0 %v4960_v7  ;;  %703 = vmatprep.mubr.f32.mxu1 %v4960_v7 }
  0x48   : > { %2467 = vmatmul.mubr.msk.f32.gmra.mrb[20].mxu0 %vm273_vm0, %v2932_v43  ;;  %2491 = vmatmul.mubr.msk.f32.gmra.mrb[20].mxu1 %vm273_vm0, %v2847_v29 }
  0x49   : > { %500 = vmatprep.mubr.f32.mxu0 %v4960_v7  ;;  %709 = vmatprep.mubr.f32.mxu1 %v4960_v7 }
  0x4c   : > { %2468 = vmatmul.mubr.msk.f32.gmra.mrb[22].mxu0 %vm273_vm0, %v2938_v44  ;;  %2492 = vmatmul.mubr.msk.f32.gmra.mrb[22].mxu1 %vm273_vm0, %v2859_v31 }
  0x4d   : > { %506 = vmatprep.mubr.f32.mxu0 %v4960_v7  ;;  %715 = vmatprep.mubr.f32.mxu1 %v4960_v7 }
  0x50   : > { %2469 = vmatmul.mubr.msk.f32.gmra.mrb[24].mxu0 %vm273_vm0, %v2944_v45  ;;  %2493 = vmatmul.mubr.msk.f32.gmra.mrb[24].mxu1 %vm273_vm0, %v2871_v33 }
  0x51   : > { %512 = vmatprep.mubr.f32.mxu0 %v4960_v7  ;;  %721 = vmatprep.mubr.f32.mxu1 %v4960_v7 }
  0x54   : > { %2470 = vmatmul.mubr.msk.f32.gmra.mrb[26].mxu0 %vm273_vm0, %v2950_v46  ;;  %2494 = vmatmul.mubr.msk.f32.gmra.mrb[26].mxu1 %vm273_vm0, %v2883_v35 }
  0x55   : > { %518 = vmatprep.mubr.f32.mxu0 %v4960_v7  ;;  %727 = vmatprep.mubr.f32.mxu1 %v4960_v7 }
  0x58   : > { %2471 = vmatmul.mubr.msk.f32.gmra.mrb[28].mxu0 %vm273_vm0, %v2956_v47  ;;  %2495 = vmatmul.mubr.msk.f32.gmra.mrb[28].mxu1 %vm273_vm0, %v2895_v37 }
  0x59   : > { %524 = vmatprep.mubr.f32.mxu0 %v4960_v7  ;;  %733 = vmatprep.mubr.f32.mxu1 %v4960_v7 }
  0x5c   : > { %2472 = vmatmul.mubr.msk.f32.gmra.mrb[30].mxu0 %vm273_vm0, %v2962_v48  ;;  %2496 = vmatmul.mubr.msk.f32.gmra.mrb[30].mxu1 %vm273_vm0, %v2907_v39 }
  0x5d   : > { %530 = vmatprep.mubr.f32.mxu0 %v4960_v7  ;;  %739 = vmatprep.mubr.f32.mxu1 %v4960_v7 }
  0x60   : > { %2473 = vmatmul.mubr.msk.f32.gmra.mrb[32].mxu0 %vm273_vm0, %v2968_v49  ;;  %2497 = vmatmul.mubr.msk.f32.gmra.mrb[32].mxu1 %vm273_vm0, %v2919_v41 }
  0x61   : > { %536 = vmatprep.mubr.f32.mxu0 %v4960_v7 }
  0x64   : > { %2474 = vmatmul.mubr.msk.f32.gmra.mrb[34].mxu0 %vm273_vm0, %v2974_v50 }
  0x65   : > { %542 = vmatprep.mubr.f32.mxu0 %v4960_v7 }
  0x68   : > { %2475 = vmatmul.mubr.msk.f32.gmra.mrb[36].mxu0 %vm273_vm0, %v2980_v51 }
  0x69   : > { %548 = vmatprep.mubr.f32.mxu0 %v4960_v7 }
  0x6c   : > { %2476 = vmatmul.mubr.msk.f32.gmra.mrb[38].mxu0 %vm273_vm0, %v2986_v52 }
  0x6d   : > { %554 = vmatprep.mubr.f32.mxu0 %v4960_v7 }
  0x70   : > { %2477 = vmatmul.mubr.msk.f32.gmra.mrb[40].mxu0 %vm273_vm0, %v2992_v53 }
  0x71   : > { %560 = vmatprep.mubr.f32.mxu0 %v4960_v7 }
  0x74   : > { %2478 = vmatmul.mubr.msk.f32.gmra.mrb[42].mxu0 %vm273_vm0, %v2998_v54 }
  0x75   : > { %566 = vmatprep.mubr.f32.mxu0 %v4960_v7 }
  0x78   : > { %2479 = vmatmul.mubr.msk.f32.gmra.mrb[44].mxu0 %vm273_vm0, %v3004_v55 }
  0x79   : > { %572 = vmatprep.mubr.f32.mxu0 %v4960_v7 }
  0x7c   : > { %2480 = vmatmul.mubr.msk.f32.gmra.mrb[46].mxu0 %vm273_vm0, %v3010_v56 }
  0x7d   : > { %2611 = vmatprep.mubr.msk.f32.mxu0 %vm273_vm0, %v2824_v25 }
  0xf3   : > { %v436_v24 = vpop.f32.mrb[0].mxu0  ;;  %v580_v25 = vpop.f32.mrb[0].mxu1 }
  0xf4   : > { %v437_v57 = vadd.f32 %v436_v24, %v3078_v23  ;;  %v3085_v58 = vpop.f32.mrb[1].mxu0  ;;  %v581_v59 = vadd.f32 %v580_v25, %v3078_v23  ;;  %v3088_v60 = vpop.f32.mrb[1].mxu1 }
  0xf5   : > { %4988 = vst [vmem:[#allocation3_spill] sm:$0xff] %v3085_v58  ;;  %4989 = vst [vmem:[#allocation4_spill] sm:$0xff] %v3088_v60 }
  0xf6   : > { %v3092_v61 = vsel %vm1111_vm1, %v437_v57, -inf  ;;  %v3103_v2 = vsel %vm1111_vm1, %v581_v59, -inf }
  0xf7   : > { %v442_v62 = vpop.f32.mrb[2].mxu0  ;;  %v586_v63 = vpop.f32.mrb[2].mxu1  ;;  %1144 = vmax.xlane.f32.xlu0 %v3092_v61 }
  0xf8   : > { %v587_v0 = vadd.f32 %v586_v63, %v3078_v23  ;;  %v3099_v1 = vpop.f32.mrb[3].mxu0  ;;  %v3105_v3 = vpop.f32.mrb[3].mxu1  ;;  %v443_v4 = vadd.f32 %v442_v62, %v3078_v23 }
  0xf9   : > { %4990 = vst [vmem:[#allocation5_spill] sm:$0xff] %v3099_v1  ;;  %4991 = vst [vmem:[#allocation6_spill] sm:$0xff] %v3105_v3 }
  0xfa   : > { %v3110_v5 = vsel %vm1111_vm1, %v587_v0, -inf  ;;  %v3129_v14 = vsel %vm1111_vm1, %v443_v4, -inf }
  0xfb   : > { %1194 = vmax.xlane.f32.xlu1 %v3110_v5  ;;  %v448_v6 = vpop.f32.mrb[4].mxu0  ;;  %1192 = vmax.xlane.f32.xlu0 %v3103_v2  ;;  %v592_v8 = vpop.f32.mrb[4].mxu1 }
  0xfc   : > { %v449_v9 = vadd.f32 %v448_v6, %v3078_v23  ;;  %v3117_v10 = vpop.f32.mrb[5].mxu0  ;;  %v593_v11 = vadd.f32 %v592_v8, %v3078_v23  ;;  %v3120_v12 = vpop.f32.mrb[5].mxu1 }
  0xfd   : > { %4992 = vst [vmem:[#allocation7_spill] sm:$0xff] %v3117_v10  ;;  %4993 = vst [vmem:[#allocation8_spill] sm:$0xff] %v3120_v12 }
  0xfe   : > { %v3125_v13 = vsel %vm1111_vm1, %v449_v9, -inf  ;;  %v3141_v21 = vsel %vm1111_vm1, %v593_v11, -inf }
  0xff   : > { %v454_v15 = vpop.f32.mrb[6].mxu0  ;;  %1148 = vmax.xlane.f32.xlu1 %v3125_v13  ;;  %1146 = vmax.xlane.f32.xlu0 %v3129_v14  ;;  %v598_v16 = vpop.f32.mrb[6].mxu1 }
 0x100   : > { %v455_v17 = vadd.f32 %v454_v15, %v3078_v23  ;;  %v3136_v18 = vpop.f32.mrb[7].mxu0  ;;  %v599_v20 = vadd.f32 %v598_v16, %v3078_v23  ;;  %v3143_v24 = vpop.f32.mrb[7].mxu1 }
 0x101   : > { %4994 = vst [vmem:[#allocation9_spill] sm:$0xff] %v3136_v18  ;;  %4995 = vst [vmem:[#allocation10_spill] sm:$0xff] %v3143_v24 }
 0x102   : > { %v3148_v25 = vsel %vm1111_vm1, %v455_v17, -inf  ;;  %v3160_v4 = vsel %vm1111_vm1, %v599_v20, -inf }
 0x103   : > { %v460_v57 = vpop.f32.mrb[8].mxu0  ;;  %1150 = vmax.xlane.f32.xlu1 %v3148_v25  ;;  %1196 = vmax.xlane.f32.xlu0 %v3141_v21  ;;  %v604_v59 = vpop.f32.mrb[8].mxu1 }
 0x104   : > { %v461_v62 = vadd.f32 %v460_v57, %v3078_v23  ;;  %v3155_v63 = vpop.f32.mrb[9].mxu0  ;;  %v605_v0 = vadd.f32 %v604_v59, %v3078_v23  ;;  %v3162_v6 = vpop.f32.mrb[9].mxu1 }
 0x105   : > { %4996 = vst [vmem:[#allocation11_spill] sm:$0xff] %v3155_v63  ;;  %4997 = vst [vmem:[#allocation12_spill] sm:$0xff] %v3162_v6 }
 0x106   : > { %v3167_v8 = vsel %vm1111_vm1, %v461_v62, -inf  ;;  %v3179_v20 = vsel %vm1111_vm1, %v605_v0, -inf }
 0x107   : > { %v466_v9 = vpop.f32.mrb[10].mxu0  ;;  %1198 = vmax.xlane.f32.xlu1 %v3160_v4  ;;  %1152 = vmax.xlane.f32.xlu0 %v3167_v8  ;;  %v610_v11 = vpop.f32.mrb[10].mxu1 }
 0x108   : > { %v467_v15 = vadd.f32 %v466_v9, %v3078_v23  ;;  %v3174_v16 = vpop.f32.mrb[11].mxu0  ;;  %v611_v17 = vadd.f32 %v610_v11, %v3078_v23  ;;  %v3181_v57 = vpop.f32.mrb[11].mxu1 }
 0x109   : > { %4998 = vst [vmem:[#allocation13_spill] sm:$0xff] %v3174_v16  ;;  %4999 = vst [vmem:[#allocation14_spill] sm:$0xff] %v3181_v57  ;;  %v5002_v57 = vmov 0.0  }
 0x10a   : > { %v3186_v59 = vsel %vm1111_vm1, %v467_v15, -inf  ;;  %v3199_v7 = vsel %vm1111_vm1, %v611_v17, -inf  ;;  %745 = vmatprep.mubr.f32.mxu1 %v5002_v57 }
 0x10b   : > { %v472_v62 = vpop.f32.mrb[12].mxu0  ;;  %1154 = vmax.xlane.f32.xlu1 %v3186_v59  ;;  %1200 = vmax.xlane.f32.xlu0 %v3179_v20  ;;  %v3192_v9 = vpop.f32.mrb[12].mxu1 }
 0x10c   : > { %v473_v0 = vadd.f32 %v472_v62, %v3078_v23  ;;  %v3195_v11 = vpop.f32.mrb[13].mxu0  ;;  %v3201_v15 = vpop.f32.mrb[13].mxu1  ;;  %2498 = vmatmul.mubr.msk.f32.gmra.mrb[34].mxu1 %vm273_vm0, %v2926_v42 }
 0x10d   : > { %5000 = vst [vmem:[#allocation15_spill] sm:$0xff] %v3195_v11  ;;  %5001 = vst [vmem:[#allocation16_spill] sm:$0xff] %v3201_v15  ;;  %751 = vmatprep.mubr.f32.mxu1 %v5002_v57 }
 0x10e   : > { %v3206_v6 = vsel %vm1111_vm1, %v473_v0, -inf }
 0x10f   : > { %v478_v16 = vpop.f32.mrb[14].mxu0  ;;  %1202 = vmax.xlane.f32.xlu1 %v3199_v7  ;;  %1156 = vmax.xlane.f32.xlu0 %v3206_v6  ;;  %v3212_v62 = vpop.f32.mrb[14].mxu1 }
 0x110   : > { %v479_v17 = vadd.f32 %v478_v16, %v3078_v23  ;;  %v3215_v11 = vpop.f32.mrb[15].mxu0  ;;  %v3217_v15 = vpop.f32.mrb[15].mxu1  ;;  %2499 = vmatmul.mubr.msk.f32.gmra.mrb[36].mxu1 %vm273_vm0, %v2932_v43 }
 0x111   : > { %5003 = vst [vmem:[#allocation17_spill] sm:$0xff] %v3215_v11  ;;  %5004 = vst [vmem:[#allocation18_spill] sm:$0xff] %v3217_v15  ;;  %757 = vmatprep.mubr.f32.mxu1 %v5002_v57 }
 0x112   : > { %v3222_v0 = vsel %vm1111_vm1, %v479_v17, -inf }
 0x113   : > { %v484_v24 = vpop.f32.mrb[16].mxu0  ;;  %1158 = vmax.xlane.f32.xlu1 %v3222_v0 }
 0x114   : > { %v485_v16 = vadd.f32 %v484_v24, %v3078_v23  ;;  %v3229_v63 = vpop.f32.mrb[17].mxu0  ;;  %2500 = vmatmul.mubr.msk.f32.gmra.mrb[38].mxu1 %vm273_vm0, %v2938_v44  ;;  %v210_v24 = vld [vmem:[%s4957_s1 + $0x20] sm:$0xff] }
 0x115   : > { %5005 = vst [vmem:[#allocation19_spill] sm:$0xff] %v3229_v63  ;;  %763 = vmatprep.mubr.f32.mxu1 %v5002_v57 }
 0x116   : > { %v3233_v15 = vsel %vm1111_vm1, %v485_v16, -inf  ;;  %v215_v16 = vld [vmem:[%s4957_s1 + $0x48] sm:$0xff] }
 0x117   : > { %v490_v17 = vpop.f32.mrb[18].mxu0  ;;  %1160 = vmax.xlane.f32.xlu0 %v3233_v15  ;;  %v2691_v63 = vpack.c.bf16 %v215_v16, %v210_v24  ;;  %v220_v24 = vld [vmem:[%s4957_s1 + $0x70] sm:$0xff] }
 0x118   : > { %v491_v11 = vadd.f32 %v490_v17, %v3078_v23  ;;  %v3240_v18 = vpop.f32.mrb[19].mxu0  ;;  %2501 = vmatmul.mubr.msk.f32.gmra.mrb[40].mxu1 %vm273_vm0, %v2944_v45 }
 0x119   : > { %5006 = vst [vmem:[#allocation20_spill] sm:$0xff] %v3240_v18  ;;  %2692 = vmatprep.subr.bf16.mxu0 %v2691_v63  ;;  %769 = vmatprep.mubr.f32.mxu1 %v5002_v57 }
 0x11a   : > { %v3250_v12 = vsel %vm1111_vm1, %v491_v11, -inf  ;;  %2694 = vmatpush3.bf16.msra.mxu0 %v2691_v63  ;;  %v225_v11 = vld [vmem:[%s4957_s1 + $0x98] sm:$0xff] }
 0x11b   : > { %v496_v10 = vpop.f32.mrb[20].mxu0  ;;  %1162 = vmax.xlane.f32.xlu1 %v3250_v12  ;;  %v2695_v16 = vpack.c.bf16 %v225_v11, %v220_v24  ;;  %v230_v24 = vld [vmem:[%s4957_s1 + $0xc0] sm:$0xff] }
 0x11c   : > { %v497_v17 = vadd.f32 %v496_v10, %v3078_v23  ;;  %v3256_v18 = vpop.f32.mrb[21].mxu0  ;;  %2502 = vmatmul.mubr.msk.f32.gmra.mrb[42].mxu1 %vm273_vm0, %v2950_v46 }
 0x11d   : > { %5007 = vst [vmem:[#allocation21_spill] sm:$0xff] %v3256_v18  ;;  %2696 = vmatprep.subr.bf16.mxu0 %v2695_v16  ;;  %775 = vmatprep.mubr.f32.mxu1 %v5002_v57 }
 0x11e   : > { %v3267_v3 = vsel %vm1111_vm1, %v497_v17, -inf  ;;  %2698 = vmatpush3.bf16.msra.mxu0 %v2695_v16  ;;  %v235_v17 = vld [vmem:[%s4957_s1 + $0xe8] sm:$0xff] }
 0x11f   : > { %v502_v10 = vpop.f32.mrb[22].mxu0  ;;  %1164 = vmax.xlane.f32.xlu0 %v3267_v3  ;;  %v2699_v11 = vpack.c.bf16 %v235_v17, %v230_v24  ;;  %v240_v24 = vld [vmem:[%s4957_s1 + $0x110] sm:$0xff] }
 0x120   : > { %v503_v63 = vadd.f32 %v502_v10, %v3078_v23  ;;  %v3273_v18 = vpop.f32.mrb[23].mxu0  ;;  %2503 = vmatmul.mubr.msk.f32.gmra.mrb[44].mxu1 %vm273_vm0, %v2956_v47 }
 0x121   : > { %5008 = vst [vmem:[#allocation22_spill] sm:$0xff] %v3273_v18  ;;  %2700 = vmatprep.subr.bf16.mxu0 %v2699_v11  ;;  %781 = vmatprep.mubr.f32.mxu1 %v5002_v57 }
 0x122   : > { %v3284_v1 = vsel %vm1111_vm1, %v503_v63, -inf  ;;  %2702 = vmatpush3.bf16.msra.mxu0 %v2699_v11  ;;  %v245_v63 = vld [vmem:[%s4957_s1 + $0x138] sm:$0xff] }
 0x123   : > { %v508_v10 = vpop.f32.mrb[24].mxu0  ;;  %1166 = vmax.xlane.f32.xlu1 %v3284_v1  ;;  %v2703_v17 = vpack.c.bf16 %v245_v63, %v240_v24 }
 0x124   : > { %v509_v16 = vadd.f32 %v508_v10, %v3078_v23  ;;  %v3290_v18 = vpop.f32.mrb[25].mxu0  ;;  %2504 = vmatmul.mubr.msk.f32.gmra.mrb[46].mxu1 %vm273_vm0, %v2962_v48 }
 0x125   : > { %5009 = vst [vmem:[#allocation23_spill] sm:$0xff] %v3290_v18  ;;  %2704 = vmatprep.subr.bf16.mxu0 %v2703_v17  ;;  %787 = vmatprep.mubr.f32.mxu1 %v5002_v57 }
 0x126   : > { %v3301_v60 = vsel %vm1111_vm1, %v509_v16, -inf  ;;  %2706 = vmatpush3.bf16.msra.mxu0 %v2703_v17 }
 0x127   : > { %v514_v10 = vpop.f32.mrb[26].mxu0  ;;  %1168 = vmax.xlane.f32.xlu0 %v3301_v60 }
 0x128   : > { %v515_v11 = vadd.f32 %v514_v10, %v3078_v23  ;;  %v3307_v18 = vpop.f32.mrb[27].mxu0  ;;  %2505 = vmatmul.mubr.msk.f32.gmra.mrb[48].mxu1 %vm273_vm0, %v2968_v49 }
 0x129   : > { %5010 = vst [vmem:[#allocation24_spill] sm:$0xff] %v3307_v18  ;;  %2612 = vmatmul.mubr.msk.f32.vlgmr.msra.gmra.mrb[48].mxu0 %vm273_vm0, %v2836_v27  ;;  %793 = vmatprep.mubr.f32.mxu1 %v5002_v57 }
 0x12a   : > { %v3312_v24 = vsel %vm1111_vm1, %v515_v11, -inf  ;;  %2614 = vmatprep.mubr.msk.f32.mxu0 %vm273_vm0, %v2847_v29 }
 0x12b   : > { %v520_v16 = vpop.f32.mrb[28].mxu0  ;;  %1170 = vmax.xlane.f32.xlu1 %v3312_v24 }
 0x12c   : > { %v521_v63 = vadd.f32 %v520_v16, %v3078_v23  ;;  %v3320_v10 = vpop.f32.mrb[29].mxu0  ;;  %2506 = vmatmul.mubr.msk.f32.gmra.mrb[50].mxu1 %vm273_vm0, %v2974_v50 }
 0x12d   : > { %5011 = vst [vmem:[#allocation25_spill] sm:$0xff] %v3320_v10  ;;  %2615 = vmatmul.mubr.msk.f32.gmra.mrb[50].mxu0 %vm273_vm0, %v2859_v31  ;;  %799 = vmatprep.mubr.f32.mxu1 %v5002_v57 }
 0x12e   : > { %v3327_v17 = vsel %vm1111_vm1, %v521_v63, -inf  ;;  %2617 = vmatprep.mubr.msk.f32.mxu0 %vm273_vm0, %v2871_v33 }
 0x12f   : > { %v526_v11 = vpop.f32.mrb[30].mxu0  ;;  %1172 = vmax.xlane.f32.xlu0 %v3327_v17 }
 0x130   : > { %v527_v27 = vadd.f32 %v526_v11, %v3078_v23  ;;  %v3335_v16 = vpop.f32.mrb[31].mxu0  ;;  %2507 = vmatmul.mubr.msk.f32.gmra.mrb[52].mxu1 %vm273_vm0, %v2980_v51 }
 0x131   : > { %5012 = vst [vmem:[#allocation26_spill] sm:$0xff] %v3335_v16  ;;  %2618 = vmatmul.mubr.msk.f32.gmra.mrb[52].mxu0 %vm273_vm0, %v2883_v35  ;;  %805 = vmatprep.mubr.f32.mxu1 %v5002_v57 }
 0x132   : > { %v3342_v29 = vsel %vm1111_vm1, %v527_v27, -inf  ;;  %2620 = vmatprep.mubr.msk.f32.mxu0 %vm273_vm0, %v2895_v37 }
 0x133   : > { %v532_v63 = vpop.f32.mrb[32].mxu0  ;;  %1174 = vmax.xlane.f32.xlu1 %v3342_v29 }
 0x134   : > { %v533_v31 = vadd.f32 %v532_v63, %v3078_v23  ;;  %v3350_v11 = vpop.f32.mrb[33].mxu0  ;;  %2508 = vmatmul.mubr.msk.f32.gmra.mrb[54].mxu1 %vm273_vm0, %v2986_v52 }
 0x135   : > { %5013 = vst [vmem:[#allocation27_spill] sm:$0xff] %v3350_v11  ;;  %2621 = vmatmul.mubr.msk.f32.gmra.mrb[54].mxu0 %vm273_vm0, %v2907_v39  ;;  %811 = vmatprep.mubr.f32.mxu1 %v5002_v57 }
 0x136   : > { %v3357_v33 = vsel %vm1111_vm1, %v533_v31, -inf  ;;  %2623 = vmatprep.mubr.msk.f32.mxu0 %vm273_vm0, %v2919_v41 }
 0x137   : > { %v538_v27 = vpop.f32.mrb[34].mxu0  ;;  %1176 = vmax.xlane.f32.xlu0 %v3357_v33 }
 0x138   : > { %v539_v35 = vadd.f32 %v538_v27, %v3078_v23  ;;  %v3365_v63 = vpop.f32.mrb[35].mxu0  ;;  %2509 = vmatmul.mubr.msk.f32.gmra.mrb[56].mxu1 %vm273_vm0, %v2992_v53 }
 0x139   : > { %5014 = vst [vmem:[#allocation28_spill] sm:$0xff] %v3365_v63  ;;  %2624 = vmatmul.mubr.msk.f32.gmra.mrb[56].mxu0 %vm273_vm0, %v2926_v42  ;;  %817 = vmatprep.mubr.f32.mxu1 %v5002_v57 }
 0x13a   : > { %v3372_v37 = vsel %vm1111_vm1, %v539_v35, -inf  ;;  %2626 = vmatprep.mubr.msk.f32.mxu0 %vm273_vm0, %v2932_v43 }
 0x13b   : > { %v544_v31 = vpop.f32.mrb[36].mxu0  ;;  %1178 = vmax.xlane.f32.xlu1 %v3372_v37 }
 0x13c   : > { %v545_v39 = vadd.f32 %v544_v31, %v3078_v23  ;;  %v3380_v27 = vpop.f32.mrb[37].mxu0  ;;  %2510 = vmatmul.mubr.msk.f32.gmra.mrb[58].mxu1 %vm273_vm0, %v2998_v54 }
 0x13d   : > { %5015 = vst [vmem:[#allocation29_spill] sm:$0xff] %v3380_v27  ;;  %2627 = vmatmul.mubr.msk.f32.gmra.mrb[58].mxu0 %vm273_vm0, %v2938_v44  ;;  %823 = vmatprep.mubr.f32.mxu1 %v5002_v57 }
 0x13e   : > { %v3387_v41 = vsel %vm1111_vm1, %v545_v39, -inf  ;;  %2629 = vmatprep.mubr.msk.f32.mxu0 %vm273_vm0, %v2944_v45 }
 0x13f   : > { %v550_v35 = vpop.f32.mrb[38].mxu0  ;;  %1180 = vmax.xlane.f32.xlu0 %v3387_v41 }
 0x140   : > { %v551_v42 = vadd.f32 %v550_v35, %v3078_v23  ;;  %v3395_v31 = vpop.f32.mrb[39].mxu0  ;;  %2511 = vmatmul.mubr.msk.f32.gmra.mrb[60].mxu1 %vm273_vm0, %v3004_v55 }
 0x141   : > { %5016 = vst [vmem:[#allocation30_spill] sm:$0xff] %v3395_v31  ;;  %2630 = vmatmul.mubr.msk.f32.gmra.mrb[60].mxu0 %vm273_vm0, %v2950_v46  ;;  %829 = vmatprep.mubr.f32.mxu1 %v5002_v57 }
 0x142   : > { %v3402_v43 = vsel %vm1111_vm1, %v551_v42, -inf  ;;  %2632 = vmatprep.mubr.msk.f32.mxu0 %vm273_vm0, %v2956_v47 }
 0x143   : > { %v556_v39 = vpop.f32.mrb[40].mxu0  ;;  %1182 = vmax.xlane.f32.xlu1 %v3402_v43 }
 0x144   : > { %v557_v44 = vadd.f32 %v556_v39, %v3078_v23  ;;  %v3410_v35 = vpop.f32.mrb[41].mxu0  ;;  %2512 = vmatmul.mubr.msk.f32.gmra.mrb[62].mxu1 %vm273_vm0, %v3010_v56 }
 0x145   : > { %5017 = vst [vmem:[#allocation31_spill] sm:$0xff] %v3410_v35  ;;  %2633 = vmatmul.mubr.msk.f32.gmra.mrb[62].mxu0 %vm273_vm0, %v2962_v48  ;;  %835 = vmatprep.mubr.f32.mxu1 %v5002_v57 }
 0x146   : > { %v3417_v45 = vsel %vm1111_vm1, %v557_v44, -inf  ;;  %2635 = vmatprep.mubr.msk.f32.mxu0 %vm273_vm0, %v2968_v49  ;;  %v617_v49 = vadd.f32 %v3192_v9, %v3078_v23 }
 0x147   : > { %v562_v42 = vpop.f32.mrb[42].mxu0  ;;  %1184 = vmax.xlane.f32.xlu0 %v3417_v45 }
 0x148   : > { %v563_v46 = vadd.f32 %v562_v42, %v3078_v23  ;;  %v3425_v39 = vpop.f32.mrb[43].mxu0  ;;  %2513 = vmatmul.mubr.msk.f32.gmra.mrb[64].mxu1 %vm273_vm0, %v2827_v26 }
 0x149   : > { %5018 = vst [vmem:[#allocation32_spill] sm:$0xff] %v3425_v39  ;;  %2636 = vmatmul.mubr.msk.f32.gmra.mrb[64].mxu0 %vm273_vm0, %v2974_v50  ;;  %841 = vmatprep.mubr.f32.mxu1 %v5002_v57 }
 0x14a   : > { %v3432_v47 = vsel %vm1111_vm1, %v563_v46, -inf  ;;  %2638 = vmatprep.mubr.msk.f32.mxu0 %vm273_vm0, %v2980_v51  ;;  %v623_v51 = vadd.f32 %v3212_v62, %v3078_v23 }
 0x14b   : > { %v568_v44 = vpop.f32.mrb[44].mxu0  ;;  %1186 = vmax.xlane.f32.xlu1 %v3432_v47 }
 0x14c   : > { %v569_v48 = vadd.f32 %v568_v44, %v3078_v23  ;;  %v3440_v42 = vpop.f32.mrb[45].mxu0  ;;  %2514 = vmatmul.mubr.msk.f32.gmra.mrb[66].mxu1 %vm273_vm0, %v2839_v28 }
 0x14d   : > { %5019 = vst [vmem:[#allocation33_spill] sm:$0xff] %v3440_v42  ;;  %2639 = vmatmul.mubr.msk.f32.gmra.mrb[66].mxu0 %vm273_vm0, %v2986_v52  ;;  %847 = vmatprep.mubr.f32.mxu1 %v5002_v57  ;;  %v3478_v52 = vsel %vm1111_vm1, %v623_v51, -inf }
 0x14e   : > { %v3449_v46 = vsel %vm1111_vm1, %v569_v48, -inf  ;;  %v3463_v48 = vsel %vm1111_vm1, %v617_v49, -inf  ;;  %2641 = vmatprep.mubr.msk.f32.mxu0 %vm273_vm0, %v2992_v53 }
 0x14f   : > { %v574_v50 = vpop.f32.mrb[46].mxu0  ;;  %1188 = vmax.xlane.f32.xlu0 %v3449_v46 }
 0x150   : > { %v575_v9 = vadd.f32 %v574_v50, %v3078_v23  ;;  %v3457_v44 = vpop.f32.mrb[47].mxu0  ;;  %2515 = vmatmul.mubr.msk.f32.gmra.mrb[68].mxu1 %vm273_vm0, %v2851_v30 }
 0x151   : > { %5020 = vst [vmem:[#allocation34_spill] sm:$0xff] %v3457_v44  ;;  %2642 = vmatmul.mubr.msk.f32.gmra.mrb[68].mxu0 %vm273_vm0, %v2998_v54  ;;  %853 = vmatprep.mubr.f32.mxu1 %v5002_v57 }
 0x152   : > { %v3470_v42 = vsel %vm1111_vm1, %v575_v9, -inf  ;;  %2644 = vmatprep.mubr.msk.f32.mxu0 %vm273_vm0, %v3004_v55 }
 0x153   : > { %1190 = vmax.xlane.f32.xlu1 %v3470_v42  ;;  %1204 = vmax.xlane.f32.xlu0 %v3463_v48 }
 0x154   : > { %2516 = vmatmul.mubr.msk.f32.gmra.mrb[70].mxu1 %vm273_vm0, %v2863_v32 }
 0x155   : > { %859 = vmatprep.mubr.f32.mxu1 %v5002_v57  ;;  %2645 = vmatmul.mubr.msk.f32.gmra.mrb[70].mxu0 %vm273_vm0, %v3010_v56 }
 0x156   : > { %2647 = vmatprep.mubr.msk.f32.mxu0 %vm273_vm0, %v2827_v26 }
 0x157   : > { %1206 = vmax.xlane.f32.xlu1 %v3478_v52 }
 0x158   : > { %2517 = vmatmul.mubr.msk.f32.gmra.mrb[72].mxu1 %vm273_vm0, %v2875_v34 }
 0x159   : > { %865 = vmatprep.mubr.f32.mxu1 %v5002_v57  ;;  %2648 = vmatmul.mubr.msk.f32.gmra.mrb[72].mxu0 %vm273_vm0, %v2839_v28 }
 0x15a   : > { %2650 = vmatprep.mubr.msk.f32.mxu0 %vm273_vm0, %v2851_v30 }
 0x15c   : > { %2518 = vmatmul.mubr.msk.f32.gmra.mrb[74].mxu1 %vm273_vm0, %v2887_v36 }
 0x15d   : > { %871 = vmatprep.mubr.f32.mxu1 %v5002_v57  ;;  %2651 = vmatmul.mubr.msk.f32.gmra.mrb[74].mxu0 %vm273_vm0, %v2863_v32 }
 0x15e   : > { %2653 = vmatprep.mubr.msk.f32.mxu0 %vm273_vm0, %v2875_v34 }
 0x160   : > { %2519 = vmatmul.mubr.msk.f32.gmra.mrb[76].mxu1 %vm273_vm0, %v2899_v38 }
 0x161   : > { %877 = vmatprep.mubr.f32.mxu1 %v5002_v57  ;;  %2654 = vmatmul.mubr.msk.f32.gmra.mrb[76].mxu0 %vm273_vm0, %v2887_v36 }
 0x162   : > { %2656 = vmatprep.mubr.msk.f32.mxu0 %vm273_vm0, %v2899_v38 }
 0x164   : > { %2520 = vmatmul.mubr.msk.f32.gmra.mrb[78].mxu1 %vm273_vm0, %v2911_v40 }
 0x165   : > { %2657 = vmatmul.mubr.msk.f32.gmra.mrb[78].mxu0 %vm273_vm0, %v2911_v40 }
 0x184   : > { %v1145_v26 = vpop.xlane.xlu0 %1144 }
 0x185   : > { %vm1208_vm2 = vcmp.ge.f32.partialorder %v3092_v61, %v1145_v26 }
 0x186   : > { %v3520_v28 = vsel %vm1208_vm2, %v3075_v22, 128 }
 0x187   : > { %v1273_v30 = vshra.s32 %v3520_v28, 16 }
 0x188   : > { %v1195_v32 = vpop.xlane.xlu1 %1194  ;;  %v1193_v34 = vpop.xlane.xlu0 %1192 }
 0x189   : > { %vm1232_vm3 = vcmp.ge.f32.partialorder %v3103_v2, %v1193_v34  ;;  %v3524_v36 = vcvt.s32.f32 %v1273_v30  ;;  %vm1233_vm4 = vcmp.ge.f32.partialorder %v3110_v5, %v1195_v32 }
 0x18a   : > { %v3528_v38 = vsel %vm1232_vm3, %v3075_v22, 128  ;;  %v3533_v55 = vsel %vm1233_vm4, %v3075_v22, 128 }
 0x18b   : > { %1276 = vmin.xlane.f32.xlu0 %v3524_v36  ;;  %v1609_v40 = vshra.s32 %v3528_v38, 16 }
 0x18c   : > { %v1149_v53 = vpop.xlane.xlu1 %1148  ;;  %v1147_v54 = vpop.xlane.xlu0 %1146 }
 0x18d   : > { %vm1210_vm5 = vcmp.ge.f32.partialorder %v3125_v13, %v1149_v53  ;;  %vm1209_vm6 = vcmp.ge.f32.partialorder %v3129_v14, %v1147_v54  ;;  %v3537_v56 = vcvt.s32.f32 %v1609_v40  ;;  %v1623_v13 = vshra.s32 %v3533_v55, 16 }
 0x18e   : > { %v3540_v23 = vsel %vm1210_vm5, %v3075_v22, 128  ;;  %v3543_v61 = vsel %vm1209_vm6, %v3075_v22, 128 }
 0x18f   : > { %1612 = vmin.xlane.f32.xlu0 %v3537_v56  ;;  %v1301_v2 = vshra.s32 %v3540_v23, 16  ;;  %v1287_v5 = vshra.s32 %v3543_v61, 16  ;;  %v3564_v30 = vcvt.s32.f32 %v1623_v13 }
 0x190   : > { %v1151_v57 = vpop.xlane.xlu1 %1150  ;;  %v1197_v62 = vpop.xlane.xlu0 %1196 }
 0x191   : > { %vm1211_vm7 = vcmp.ge.f32.partialorder %v3148_v25, %v1151_v57  ;;  %vm1234_vm8 = vcmp.ge.f32.partialorder %v3141_v21, %v1197_v62  ;;  %v3551_v14 = vcvt.s32.f32 %v1301_v2  ;;  %v3553_v49 = vcvt.s32.f32 %v1287_v5 }
 0x192   : > { %v3556_v50 = vsel %vm1211_vm7, %v3075_v22, 128  ;;  %v3559_v9 = vsel %vm1234_vm8, %v3075_v22, 128 }
 0x193   : > { %1304 = vmin.xlane.f32.xlu0 %v3551_v14  ;;  %1290 = vmin.xlane.f32.xlu1 %v3553_v49  ;;  %v1637_v51 = vshra.s32 %v3559_v9, 16  ;;  %v1315_v32 = vshra.s32 %v3556_v50, 16 }
 0x194   : > { %v1199_v26 = vpop.xlane.xlu1 %1198  ;;  %v1153_v25 = vpop.xlane.xlu0 %1152 }
 0x195   : > { %vm1235_vm9 = vcmp.ge.f32.partialorder %v3160_v4, %v1199_v26  ;;  %vm1212_vm10 = vcmp.ge.f32.partialorder %v3167_v8, %v1153_v25  ;;  %v3568_v21 = vcvt.s32.f32 %v1637_v51  ;;  %v3583_v2 = vcvt.s32.f32 %v1315_v32 }
 0x196   : > { %v3572_v34 = vsel %vm1235_vm9, %v3075_v22, 128  ;;  %v3575_v40 = vsel %vm1212_vm10, %v3075_v22, 128 }
 0x197   : > { %1626 = vmin.xlane.f32.xlu1 %v3564_v30  ;;  %1640 = vmin.xlane.f32.xlu0 %v3568_v21  ;;  %v1329_v53 = vshra.s32 %v3575_v40, 16  ;;  %v1651_v8 = vshra.s32 %v3572_v34, 16 }
 0x198   : > { %v1155_v54 = vpop.xlane.xlu1 %1154  ;;  %v1201_v4 = vpop.xlane.xlu0 %1200 }
 0x199   : > { %vm1213_vm11 = vcmp.ge.f32.partialorder %v3186_v59, %v1155_v54  ;;  %vm1236_vm12 = vcmp.ge.f32.partialorder %v3179_v20, %v1201_v4  ;;  %v3585_v5 = vcvt.s32.f32 %v1329_v53  ;;  %v3596_v26 = vcvt.s32.f32 %v1651_v8 }
 0x19a   : > { %v3588_v57 = vsel %vm1213_vm11, %v3075_v22, 128  ;;  %v3591_v62 = vsel %vm1236_vm12, %v3075_v22, 128 }
 0x19b   : > { %1318 = vmin.xlane.f32.xlu1 %v3583_v2  ;;  %1332 = vmin.xlane.f32.xlu0 %v3585_v5  ;;  %v1665_v13 = vshra.s32 %v3591_v62, 16  ;;  %v1343_v25 = vshra.s32 %v3588_v57, 16 }
 0x19c   : > { %v1203_v51 = vpop.xlane.xlu1 %1202  ;;  %v1157_v59 = vpop.xlane.xlu0 %1156 }
 0x19d   : > { %vm1237_vm13 = vcmp.ge.f32.partialorder %v3199_v7, %v1203_v51  ;;  %vm1214_vm14 = vcmp.ge.f32.partialorder %v3206_v6, %v1157_v59  ;;  %v3600_v20 = vcvt.s32.f32 %v1665_v13  ;;  %v3613_v7 = vcvt.s32.f32 %v1343_v25 }
 0x19e   : > { %v3604_v32 = vsel %vm1237_vm13, %v3075_v22, 128  ;;  %v3607_v53 = vsel %vm1214_vm14, %v3075_v22, 128 }
 0x19f   : > { %1654 = vmin.xlane.f32.xlu1 %v3596_v26  ;;  %1668 = vmin.xlane.f32.xlu0 %v3600_v20  ;;  %v1357_v54 = vshra.s32 %v3607_v53, 16  ;;  %v1679_v8 = vshra.s32 %v3604_v32, 16 }
 0x1a0   : > { %v1159_v4 = vpop.xlane.xlu1 %1158 }
 0x1a1   : > { %vm1215_vm15 = vcmp.ge.f32.partialorder %v3222_v0, %v1159_v4  ;;  %v3615_v6 = vcvt.s32.f32 %v1357_v54  ;;  %v3624_v59 = vcvt.s32.f32 %v1679_v8 }
 0x1a2   : > { %v3619_v13 = vsel %vm1215_vm15, %v3075_v22, 128 }
 0x1a3   : > { %1346 = vmin.xlane.f32.xlu1 %v3613_v7  ;;  %1360 = vmin.xlane.f32.xlu0 %v3615_v6  ;;  %v1371_v0 = vshra.s32 %v3619_v13, 16 }
 0x1a4   : > { %v1161_v51 = vpop.xlane.xlu0 %1160 }
 0x1a5   : > { %vm1216_vm0 = vcmp.ge.f32.partialorder %v3233_v15, %v1161_v51  ;;  %v3633_v44 = vcvt.s32.f32 %v1371_v0 }
 0x1a6   : > { %v3628_v25 = vsel %vm1216_vm0, %v3075_v22, 128 }
 0x1a7   : > { %1682 = vmin.xlane.f32.xlu1 %v3624_v59  ;;  %v1385_v54 = vshra.s32 %v3628_v25, 16 }
 0x1a8   : > { %v1163_v4 = vpop.xlane.xlu1 %1162 }
 0x1a9   : > { %vm1217_vm1 = vcmp.ge.f32.partialorder %v3250_v12, %v1163_v4  ;;  %v3635_v39 = vcvt.s32.f32 %v1385_v54 }
 0x1aa   : > { %v3638_v15 = vsel %vm1217_vm1, %v3075_v22, 128 }
 0x1ab   : > { %1374 = vmin.xlane.f32.xlu1 %v3633_v44  ;;  %1388 = vmin.xlane.f32.xlu0 %v3635_v39  ;;  %v1399_v8 = vshra.s32 %v3638_v15, 16 }
 0x1ac   : > { %v1165_v51 = vpop.xlane.xlu0 %1164 }
 0x1ad   : > { %vm1218_vm2 = vcmp.ge.f32.partialorder %v3267_v3, %v1165_v51  ;;  %v3644_v35 = vcvt.s32.f32 %v1399_v8 }
 0x1ae   : > { %v3647_v12 = vsel %vm1218_vm2, %v3075_v22, 128 }
 0x1af   : > { %1402 = vmin.xlane.f32.xlu1 %v3644_v35  ;;  %v1413_v0 = vshra.s32 %v3647_v12, 16 }
 0x1b0   : > { %v1167_v54 = vpop.xlane.xlu1 %1166 }
 0x1b1   : > { %vm1219_vm3 = vcmp.ge.f32.partialorder %v3284_v1, %v1167_v54  ;;  %v3652_v4 = vcvt.s32.f32 %v1413_v0 }
 0x1b2   : > { %v3655_v31 = vsel %vm1219_vm3, %v3075_v22, 128 }
 0x1b3   : > { %1416 = vmin.xlane.f32.xlu0 %v3652_v4  ;;  %v1427_v3 = vshra.s32 %v3655_v31, 16 }
 0x1b4   : > { %v1169_v8 = vpop.xlane.xlu0 %1168 }
 0x1b5   : > { %vm1220_vm4 = vcmp.ge.f32.partialorder %v3301_v60, %v1169_v8  ;;  %v3660_v51 = vcvt.s32.f32 %v1427_v3 }
 0x1b6   : > { %v3663_v27 = vsel %vm1220_vm4, %v3075_v22, 128 }
 0x1b7   : > { %1430 = vmin.xlane.f32.xlu1 %v3660_v51  ;;  %v1441_v1 = vshra.s32 %v3663_v27, 16 }
 0x1b8   : > { %v1171_v0 = vpop.xlane.xlu1 %1170 }
 0x1b9   : > { %vm1221_vm5 = vcmp.ge.f32.partialorder %v3312_v24, %v1171_v0  ;;  %v3668_v54 = vcvt.s32.f32 %v1441_v1 }
 0x1ba   : > { %v3671_v63 = vsel %vm1221_vm5, %v3075_v22, 128 }
 0x1bb   : > { %1444 = vmin.xlane.f32.xlu0 %v3668_v54  ;;  %v1455_v60 = vshra.s32 %v3671_v63, 16 }
 0x1bc   : > { %v1173_v3 = vpop.xlane.xlu0 %1172 }
 0x1bd   : > { %vm1222_vm6 = vcmp.ge.f32.partialorder %v3327_v17, %v1173_v3  ;;  %v3676_v8 = vcvt.s32.f32 %v1455_v60 }
 0x1be   : > { %v3679_v11 = vsel %vm1222_vm6, %v3075_v22, 128 }
 0x1bf   : > { %1458 = vmin.xlane.f32.xlu1 %v3676_v8  ;;  %v1469_v24 = vshra.s32 %v3679_v11, 16 }
 0x1c0   : > { %v1175_v1 = vpop.xlane.xlu1 %1174 }
 0x1c1   : > { %vm1223_vm7 = vcmp.ge.f32.partialorder %v3342_v29, %v1175_v1  ;;  %v3684_v0 = vcvt.s32.f32 %v1469_v24 }
 0x1c2   : > { %v3687_v16 = vsel %vm1223_vm7, %v3075_v22, 128 }
 0x1c3   : > { %1472 = vmin.xlane.f32.xlu0 %v3684_v0  ;;  %v1483_v17 = vshra.s32 %v3687_v16, 16 }
 0x1c4   : > { %v1177_v60 = vpop.xlane.xlu0 %1176 }
 0x1c5   : > { %vm1224_vm8 = vcmp.ge.f32.partialorder %v3357_v33, %v1177_v60  ;;  %v3692_v3 = vcvt.s32.f32 %v1483_v17 }
 0x1c6   : > { %v3695_v10 = vsel %vm1224_vm8, %v3075_v22, 128 }
 0x1c7   : > { %1486 = vmin.xlane.f32.xlu1 %v3692_v3  ;;  %v1497_v29 = vshra.s32 %v3695_v10, 16 }
 0x1c8   : > { %v1179_v24 = vpop.xlane.xlu1 %1178 }
 0x1c9   : > { %vm1225_vm9 = vcmp.ge.f32.partialorder %v3372_v37, %v1179_v24  ;;  %v3700_v1 = vcvt.s32.f32 %v1497_v29 }
 0x1ca   : > { %v3703_v18 = vsel %vm1225_vm9, %v3075_v22, 128 }
 0x1cb   : > { %1500 = vmin.xlane.f32.xlu0 %v3700_v1  ;;  %v1511_v33 = vshra.s32 %v3703_v18, 16 }
 0x1cc   : > { %v1181_v17 = vpop.xlane.xlu0 %1180 }
 0x1cd   : > { %vm1226_vm10 = vcmp.ge.f32.partialorder %v3387_v41, %v1181_v17  ;;  %v3708_v60 = vcvt.s32.f32 %v1511_v33 }
 0x1ce   : > { %v3711_v58 = vsel %vm1226_vm10, %v3075_v22, 128 }
 0x1cf   : > { %5021 = vst [vmem:[#allocation35_spill] sm:$0xff] %v3708_v60  ;;  %1514 = vmin.xlane.f32.xlu1 %v3708_v60  ;;  %v1525_v37 = vshra.s32 %v3711_v58, 16 }
 0x1d0   : > { %v1183_v29 = vpop.xlane.xlu1 %1182 }
 0x1d1   : > { %vm1227_vm11 = vcmp.ge.f32.partialorder %v3402_v43, %v1183_v29  ;;  %v3716_v24 = vcvt.s32.f32 %v1525_v37 }
 0x1d2   : > { %v3719_v19 = vsel %vm1227_vm11, %v3075_v22, 128 }
 0x1d3   : > { %5022 = vst [vmem:[#allocation36_spill] sm:$0xff] %v3716_v24  ;;  %1528 = vmin.xlane.f32.xlu0 %v3716_v24  ;;  %v1539_v41 = vshra.s32 %v3719_v19, 16 }
 0x1d4   : > { %v1185_v33 = vpop.xlane.xlu0 %1184 }
 0x1d5   : > { %vm1228_vm12 = vcmp.ge.f32.partialorder %v3417_v45, %v1185_v33  ;;  %v3724_v17 = vcvt.s32.f32 %v1539_v41 }
 0x1d6   : > { %v3727_v60 = vsel %vm1228_vm12, %v3075_v22, 128 }
 0x1d7   : > { %5023 = vst [vmem:[#allocation37_spill] sm:$0xff] %v3724_v17  ;;  %1542 = vmin.xlane.f32.xlu1 %v3724_v17  ;;  %v1553_v43 = vshra.s32 %v3727_v60, 16 }
 0x1d8   : > { %v1187_v37 = vpop.xlane.xlu1 %1186 }
 0x1d9   : > { %vm1229_vm13 = vcmp.ge.f32.partialorder %v3432_v47, %v1187_v37  ;;  %v3732_v29 = vcvt.s32.f32 %v1553_v43 }
 0x1da   : > { %v3735_v24 = vsel %vm1229_vm13, %v3075_v22, 128 }
 0x1db   : > { %5024 = vst [vmem:[#allocation38_spill] sm:$0xff] %v3732_v29  ;;  %5025 = vst [vmem:[#allocation39_spill] sm:$0xff] %v3735_v24  ;;  %1556 = vmin.xlane.f32.xlu0 %v3732_v29  ;;  %v1567_v45 = vshra.s32 %v3735_v24, 16 }
 0x1dc   : > { %v1189_v41 = vpop.xlane.xlu0 %1188 }
 0x1dd   : > { %vm1230_vm14 = vcmp.ge.f32.partialorder %v3449_v46, %v1189_v41  ;;  %v3740_v33 = vcvt.s32.f32 %v1567_v45 }
 0x1de   : > { %v3743_v17 = vsel %vm1230_vm14, %v3075_v22, 128 }
 0x1df   : > { %5026 = vst [vmem:[#allocation40_spill] sm:$0xff] %v3740_v33  ;;  %1570 = vmin.xlane.f32.xlu1 %v3740_v33  ;;  %v1581_v47 = vshra.s32 %v3743_v17, 16 }
 0x1e0   : > { %v1191_v43 = vpop.xlane.xlu1 %1190  ;;  %v1205_v37 = vpop.xlane.xlu0 %1204 }
 0x1e1   : > { %vm1231_vm15 = vcmp.ge.f32.partialorder %v3470_v42, %v1191_v43  ;;  %vm1238_vm0 = vcmp.ge.f32.partialorder %v3463_v48, %v1205_v37  ;;  %v3749_v29 = vcvt.s32.f32 %v1581_v47 }
 0x1e2   : > { %v3752_v24 = vsel %vm1231_vm15, %v3075_v22, 128  ;;  %v3755_v46 = vsel %vm1238_vm0, %v3075_v22, 128 }
 0x1e3   : > { %5027 = vst [vmem:[#allocation41_spill] sm:$0xff] %v3749_v29  ;;  %1584 = vmin.xlane.f32.xlu0 %v3749_v29  ;;  %v1595_v45 = vshra.s32 %v3752_v24, 16  ;;  %v1693_v41 = vshra.s32 %v3755_v46, 16  ;;  %v3774_v29 = vpop.f32.mrb[16].mxu1 }
 0x1e4   : > { %v1207_v33 = vpop.xlane.xlu1 %1206  ;;  %5032 = vst [vmem:[#allocation46_spill] sm:$0xff] %v3774_v29 }
 0x1e5   : > { %vm1239_vm1 = vcmp.ge.f32.partialorder %v3478_v52, %v1207_v33  ;;  %v3761_v42 = vcvt.s32.f32 %v1595_v45  ;;  %v3763_v48 = vcvt.s32.f32 %v1693_v41  ;;  %v3776_v52 = vpop.f32.mrb[17].mxu1 }
 0x1e6   : > { %v3766_v47 = vsel %vm1239_vm1, %v3075_v22, 128  ;;  %5033 = vst [vmem:[#allocation47_spill] sm:$0xff] %v3776_v52  ;;  %v3778_v33 = vpop.f32.mrb[18].mxu1 }
 0x1e7   : > { %5028 = vst [vmem:[#allocation42_spill] sm:$0xff] %v3761_v42  ;;  %5029 = vst [vmem:[#allocation43_spill] sm:$0xff] %v3763_v48  ;;  %1598 = vmin.xlane.f32.xlu1 %v3761_v42  ;;  %1696 = vmin.xlane.f32.xlu0 %v3763_v48  ;;  %v1707_v43 = vshra.s32 %v3766_v47, 16  ;;  %v3780_v45 = vpop.f32.mrb[19].mxu1 }
 0x1e8   : > { %5030 = vst [vmem:[#allocation44_spill] sm:$0xff] %v3766_v47  ;;  %5034 = vst [vmem:[#allocation48_spill] sm:$0xff] %v3778_v33  ;;  %v3784_v41 = vpop.f32.mrb[20].mxu1 }
 0x1e9   : > { %v3771_v37 = vcvt.s32.f32 %v1707_v43  ;;  %5035 = vst [vmem:[#allocation49_spill] sm:$0xff] %v3780_v45  ;;  %5037 = vst [vmem:[#allocation51_spill] sm:$0xff] %v3784_v41  ;;  %v3788_v48 = vpop.f32.mrb[21].mxu1 }
 0x1ea   : > { %5039 = vst [vmem:[#allocation53_spill] sm:$0xff] %v3788_v48  ;;  %v3790_v43 = vpop.f32.mrb[22].mxu1 }
 0x1eb   : > { %5031 = vst [vmem:[#allocation45_spill] sm:$0xff] %v3771_v37  ;;  %1710 = vmin.xlane.f32.xlu1 %v3771_v37  ;;  %5040 = vst [vmem:[#allocation54_spill] sm:$0xff] %v3790_v43  ;;  %v3792_v47 = vpop.f32.mrb[23].mxu1 }
 0x1ec   : > { %5041 = vst [vmem:[#allocation55_spill] sm:$0xff] %v3792_v47  ;;  %v3796_v29 = vpop.f32.mrb[24].mxu1 }
 0x1ed   : > { %5043 = vst [vmem:[#allocation57_spill] sm:$0xff] %v3796_v29  ;;  %v3800_v33 = vpop.f32.mrb[25].mxu1 }
 0x1ee   : > { %5045 = vst [vmem:[#allocation59_spill] sm:$0xff] %v3800_v33  ;;  %v3802_v45 = vpop.f32.mrb[26].mxu1 }
 0x1ef   : > { %5046 = vst [vmem:[#allocation60_spill] sm:$0xff] %v3802_v45 }
 0x1fc   : > { %v3782_v22 = vpop.f32.mrb[48].mxu0 }
 0x1fd   : > { %5036 = vst [vmem:[#allocation50_spill] sm:$0xff] %v3782_v22  ;;  %v3786_v42 = vpop.f32.mrb[49].mxu0  ;;  %v3804_v22 = vpop.f32.mrb[27].mxu1 }
 0x1fe   : > { %5038 = vst [vmem:[#allocation52_spill] sm:$0xff] %v3786_v42  ;;  %5047 = vst [vmem:[#allocation61_spill] sm:$0xff] %v3804_v22  ;;  %v3808_v42 = vpop.f32.mrb[28].mxu1 }
 0x1ff   : > { %5049 = vst [vmem:[#allocation63_spill] sm:$0xff] %v3808_v42  ;;  %v3812_v43 = vpop.f32.mrb[29].mxu1 }
 0x200   : > { %v3794_v37 = vpop.f32.mrb[50].mxu0  ;;  %5051 = vst [vmem:[#allocation65_spill] sm:$0xff] %v3812_v43  ;;  %v3814_v47 = vpop.f32.mrb[30].mxu1 }
 0x201   : > { %5042 = vst [vmem:[#allocation56_spill] sm:$0xff] %v3794_v37  ;;  %v3798_v52 = vpop.f32.mrb[51].mxu0  ;;  %5052 = vst [vmem:[#allocation66_spill] sm:$0xff] %v3814_v47  ;;  %v3816_v37 = vpop.f32.mrb[31].mxu1 }
 0x202   : > { %5044 = vst [vmem:[#allocation58_spill] sm:$0xff] %v3798_v52  ;;  %5053 = vst [vmem:[#allocation67_spill] sm:$0xff] %v3816_v37  ;;  %v3820_v52 = vpop.f32.mrb[32].mxu1 }
 0x203   : > { %5055 = vst [vmem:[#allocation69_spill] sm:$0xff] %v3820_v52  ;;  %v3824_v45 = vpop.f32.mrb[33].mxu1 }
 0x204   : > { %v3806_v41 = vpop.f32.mrb[52].mxu0  ;;  %5057 = vst [vmem:[#allocation71_spill] sm:$0xff] %v3824_v45  ;;  %v3826_v22 = vpop.f32.mrb[34].mxu1 }
 0x205   : > { %5048 = vst [vmem:[#allocation62_spill] sm:$0xff] %v3806_v41  ;;  %v3810_v48 = vpop.f32.mrb[53].mxu0  ;;  %5058 = vst [vmem:[#allocation72_spill] sm:$0xff] %v3826_v22  ;;  %v3828_v41 = vpop.f32.mrb[35].mxu1 }
 0x206   : > { %5050 = vst [vmem:[#allocation64_spill] sm:$0xff] %v3810_v48  ;;  %5059 = vst [vmem:[#allocation73_spill] sm:$0xff] %v3828_v41  ;;  %v3832_v48 = vpop.f32.mrb[36].mxu1  ;;  %v1272_v41 = vand.u32 65535, %v3520_v28 }
 0x207   : > { %5061 = vst [vmem:[#allocation75_spill] sm:$0xff] %v3832_v48  ;;  %v3836_v47 = vpop.f32.mrb[37].mxu1 }
 0x208   : > { %v3818_v29 = vpop.f32.mrb[54].mxu0  ;;  %5063 = vst [vmem:[#allocation77_spill] sm:$0xff] %v3836_v47  ;;  %v3838_v37 = vpop.f32.mrb[38].mxu1 }
 0x209   : > { %5054 = vst [vmem:[#allocation68_spill] sm:$0xff] %v3818_v29  ;;  %v3822_v33 = vpop.f32.mrb[55].mxu0  ;;  %5064 = vst [vmem:[#allocation78_spill] sm:$0xff] %v3838_v37  ;;  %v3840_v29 = vpop.f32.mrb[39].mxu1 }
 0x20a   : > { %5056 = vst [vmem:[#allocation70_spill] sm:$0xff] %v3822_v33  ;;  %5065 = vst [vmem:[#allocation79_spill] sm:$0xff] %v3840_v29  ;;  %v3844_v33 = vpop.f32.mrb[40].mxu1 }
 0x20b   : > { %5067 = vst [vmem:[#allocation81_spill] sm:$0xff] %v3844_v33  ;;  %v3849_v22 = vpop.f32.mrb[41].mxu1  ;;  %v1274_v33 = vcvt.s32.f32 %v1272_v41  ;;  %v1286_v41 = vand.u32 65535, %v3543_v61  ;;  %v1622_v61 = vand.u32 65535, %v3533_v55 }
 0x20c   : > { %v3830_v42 = vpop.f32.mrb[56].mxu0  ;;  %5069 = vst [vmem:[#allocation83_spill] sm:$0xff] %v3849_v22 }
 0x20d   : > { %5060 = vst [vmem:[#allocation74_spill] sm:$0xff] %v3830_v42  ;;  %v3834_v43 = vpop.f32.mrb[57].mxu0  ;;  %v3851_v42 = vpop.f32.mrb[42].mxu1 }
 0x20e   : > { %5062 = vst [vmem:[#allocation76_spill] sm:$0xff] %v3834_v43  ;;  %5070 = vst [vmem:[#allocation84_spill] sm:$0xff] %v3851_v42  ;;  %v3853_v48 = vpop.f32.mrb[43].mxu1 }
 0x20f   : > { %5071 = vst [vmem:[#allocation85_spill] sm:$0xff] %v3853_v48  ;;  %v3857_v47 = vpop.f32.mrb[44].mxu1 }
 0x210   : > { %v3842_v52 = vpop.f32.mrb[58].mxu0  ;;  %5073 = vst [vmem:[#allocation87_spill] sm:$0xff] %v3857_v47 }
 0x211   : > { %5066 = vst [vmem:[#allocation80_spill] sm:$0xff] %v3842_v52  ;;  %v3846_v45 = vpop.f32.mrb[59].mxu0  ;;  %v1608_v52 = vand.u32 65535, %v3528_v38  ;;  %v1300_v38 = vand.u32 65535, %v3540_v23 }
 0x212   : > { %5068 = vst [vmem:[#allocation82_spill] sm:$0xff] %v3846_v45  ;;  %v3864_v45 = vpop.f32.mrb[45].mxu1 }
 0x213   : > { %5075 = vst [vmem:[#allocation89_spill] sm:$0xff] %v3864_v45  ;;  %v3868_v28 = vpop.f32.mrb[46].mxu1  ;;  %v1610_v22 = vcvt.s32.f32 %v1608_v52  ;;  %v1636_v52 = vand.u32 65535, %v3559_v9 }
 0x214   : > { %v3855_v43 = vpop.f32.mrb[60].mxu0  ;;  %v3870_v48 = vpop.f32.mrb[47].mxu1 }
 0x215   : > { %5072 = vst [vmem:[#allocation86_spill] sm:$0xff] %v3855_v43  ;;  %v3859_v37 = vpop.f32.mrb[61].mxu0  ;;  %5076 = vst [vmem:[#allocation90_spill] sm:$0xff] %v3870_v48  ;;  %v3874_v47 = vpop.f32.mrb[48].mxu1 }
 0x216   : > { %5074 = vst [vmem:[#allocation88_spill] sm:$0xff] %v3859_v37  ;;  %5078 = vst [vmem:[#allocation92_spill] sm:$0xff] %v3874_v47 }
 0x218   : > { %v3862_v29 = vpop.xlane.xlu0 %1276  ;;  %v3872_v43 = vpop.f32.mrb[62].mxu0 }
 0x219   : > { %vm1278_vm2 = vcmp.eq.f32.partialorder %v3524_v36, %v3862_v29  ;;  %5077 = vst [vmem:[#allocation91_spill] sm:$0xff] %v3872_v43  ;;  %v3876_v37 = vpop.f32.mrb[63].mxu0  ;;  %v3882_v36 = vpop.f32.mrb[49].mxu1 }
 0x21a   : > { %v1279_v42 = vsel %vm1278_vm2, %v1274_v33, inf  ;;  %5079 = vst [vmem:[#allocation93_spill] sm:$0xff] %v3876_v37  ;;  %5080 = vst [vmem:[#allocation94_spill] sm:$0xff] %v3882_v36  ;;  %v3886_v33 = vpop.f32.mrb[50].mxu1 }
 0x21b   : > { %1280 = vmin.xlane.f32.xlu0 %v1279_v42  ;;  %5081 = vst [vmem:[#allocation95_spill] sm:$0xff] %v3886_v33  ;;  %v3888_v42 = vpop.f32.mrb[51].mxu1  ;;  %v1302_v33 = vcvt.s32.f32 %v1300_v38  ;;  %v1314_v38 = vand.u32 65535, %v3556_v50 }
 0x21c   : > { %v3880_v45 = vpop.xlane.xlu0 %1612  ;;  %v3890_v47 = vpop.f32.mrb[64].mxu0 }
 0x21d   : > { %vm1614_vm3 = vcmp.eq.f32.partialorder %v3537_v56, %v3880_v45  ;;  %5082 = vst [vmem:[#allocation96_spill] sm:$0xff] %v3890_v47  ;;  %v3892_v37 = vpop.f32.mrb[52].mxu1  ;;  %v3894_v23 = vpop.f32.mrb[65].mxu0  ;;  %v1288_v56 = vcvt.s32.f32 %v1286_v41  ;;  %v1328_v41 = vand.u32 65535, %v3575_v40  ;;  %v1650_v40 = vand.u32 65535, %v3572_v34 }
 0x21e   : > { %v1615_v43 = vsel %vm1614_vm3, %v1610_v22, inf  ;;  %5083 = vst [vmem:[#allocation97_spill] sm:$0xff] %v3892_v37  ;;  %5084 = vst [vmem:[#allocation98_spill] sm:$0xff] %v3894_v23  ;;  %v3906_v22 = vpop.f32.mrb[53].mxu1 }
 0x21f   : > { %1616 = vmin.xlane.f32.xlu0 %v1615_v43  ;;  %5085 = vst [vmem:[#allocation99_spill] sm:$0xff] %v3906_v22  ;;  %v3908_v37 = vpop.f32.mrb[54].mxu1  ;;  %v1638_v22 = vcvt.s32.f32 %v1636_v52 }
 0x220   : > { %v3898_v36 = vpop.xlane.xlu1 %1290  ;;  %v3900_v48 = vpop.xlane.xlu0 %1304 }
 0x221   : > { %vm1292_vm4 = vcmp.eq.f32.partialorder %v3553_v49, %v3898_v36  ;;  %vm1306_vm5 = vcmp.eq.f32.partialorder %v3551_v14, %v3900_v48  ;;  %v3910_v55 = vpop.f32.mrb[66].mxu0  ;;  %v3912_v9 = vpop.f32.mrb[55].mxu1  ;;  %v1624_v14 = vcvt.s32.f32 %v1622_v61  ;;  %v1664_v61 = vand.u32 65535, %v3591_v62 }
 0x222   : > { %v1293_v43 = vsel %vm1292_vm4, %v1288_v56, inf  ;;  %v1307_v23 = vsel %vm1306_vm5, %v1302_v33, inf  ;;  %5086 = vst [vmem:[#allocation100_spill] sm:$0xff] %v3910_v55  ;;  %v3924_v33 = vpop.f32.mrb[56].mxu1  ;;  %v1316_v55 = vcvt.s32.f32 %v1314_v38  ;;  %v1342_v38 = vand.u32 65535, %v3588_v57 }
 0x223   : > { %1294 = vmin.xlane.f32.xlu1 %v1293_v43  ;;  %1308 = vmin.xlane.f32.xlu0 %v1307_v23  ;;  %v3926_v43 = vpop.f32.mrb[57].mxu1 }
 0x224   : > { %v3916_v49 = vpop.xlane.xlu1 %1626  ;;  %v3918_v47 = vpop.xlane.xlu0 %1640 }
 0x225   : > { %vm1628_vm6 = vcmp.eq.f32.partialorder %v3564_v30, %v3916_v49  ;;  %vm1642_vm7 = vcmp.eq.f32.partialorder %v3568_v21, %v3918_v47  ;;  %v3928_v50 = vpop.f32.mrb[58].mxu1  ;;  %v1330_v21 = vcvt.s32.f32 %v1328_v41  ;;  %v1356_v41 = vand.u32 65535, %v3607_v53 }
 0x226   : > { %v1629_v23 = vsel %vm1628_vm6, %v1624_v14, inf  ;;  %v1643_v56 = vsel %vm1642_vm7, %v1638_v22, inf  ;;  %5087 = vst [vmem:[#allocation101_spill] sm:$0xff] %v3928_v50 }
 0x227   : > { %1630 = vmin.xlane.f32.xlu1 %v1629_v23  ;;  %1644 = vmin.xlane.f32.xlu0 %v1643_v56  ;;  %v3940_v23 = vpop.f32.mrb[59].mxu1  ;;  %v3942_v56 = vpop.f32.mrb[67].mxu0 }
 0x228   : > { %v3932_v52 = vpop.xlane.xlu1 %1318  ;;  %v3934_v30 = vpop.xlane.xlu0 %1332 }
 0x229   : > { %vm1320_vm8 = vcmp.eq.f32.partialorder %v3583_v2, %v3932_v52  ;;  %vm1334_vm9 = vcmp.eq.f32.partialorder %v3585_v5, %v3934_v30  ;;  %v3944_v34 = vpop.f32.mrb[60].mxu1  ;;  %v3946_v62 = vpop.f32.mrb[68].mxu0  ;;  %v1652_v5 = vcvt.s32.f32 %v1650_v40 }
 0x22a   : > { %v1321_v22 = vsel %vm1320_vm8, %v1316_v55, inf  ;;  %v1335_v14 = vsel %vm1334_vm9, %v1330_v21, inf  ;;  %5088 = vst [vmem:[#allocation102_spill] sm:$0xff] %v3944_v34  ;;  %5089 = vst [vmem:[#allocation103_spill] sm:$0xff] %v3946_v62  ;;  %v1666_v55 = vcvt.s32.f32 %v1664_v61  ;;  %v3958_v21 = vpop.f32.mrb[61].mxu1 }
 0x22b   : > { %1322 = vmin.xlane.f32.xlu1 %v1321_v22  ;;  %1336 = vmin.xlane.f32.xlu0 %v1335_v14  ;;  %5090 = vst [vmem:[#allocation104_spill] sm:$0xff] %v3958_v21  ;;  %v3960_v22 = vpop.f32.mrb[69].mxu0  ;;  %v3962_v62 = vpop.f32.mrb[62].mxu1  ;;  %v1344_v21 = vcvt.s32.f32 %v1342_v38  ;;  %v1370_v38 = vand.u32 65535, %v3619_v13 }
 0x22c   : > { %v3950_v2 = vpop.xlane.xlu1 %1654  ;;  %v3952_v50 = vpop.xlane.xlu0 %1668  ;;  %5091 = vst [vmem:[#allocation105_spill] sm:$0xff] %v3960_v22  ;;  %v1358_v22 = vcvt.s32.f32 %v1356_v41  ;;  %v1384_v41 = vand.u32 65535, %v3628_v25 }
 0x22d   : > { %vm1656_vm10 = vcmp.eq.f32.partialorder %v3596_v26, %v3950_v2  ;;  %vm1670_vm11 = vcmp.eq.f32.partialorder %v3600_v20, %v3952_v50  ;;  %v3964_v53 = vpop.f32.mrb[70].mxu0  ;;  %v3966_v40 = vpop.f32.mrb[63].mxu1  ;;  %v1678_v26 = vand.u32 65535, %v3604_v32 }
 0x22e   : > { %v1657_v14 = vsel %vm1656_vm10, %v1652_v5, inf  ;;  %v1671_v57 = vsel %vm1670_vm11, %v1666_v55, inf  ;;  %5092 = vst [vmem:[#allocation106_spill] sm:$0xff] %v3966_v40  ;;  %v3968_v61 = vpop.f32.mrb[71].mxu0  ;;  %v3979_v5 = vpop.f32.mrb[64].mxu1 }
 0x22f   : > { %1658 = vmin.xlane.f32.xlu1 %v1657_v14  ;;  %1672 = vmin.xlane.f32.xlu0 %v1671_v57  ;;  %5093 = vst [vmem:[#allocation107_spill] sm:$0xff] %v3968_v61  ;;  %v3981_v55 = vpop.f32.mrb[72].mxu0  ;;  %v3983_v61 = vpop.f32.mrb[65].mxu1  ;;  %v1680_v40 = vcvt.s32.f32 %v1678_v26 }
 0x230   : > { %v3971_v34 = vpop.xlane.xlu1 %1346  ;;  %v3973_v20 = vpop.xlane.xlu0 %1360  ;;  %5094 = vst [vmem:[#allocation108_spill] sm:$0xff] %v3981_v55 }
 0x231   : > { %vm1348_vm12 = vcmp.eq.f32.partialorder %v3613_v7, %v3971_v34  ;;  %vm1362_vm13 = vcmp.eq.f32.partialorder %v3615_v6, %v3973_v20  ;;  %v3985_v32 = vpop.f32.mrb[73].mxu0  ;;  %v4002_v13 = vpop.f32.mrb[66].mxu1 }
 0x232   : > { %v1349_v14 = vsel %vm1348_vm12, %v1344_v21, inf  ;;  %v1363_v57 = vsel %vm1362_vm13, %v1358_v22, inf  ;;  %v1398_v21 = vand.u32 65535, %v3638_v15  ;;  %v1412_v15 = vand.u32 65535, %v3647_v12 }
 0x233   : > { %1350 = vmin.xlane.f32.xlu1 %v1349_v14  ;;  %1364 = vmin.xlane.f32.xlu0 %v1363_v57  ;;  %v1372_v14 = vcvt.s32.f32 %v1370_v38  ;;  %v1386_v57 = vcvt.s32.f32 %v1384_v41 }
 0x234   : > { %v3989_v7 = vpop.xlane.xlu1 %1682  ;;  %v1400_v38 = vcvt.s32.f32 %v1398_v21  ;;  %v1414_v12 = vcvt.s32.f32 %v1412_v15 }
 0x235   : > { %vm1684_vm14 = vcmp.eq.f32.partialorder %v3624_v59, %v3989_v7 }
 0x236   : > { %v1685_v6 = vsel %vm1684_vm14, %v1680_v40, inf  ;;  %v4004_v40 = vpop.f32.mrb[67].mxu1 }
 0x237   : > { %1686 = vmin.xlane.f32.xlu1 %v1685_v6  ;;  %v4009_v41 = vpop.f32.mrb[68].mxu1 }
 0x238   : > { %v3994_v22 = vpop.xlane.xlu1 %1374  ;;  %v3996_v55 = vpop.xlane.xlu0 %1388 }
 0x239   : > { %vm1376_vm15 = vcmp.eq.f32.partialorder %v3633_v44, %v3994_v22  ;;  %vm1390_vm0 = vcmp.eq.f32.partialorder %v3635_v39, %v3996_v55  ;;  %v4013_v39 = vpop.f32.mrb[74].mxu0  ;;  %v4015_v6 = vpop.f32.mrb[69].mxu1 }
 0x23a   : > { %v1377_v25 = vsel %vm1376_vm15, %v1372_v14, inf  ;;  %v1391_v59 = vsel %vm1390_vm0, %v1386_v57, inf  ;;  %5095 = vst [vmem:[#allocation109_spill] sm:$0xff] %v4013_v39  ;;  %v4017_v14 = vpop.f32.mrb[75].mxu0  ;;  %v1426_v57 = vand.u32 65535, %v3655_v31  ;;  %v4029_v39 = vpop.f32.mrb[70].mxu1 }
 0x23b   : > { %1378 = vmin.xlane.f32.xlu1 %v1377_v25  ;;  %1392 = vmin.xlane.f32.xlu0 %v1391_v59  ;;  %5096 = vst [vmem:[#allocation110_spill] sm:$0xff] %v4017_v14  ;;  %v1454_v31 = vand.u32 65535, %v3671_v63  ;;  %v1468_v63 = vand.u32 65535, %v3679_v11  ;;  %v1496_v11 = vand.u32 65535, %v3695_v10 }
 0x23c   : > { %v4007_v26 = vpop.xlane.xlu1 %1402 }
 0x23d   : > { %vm1404_vm1 = vcmp.eq.f32.partialorder %v3644_v35, %v4007_v26  ;;  %v1440_v35 = vand.u32 65535, %v3663_v27 }
 0x23e   : > { %v1405_v44 = vsel %vm1404_vm1, %v1400_v38, inf  ;;  %v1428_v38 = vcvt.s32.f32 %v1426_v57 }
 0x23f   : > { %1406 = vmin.xlane.f32.xlu1 %v1405_v44  ;;  %v1442_v14 = vcvt.s32.f32 %v1440_v35  ;;  %v1456_v35 = vcvt.s32.f32 %v1454_v31 }
 0x240   : > { %v4020_v25 = vpop.xlane.xlu0 %1416 }
 0x241   : > { %vm1418_vm2 = vcmp.eq.f32.partialorder %v3652_v4, %v4020_v25  ;;  %v4034_v4 = vpop.f32.mrb[71].mxu1 }
 0x242   : > { %v1419_v21 = vsel %vm1418_vm2, %v1414_v12, inf  ;;  %v4038_v27 = vpop.f32.mrb[72].mxu1  ;;  %v4040_v12 = vpop.f32.mrb[76].mxu0 }
 0x243   : > { %1420 = vmin.xlane.f32.xlu0 %v1419_v21  ;;  %5097 = vst [vmem:[#allocation111_spill] sm:$0xff] %v4040_v12  ;;  %v4044_v21 = vpop.f32.mrb[77].mxu0  ;;  %v1470_v12 = vcvt.s32.f32 %v1468_v63  ;;  %v1510_v63 = vand.u32 65535, %v3703_v18  ;;  %v1538_v18 = vand.u32 65535, %v3719_v19 }
 0x244   : > { %v4025_v59 = vpop.xlane.xlu1 %1430  ;;  %5098 = vst [vmem:[#allocation112_spill] sm:$0xff] %v4044_v21 }
 0x245   : > { %vm1432_vm3 = vcmp.eq.f32.partialorder %v3660_v51, %v4025_v59  ;;  %v4042_v51 = vpop.f32.mrb[73].mxu1 }
 0x246   : > { %v1433_v44 = vsel %vm1432_vm3, %v1428_v38, inf }
 0x247   : > { %1434 = vmin.xlane.f32.xlu1 %v1433_v44 }
 0x248   : > { %v4032_v15 = vpop.xlane.xlu0 %1444 }
 0x249   : > { %vm1446_vm4 = vcmp.eq.f32.partialorder %v3668_v54, %v4032_v15  ;;  %v1482_v54 = vand.u32 65535, %v3687_v16 }
 0x24a   : > { %v1447_v57 = vsel %vm1446_vm4, %v1442_v14, inf }
 0x24b   : > { %1448 = vmin.xlane.f32.xlu0 %v1447_v57  ;;  %v1484_v31 = vcvt.s32.f32 %v1482_v54 }
 0x24c   : > { %v4047_v38 = vpop.xlane.xlu1 %1458 }
 0x24d   : > { %vm1460_vm5 = vcmp.eq.f32.partialorder %v3676_v8, %v4047_v38  ;;  %v4061_v8 = vpop.f32.mrb[74].mxu1 }
 0x24e   : > { %v1461_v44 = vsel %vm1460_vm5, %v1456_v35, inf  ;;  %v4063_v16 = vpop.f32.mrb[75].mxu1 }
 0x24f   : > { %1462 = vmin.xlane.f32.xlu1 %v1461_v44  ;;  %5099 = vst [vmem:[#allocation113_spill] sm:$0xff] %v4063_v16  ;;  %v5102_v16 = vld [vmem:[#allocation36_spill] sm:$0xff] }
 0x250   : > { %v4052_v14 = vpop.xlane.xlu0 %1472 }
 0x251   : > { %vm1474_vm6 = vcmp.eq.f32.partialorder %v3684_v0, %v4052_v14  ;;  %v1498_v0 = vcvt.s32.f32 %v1496_v11 }
 0x252   : > { %v1475_v57 = vsel %vm1474_vm6, %v1470_v12, inf  ;;  %v1524_v12 = vand.u32 65535, %v3711_v58  ;;  %v1552_v58 = vand.u32 65535, %v3727_v60  ;;  %v1580_v60 = vand.u32 65535, %v3743_v17  ;;  %v5110_v17 = vld [vmem:[#allocation44_spill] sm:$0xff] }
 0x253   : > { %1476 = vmin.xlane.f32.xlu0 %v1475_v57  ;;  %v5101_v57 = vld [vmem:[#allocation35_spill] sm:$0xff] }
 0x254   : > { %v4057_v21 = vpop.xlane.xlu1 %1486  ;;  %v1526_v11 = vcvt.s32.f32 %v1524_v12  ;;  %v1554_v12 = vcvt.s32.f32 %v1552_v58 }
 0x255   : > { %vm1488_vm7 = vcmp.eq.f32.partialorder %v3692_v3, %v4057_v21  ;;  %v1512_v3 = vcvt.s32.f32 %v1510_v63  ;;  %v1540_v63 = vcvt.s32.f32 %v1538_v18 }
 0x256   : > { %v1489_v35 = vsel %vm1488_vm7, %v1484_v31, inf }
 0x257   : > { %1490 = vmin.xlane.f32.xlu1 %v1489_v35 }
 0x258   : > { %v4066_v44 = vpop.xlane.xlu0 %1500 }
 0x259   : > { %vm1502_vm8 = vcmp.eq.f32.partialorder %v3700_v1, %v4066_v44 }
 0x25a   : > { %v1503_v10 = vsel %vm1502_vm8, %v1498_v0, inf }
 0x25b   : > { %1504 = vmin.xlane.f32.xlu0 %v1503_v10  ;;  %v5103_v10 = vld [vmem:[#allocation37_spill] sm:$0xff] }
 0x25c   : > { %v4071_v54 = vpop.xlane.xlu1 %1514 }
 0x25d   : > { %5100 = vst [vmem:[#allocation114_spill] sm:$0xff] %v4071_v54  ;;  %vm1516_vm9 = vcmp.eq.f32.partialorder %v5101_v57, %v4071_v54  ;;  %v5104_v57 = vld [vmem:[#allocation39_spill] sm:$0xff]  ;;  %v5106_v54 = vld [vmem:[#allocation38_spill] sm:$0xff] }
 0x25e   : > { %v1517_v31 = vsel %vm1516_vm9, %v1512_v3, inf  ;;  %v1566_v19 = vand.u32 65535, %v5104_v57  ;;  %v1582_v57 = vcvt.s32.f32 %v1580_v60 }
 0x25f   : > { %1518 = vmin.xlane.f32.xlu1 %v1517_v31 }
 0x260   : > { %v4076_v35 = vpop.xlane.xlu0 %1528  ;;  %v1568_v18 = vcvt.s32.f32 %v1566_v19 }
 0x261   : > { %vm1530_vm10 = vcmp.eq.f32.partialorder %v5102_v16, %v4076_v35 }
 0x262   : > { %v1531_v1 = vsel %vm1530_vm10, %v1526_v11, inf }
 0x263   : > { %1532 = vmin.xlane.f32.xlu0 %v1531_v1  ;;  %v5107_v1 = vld [vmem:[#allocation40_spill] sm:$0xff] }
 0x264   : > { %v4081_v0 = vpop.xlane.xlu1 %1542 }
 0x265   : > { %vm1544_vm11 = vcmp.eq.f32.partialorder %v5103_v10, %v4081_v0  ;;  %v1594_v10 = vand.u32 65535, %v3752_v24  ;;  %v5113_v24 = vld [vmem:[#allocation42_spill] sm:$0xff] }
 0x266   : > { %v1545_v3 = vsel %vm1544_vm11, %v1540_v63, inf }
 0x267   : > { %1546 = vmin.xlane.f32.xlu1 %v1545_v3  ;;  %v1692_v3 = vand.u32 65535, %v3755_v46  ;;  %v5114_v46 = vld [vmem:[#allocation43_spill] sm:$0xff] }
 0x268   : > { %v4086_v31 = vpop.xlane.xlu0 %1556 }
 0x269   : > { %5105 = vst [vmem:[#allocation35_spill] sm:$0xff] %v4086_v31  ;;  %vm1558_vm12 = vcmp.eq.f32.partialorder %v5106_v54, %v4086_v31  ;;  %v5109_v54 = vld [vmem:[#allocation41_spill] sm:$0xff] }
 0x26a   : > { %v1559_v16 = vsel %vm1558_vm12, %v1554_v12, inf }
 0x26b   : > { %1560 = vmin.xlane.f32.xlu0 %v1559_v16  ;;  %v1706_v16 = vand.u32 65535, %v5110_v17 }
 0x26c   : > { %v4091_v11 = vpop.xlane.xlu1 %1570 }
 0x26d   : > { %vm1572_vm13 = vcmp.eq.f32.partialorder %v5107_v1, %v4091_v11  ;;  %v1694_v1 = vcvt.s32.f32 %v1692_v3  ;;  %v1708_v17 = vcvt.s32.f32 %v1706_v16  ;;  %v2724_v3 = vld [vmem:[%s4958_s2] sm:$0x1f]  ;;  %v5123_v16 = vld [vmem:[#allocation5_spill] sm:$0xff] }
 0x26e   : > { %v1573_v63 = vsel %vm1572_vm13, %v1568_v18, inf  ;;  %v1596_v18 = vcvt.s32.f32 %v1594_v10 }
 0x26f   : > { %1574 = vmin.xlane.f32.xlu1 %v1573_v63 }
 0x270   : > { %v4097_v58 = vpop.xlane.xlu0 %1584 }
 0x271   : > { %5108 = vst [vmem:[#allocation36_spill] sm:$0xff] %v4097_v58  ;;  %vm1586_vm14 = vcmp.eq.f32.partialorder %v5109_v54, %v4097_v58  ;;  %v5117_v58 = vld [vmem:[#allocation45_spill] sm:$0xff] }
 0x272   : > { %v1587_v12 = vsel %vm1586_vm14, %v1582_v57, inf  ;;  %v5115_v57 = vld [vmem:[#allocation2_spill] sm:$0xff] }
 0x273   : > { %1588 = vmin.xlane.f32.xlu0 %v1587_v12  ;;  %v254_v54 = vsub.s32 1, %v5115_v57 }
 0x274   : > { %v4102_v19 = vpop.xlane.xlu1 %1598  ;;  %v4104_v31 = vpop.xlane.xlu0 %1696 }
 0x275   : > { %5111 = vst [vmem:[#allocation37_spill] sm:$0xff] %v4102_v19  ;;  %5112 = vst [vmem:[#allocation39_spill] sm:$0xff] %v4104_v31  ;;  %vm1600_vm15 = vcmp.eq.f32.partialorder %v5113_v24, %v4102_v19  ;;  %vm1698_vm0 = vcmp.eq.f32.partialorder %v5114_v46, %v4104_v31  ;;  %v4118_v24 = vrot.slane %v2724_v3, %v254_v54  ;;  %v5121_v46 = vld [vmem:[#allocation4_spill] sm:$0xff]  ;;  %v258_v31 = vsub.s32 2, %v5115_v57 }
 0x276   : > { %v1601_v60 = vsel %vm1600_vm15, %v1596_v18, inf  ;;  %v1699_v63 = vsel %vm1698_vm0, %v1694_v1, inf  ;;  %v5119_v18 = vld [vmem:[#allocation3_spill] sm:$0xff] }
 0x277   : > { %1602 = vmin.xlane.f32.xlu1 %v1601_v60  ;;  %1700 = vmin.xlane.f32.xlu0 %v1699_v63  ;;  %5118 = vst [vmem:[#allocation40_spill] sm:$0xff] %v4118_v24  ;;  %v4122_v1 = vadd.f32 %v5119_v18, %v4118_v24  ;;  %v4126_v60 = vadd.f32 %v5121_v46, %v4118_v24  ;;  %v262_v46 = vsub.s32 3, %v5115_v57 }
 0x278   : > { %v4111_v12 = vpop.xlane.xlu1 %1710  ;;  %v4130_v63 = vadd.f32 %v5123_v16, %v4118_v24 }
 0x279   : > { %5116 = vst [vmem:[#allocation38_spill] sm:$0xff] %v4111_v12  ;;  %vm1712_vm1 = vcmp.eq.f32.partialorder %v5117_v58, %v4111_v12  ;;  %5120 = vst [vmem:[#allocation41_spill] sm:$0xff] %v4122_v1  ;;  %v5125_v58 = vld [vmem:[#allocation6_spill] sm:$0xff]  ;;  %v5129_v12 = vld [vmem:[#allocation8_spill] sm:$0xff] }
 0x27a   : > { %v1713_v10 = vsel %vm1712_vm1, %v1708_v17, inf  ;;  %5122 = vst [vmem:[#allocation44_spill] sm:$0xff] %v4126_v60  ;;  %5124 = vst [vmem:[#allocation42_spill] sm:$0xff] %v4130_v63  ;;  %v4134_v17 = vadd.f32 %v5125_v58, %v4118_v24  ;;  %v4142_v18 = vadd.f32 %v5129_v12, %v4118_v24  ;;  %v5131_v60 = vld [vmem:[#allocation9_spill] sm:$0xff]  ;;  %v5133_v63 = vld [vmem:[#allocation11_spill] sm:$0xff] }
 0x27b   : > { %1714 = vmin.xlane.f32.xlu1 %v1713_v10  ;;  %v5127_v10 = vld [vmem:[#allocation7_spill] sm:$0xff]  ;;  %v4148_v16 = vadd.f32 %v5131_v60, %v4118_v24  ;;  %v4152_v58 = vadd.f32 %v5133_v63, %v4118_v24  ;;  %v5137_v12 = vld [vmem:[#allocation13_spill] sm:$0xff]  ;;  %v5139_v1 = vld [vmem:[#allocation12_spill] sm:$0xff] }
 0x27c   : > { %5126 = vst [vmem:[#allocation43_spill] sm:$0xff] %v4134_v17  ;;  %v4138_v54 = vadd.f32 %v5127_v10, %v4118_v24  ;;  %5130 = vst [vmem:[#allocation45_spill] sm:$0xff] %v4142_v18  ;;  %v5135_v17 = vld [vmem:[#allocation10_spill] sm:$0xff]  ;;  %v4161_v18 = vadd.f32 %v5137_v12, %v4118_v24  ;;  %v4165_v19 = vadd.f32 %v5139_v1, %v4118_v24  ;;  %v5141_v60 = vld [vmem:[#allocation15_spill] sm:$0xff] }
 0x27d   : > { %5132 = vst [vmem:[#allocation3_spill] sm:$0xff] %v4148_v16  ;;  %5134 = vst [vmem:[#allocation4_spill] sm:$0xff] %v4152_v58  ;;  %v4156_v10 = vadd.f32 %v5135_v17, %v4118_v24  ;;  %v4169_v16 = vadd.f32 %v5141_v60, %v4118_v24  ;;  %v5143_v63 = vld [vmem:[#allocation14_spill] sm:$0xff]  ;;  %v5145_v17 = vld [vmem:[#allocation17_spill] sm:$0xff] }
 0x27e   : > { %5128 = vst [vmem:[#allocation2_spill] sm:$0xff] %v4138_v54  ;;  %v266_v54 = vsub.s32 4, %v5115_v57  ;;  %5138 = vst [vmem:[#allocation6_spill] sm:$0xff] %v4161_v18  ;;  %v4173_v58 = vadd.f32 %v5143_v63, %v4118_v24  ;;  %v5147_v57 = vld [vmem:[#allocation19_spill] sm:$0xff]  ;;  %v5149_v18 = vld [vmem:[#allocation20_spill] sm:$0xff] }
 0x27f   : > { %5136 = vst [vmem:[#allocation5_spill] sm:$0xff] %v4156_v10  ;;  %5140 = vst [vmem:[#allocation7_spill] sm:$0xff] %v4165_v19  ;;  %v4177_v10 = vadd.f32 %v5145_v17, %v4118_v24  ;;  %v4181_v12 = vadd.f32 %v5147_v57, %v4118_v24  ;;  %v4185_v1 = vadd.f32 %v5149_v18, %v4118_v24  ;;  %v5151_v19 = vld [vmem:[#allocation16_spill] sm:$0xff] }
 0x280   : > { %5142 = vst [vmem:[#allocation8_spill] sm:$0xff] %v4169_v16  ;;  %5144 = vst [vmem:[#allocation9_spill] sm:$0xff] %v4173_v58  ;;  %v4189_v60 = vadd.f32 %v5151_v19, %v4118_v24  ;;  %v5153_v16 = vld [vmem:[#allocation21_spill] sm:$0xff]  ;;  %v5155_v58 = vld [vmem:[#allocation22_spill] sm:$0xff]  ;;  %v4201_v57 = vrot.slane %v2724_v3, %v262_v46 }
 0x281   : > { %5146 = vst [vmem:[#allocation11_spill] sm:$0xff] %v4177_v10  ;;  %5148 = vst [vmem:[#allocation10_spill] sm:$0xff] %v4181_v12  ;;  %v4193_v63 = vadd.f32 %v5153_v16, %v4118_v24  ;;  %v4197_v17 = vadd.f32 %v5155_v58, %v4118_v24  ;;  %v4199_v10 = vrot.slane %v2724_v3, %v258_v31  ;;  %v5158_v12 = vld [vmem:[#allocation23_spill] sm:$0xff]  ;;  %v5165_v58 = vld [vmem:[#allocation26_spill] sm:$0xff] }
 0x282   : > { %5150 = vst [vmem:[#allocation13_spill] sm:$0xff] %v4185_v1  ;;  %5152 = vst [vmem:[#allocation12_spill] sm:$0xff] %v4189_v60  ;;  %v4205_v18 = vadd.f32 %v5158_v12, %v4118_v24  ;;  %v5160_v1 = vld [vmem:[#allocation24_spill] sm:$0xff]  ;;  %v5162_v60 = vld [vmem:[#allocation25_spill] sm:$0xff]  ;;  %v4219_v31 = vadd.f32 %v5165_v58, %v4118_v24 }
 0x283   : > { %5154 = vst [vmem:[#allocation15_spill] sm:$0xff] %v4193_v63  ;;  %5156 = vst [vmem:[#allocation14_spill] sm:$0xff] %v4197_v17  ;;  %v4209_v19 = vadd.f32 %v5160_v1, %v4118_v24  ;;  %v4213_v16 = vadd.f32 %v5162_v60, %v4118_v24  ;;  %v4215_v63 = vrot.slane %v2724_v3, %v266_v54  ;;  %v5167_v46 = vld [vmem:[#allocation27_spill] sm:$0xff]  ;;  %v5169_v12 = vld [vmem:[#allocation28_spill] sm:$0xff] }
 0x284   : > { %5157 = vst [vmem:[#allocation17_spill] sm:$0xff] %v4199_v10  ;;  %5159 = vst [vmem:[#allocation19_spill] sm:$0xff] %v4205_v18  ;;  %v4223_v17 = vadd.f32 %v5167_v46, %v4118_v24  ;;  %v4227_v18 = vadd.f32 %v5169_v12, %v4118_v24  ;;  %v5171_v1 = vld [vmem:[#allocation29_spill] sm:$0xff]  ;;  %v5173_v60 = vld [vmem:[#allocation30_spill] sm:$0xff] }
 0x285   : > { %5161 = vst [vmem:[#allocation20_spill] sm:$0xff] %v4209_v19  ;;  %5163 = vst [vmem:[#allocation16_spill] sm:$0xff] %v4213_v16  ;;  %v4231_v19 = vadd.f32 %v5171_v1, %v4118_v24  ;;  %v4235_v3 = vadd.f32 %v5173_v60, %v4118_v24  ;;  %v5175_v54 = vld [vmem:[#allocation31_spill] sm:$0xff]  ;;  %v5195_v16 = vld [vmem:[#allocation53_spill] sm:$0xff] }
 0x286   : > { %5164 = vst [vmem:[#allocation21_spill] sm:$0xff] %v4215_v63  ;;  %5166 = vst [vmem:[#allocation22_spill] sm:$0xff] %v4219_v31  ;;  %v4239_v58 = vadd.f32 %v5175_v54, %v4118_v24  ;;  %v5177_v31 = vld [vmem:[#allocation32_spill] sm:$0xff] }
 0x287   : > { %5168 = vst [vmem:[#allocation23_spill] sm:$0xff] %v4223_v17  ;;  %5170 = vst [vmem:[#allocation24_spill] sm:$0xff] %v4227_v18  ;;  %v4243_v46 = vadd.f32 %v5177_v31, %v4118_v24  ;;  %v5179_v17 = vld [vmem:[#allocation33_spill] sm:$0xff]  ;;  %v5181_v18 = vld [vmem:[#allocation34_spill] sm:$0xff] }
 0x288   : > { %5172 = vst [vmem:[#allocation25_spill] sm:$0xff] %v4231_v19  ;;  %5174 = vst [vmem:[#allocation26_spill] sm:$0xff] %v4235_v3  ;;  %v4247_v12 = vadd.f32 %v5179_v17, %v4118_v24  ;;  %v4251_v1 = vadd.f32 %v5181_v18, %v4118_v24  ;;  %v5183_v19 = vld [vmem:[#allocation46_spill] sm:$0xff]  ;;  %v5184_v3 = vld [vmem:[#allocation47_spill] sm:$0xff] }
 0x289   : > { %5176 = vst [vmem:[#allocation27_spill] sm:$0xff] %v4239_v58  ;;  %5178 = vst [vmem:[#allocation28_spill] sm:$0xff] %v4243_v46  ;;  %v4255_v60 = vadd.f32 %v5183_v19, %v4199_v10  ;;  %v4259_v54 = vadd.f32 %v5184_v3, %v4201_v57  ;;  %v5185_v58 = vld [vmem:[#allocation48_spill] sm:$0xff]  ;;  %v5187_v46 = vld [vmem:[#allocation49_spill] sm:$0xff] }
 0x28a   : > { %5180 = vst [vmem:[#allocation29_spill] sm:$0xff] %v4247_v12  ;;  %5182 = vst [vmem:[#allocation30_spill] sm:$0xff] %v4251_v1  ;;  %v4263_v31 = vadd.f32 %v5185_v58, %v4199_v10  ;;  %v4267_v17 = vadd.f32 %v5187_v46, %v4201_v57  ;;  %v5189_v12 = vld [vmem:[#allocation51_spill] sm:$0xff]  ;;  %v5191_v24 = vld [vmem:[#allocation50_spill] sm:$0xff]  ;;  %v4283_v58 = vadd.f32 %v5195_v16, %v4201_v57 }
 0x28b   : > { %v4271_v18 = vadd.f32 %v5189_v12, %v4199_v10  ;;  %v4275_v19 = vadd.f32 %v5191_v24, %v4215_v63  ;;  %v5193_v1 = vld [vmem:[#allocation52_spill] sm:$0xff] }
 0x28c   : > { %5186 = vst [vmem:[#allocation31_spill] sm:$0xff] %v4263_v31  ;;  %5188 = vst [vmem:[#allocation32_spill] sm:$0xff] %v4267_v17  ;;  %v4279_v3 = vadd.f32 %v5193_v1, %v4215_v63  ;;  %v5197_v31 = vld [vmem:[#allocation54_spill] sm:$0xff]  ;;  %v5199_v17 = vld [vmem:[#allocation55_spill] sm:$0xff] }
 0x28d   : > { %5190 = vst [vmem:[#allocation33_spill] sm:$0xff] %v4271_v18  ;;  %5192 = vst [vmem:[#allocation34_spill] sm:$0xff] %v4275_v19  ;;  %v4287_v46 = vadd.f32 %v5197_v31, %v4199_v10  ;;  %v4291_v12 = vadd.f32 %v5199_v17, %v4201_v57  ;;  %v5201_v18 = vld [vmem:[#allocation56_spill] sm:$0xff]  ;;  %v5203_v19 = vld [vmem:[#allocation57_spill] sm:$0xff] }
 0x28e   : > { %5194 = vst [vmem:[#allocation46_spill] sm:$0xff] %v4279_v3  ;;  %5196 = vst [vmem:[#allocation47_spill] sm:$0xff] %v4283_v58  ;;  %v4295_v24 = vadd.f32 %v5201_v18, %v4215_v63  ;;  %v4299_v1 = vadd.f32 %v5203_v19, %v4199_v10  ;;  %v5205_v3 = vld [vmem:[#allocation59_spill] sm:$0xff]  ;;  %v5207_v58 = vld [vmem:[#allocation60_spill] sm:$0xff] }
 0x28f   : > { %5198 = vst [vmem:[#allocation48_spill] sm:$0xff] %v4287_v46  ;;  %5200 = vst [vmem:[#allocation49_spill] sm:$0xff] %v4291_v12  ;;  %v4303_v16 = vadd.f32 %v5205_v3, %v4201_v57  ;;  %v4307_v31 = vadd.f32 %v5207_v58, %v4199_v10  ;;  %v5209_v46 = vld [vmem:[#allocation58_spill] sm:$0xff]  ;;  %v5211_v12 = vld [vmem:[#allocation61_spill] sm:$0xff] }
 0x290   : > { %5202 = vst [vmem:[#allocation51_spill] sm:$0xff] %v4295_v24  ;;  %5204 = vst [vmem:[#allocation50_spill] sm:$0xff] %v4299_v1  ;;  %v4311_v17 = vadd.f32 %v5209_v46, %v4215_v63  ;;  %v4315_v18 = vadd.f32 %v5211_v12, %v4201_v57  ;;  %v5213_v24 = vld [vmem:[#allocation63_spill] sm:$0xff]  ;;  %v5215_v1 = vld [vmem:[#allocation62_spill] sm:$0xff] }
 0x291   : > { %5206 = vst [vmem:[#allocation52_spill] sm:$0xff] %v4303_v16  ;;  %5208 = vst [vmem:[#allocation53_spill] sm:$0xff] %v4307_v31  ;;  %v4319_v19 = vadd.f32 %v5213_v24, %v4199_v10  ;;  %v4323_v3 = vadd.f32 %v5215_v1, %v4215_v63  ;;  %v5217_v16 = vld [vmem:[#allocation64_spill] sm:$0xff]  ;;  %v5219_v31 = vld [vmem:[#allocation65_spill] sm:$0xff] }
 0x292   : > { %5210 = vst [vmem:[#allocation54_spill] sm:$0xff] %v4311_v17  ;;  %5212 = vst [vmem:[#allocation55_spill] sm:$0xff] %v4315_v18  ;;  %v4327_v58 = vadd.f32 %v5217_v16, %v4215_v63  ;;  %v4331_v46 = vadd.f32 %v5219_v31, %v4201_v57  ;;  %v5221_v17 = vld [vmem:[#allocation66_spill] sm:$0xff]  ;;  %v5223_v18 = vld [vmem:[#allocation67_spill] sm:$0xff] }
 0x293   : > { %5214 = vst [vmem:[#allocation56_spill] sm:$0xff] %v4319_v19  ;;  %5216 = vst [vmem:[#allocation57_spill] sm:$0xff] %v4323_v3  ;;  %v4335_v12 = vadd.f32 %v5221_v17, %v4199_v10  ;;  %v4339_v24 = vadd.f32 %v5223_v18, %v4201_v57  ;;  %v5225_v19 = vld [vmem:[#allocation68_spill] sm:$0xff]  ;;  %v5227_v3 = vld [vmem:[#allocation69_spill] sm:$0xff] }
 0x294   : > { %5218 = vst [vmem:[#allocation59_spill] sm:$0xff] %v4327_v58  ;;  %5220 = vst [vmem:[#allocation60_spill] sm:$0xff] %v4331_v46  ;;  %v4343_v1 = vadd.f32 %v5225_v19, %v4215_v63  ;;  %v4347_v16 = vadd.f32 %v5227_v3, %v4199_v10  ;;  %v5229_v58 = vld [vmem:[#allocation71_spill] sm:$0xff]  ;;  %v5231_v46 = vld [vmem:[#allocation72_spill] sm:$0xff] }
 0x295   : > { %5222 = vst [vmem:[#allocation58_spill] sm:$0xff] %v4335_v12  ;;  %5224 = vst [vmem:[#allocation61_spill] sm:$0xff] %v4339_v24  ;;  %v4351_v31 = vadd.f32 %v5229_v58, %v4201_v57  ;;  %v4355_v17 = vadd.f32 %v5231_v46, %v4199_v10  ;;  %v5233_v12 = vld [vmem:[#allocation70_spill] sm:$0xff]  ;;  %v5235_v24 = vld [vmem:[#allocation73_spill] sm:$0xff] }
 0x296   : > { %5226 = vst [vmem:[#allocation63_spill] sm:$0xff] %v4343_v1  ;;  %5228 = vst [vmem:[#allocation62_spill] sm:$0xff] %v4347_v16  ;;  %v4359_v18 = vadd.f32 %v5233_v12, %v4215_v63  ;;  %v4363_v19 = vadd.f32 %v5235_v24, %v4201_v57  ;;  %v5237_v1 = vld [vmem:[#allocation75_spill] sm:$0xff]  ;;  %v5239_v16 = vld [vmem:[#allocation74_spill] sm:$0xff] }
 0x297   : > { %5230 = vst [vmem:[#allocation64_spill] sm:$0xff] %v4351_v31  ;;  %5232 = vst [vmem:[#allocation65_spill] sm:$0xff] %v4355_v17  ;;  %v4367_v3 = vadd.f32 %v5237_v1, %v4199_v10  ;;  %v4371_v58 = vadd.f32 %v5239_v16, %v4215_v63  ;;  %v5241_v31 = vld [vmem:[#allocation76_spill] sm:$0xff]  ;;  %v1283_v17 = vcvt.f32.s32 %v3862_v29  ;;  %v5243_v12 = vld [vmem:[#allocation77_spill] sm:$0xff] }
 0x298   : > { %5234 = vst [vmem:[#allocation66_spill] sm:$0xff] %v4359_v18  ;;  %5236 = vst [vmem:[#allocation67_spill] sm:$0xff] %v4363_v19  ;;  %v4375_v46 = vadd.f32 %v5241_v31, %v4215_v63  ;;  %v4380_v18 = vadd.f32 %v5243_v12, %v4201_v57  ;;  %v5245_v24 = vld [vmem:[#allocation78_spill] sm:$0xff]  ;;  %v5247_v1 = vld [vmem:[#allocation79_spill] sm:$0xff] }
 0x299   : > { %5238 = vst [vmem:[#allocation68_spill] sm:$0xff] %v4367_v3  ;;  %5240 = vst [vmem:[#allocation69_spill] sm:$0xff] %v4371_v58  ;;  %v4384_v19 = vadd.f32 %v5245_v24, %v4199_v10  ;;  %v4388_v3 = vadd.f32 %v5247_v1, %v4201_v57  ;;  %v5249_v16 = vld [vmem:[#allocation81_spill] sm:$0xff]  ;;  %v5251_v31 = vld [vmem:[#allocation83_spill] sm:$0xff] }
 0x29a   : > { %5242 = vst [vmem:[#allocation71_spill] sm:$0xff] %v4375_v46  ;;  %5244 = vst [vmem:[#allocation72_spill] sm:$0xff] %v4380_v18  ;;  %v4392_v58 = vadd.f32 %v5249_v16, %v4199_v10  ;;  %v4396_v46 = vadd.f32 %v5251_v31, %v4201_v57  ;;  %v5253_v29 = vld [vmem:[#allocation80_spill] sm:$0xff]  ;;  %v5255_v18 = vld [vmem:[#allocation82_spill] sm:$0xff] }
 0x29b   : > { %5246 = vst [vmem:[#allocation70_spill] sm:$0xff] %v4384_v19  ;;  %5248 = vst [vmem:[#allocation73_spill] sm:$0xff] %v4388_v3  ;;  %v4400_v12 = vadd.f32 %v5253_v29, %v4215_v63  ;;  %v4404_v24 = vadd.f32 %v5255_v18, %v4215_v63  ;;  %v1619_v19 = vcvt.f32.s32 %v3880_v45  ;;  %v5257_v1 = vld [vmem:[#allocation84_spill] sm:$0xff]  ;;  %v5259_v16 = vld [vmem:[#allocation85_spill] sm:$0xff]  ;;  %v4429_v45 = vadd.f32 %v3868_v28, %v4199_v10 }
 0x29c   : > { %5250 = vst [vmem:[#allocation75_spill] sm:$0xff] %v4392_v58  ;;  %5252 = vst [vmem:[#allocation74_spill] sm:$0xff] %v4396_v46  ;;  %v4409_v3 = vadd.f32 %v5257_v1, %v4199_v10  ;;  %v4413_v58 = vadd.f32 %v5259_v16, %v4201_v57  ;;  %v5261_v31 = vld [vmem:[#allocation86_spill] sm:$0xff]  ;;  %v5263_v29 = vld [vmem:[#allocation87_spill] sm:$0xff] }
 0x29d   : > { %5254 = vst [vmem:[#allocation76_spill] sm:$0xff] %v4400_v12  ;;  %5256 = vst [vmem:[#allocation77_spill] sm:$0xff] %v4404_v24  ;;  %v4417_v46 = vadd.f32 %v5261_v31, %v4215_v63  ;;  %v4421_v12 = vadd.f32 %v5263_v29, %v4199_v10  ;;  %v5265_v18 = vld [vmem:[#allocation89_spill] sm:$0xff]  ;;  %v5268_v1 = vld [vmem:[#allocation88_spill] sm:$0xff]  ;;  %v1297_v31 = vcvt.f32.s32 %v3898_v36 }
 0x29e   : > { %5258 = vst [vmem:[#allocation78_spill] sm:$0xff] %v4409_v3  ;;  %5260 = vst [vmem:[#allocation79_spill] sm:$0xff] %v4413_v58  ;;  %v4425_v24 = vadd.f32 %v5265_v18, %v4201_v57  ;;  %v4433_v16 = vadd.f32 %v5268_v1, %v4215_v63  ;;  %v4435_v58 = vshll.u32 %v1283_v17, 16  ;;  %v5273_v28 = vld [vmem:[#allocation92_spill] sm:$0xff]  ;;  %v5275_v1 = vld [vmem:[#allocation94_spill] sm:$0xff] }
 0x29f   : > { %5262 = vst [vmem:[#allocation81_spill] sm:$0xff] %v4417_v46  ;;  %5264 = vst [vmem:[#allocation83_spill] sm:$0xff] %v4421_v12  ;;  %v5269_v46 = vld [vmem:[#allocation90_spill] sm:$0xff]  ;;  %v5271_v12 = vld [vmem:[#allocation91_spill] sm:$0xff]  ;;  %v4453_v17 = vadd.f32 %v5275_v1, %v4201_v57  ;;  %v1633_v1 = vcvt.f32.s32 %v3916_v49  ;;  %v1339_v49 = vcvt.f32.s32 %v3934_v30  ;;  %v4507_v30 = vadd.f32 %v3908_v37, %v4199_v10 }
 0x2a0   : > { %5266 = vst [vmem:[#allocation80_spill] sm:$0xff] %v4425_v24  ;;  %5267 = vst [vmem:[#allocation82_spill] sm:$0xff] %v4429_v45  ;;  %v4440_v29 = vadd.f32 %v5269_v46, %v4201_v57  ;;  %v4444_v18 = vadd.f32 %v5271_v12, %v4215_v63  ;;  %v1311_v24 = vcvt.f32.s32 %v3900_v48  ;;  %v4449_v45 = vadd.f32 %v5273_v28, %v4199_v10  ;;  %v5277_v36 = vld [vmem:[#allocation93_spill] sm:$0xff]  ;;  %v5282_v28 = vld [vmem:[#allocation96_spill] sm:$0xff] }
 0x2a1   : > { %5276 = vst [vmem:[#allocation87_spill] sm:$0xff] %v4453_v17  ;;  %v4457_v3 = vadd.f32 %v5277_v36, %v4215_v63  ;;  %v4459_v46 = vshll.u32 %v1619_v19, 16  ;;  %v4467_v48 = vadd.f32 %v3888_v42, %v4201_v57  ;;  %v1647_v17 = vcvt.f32.s32 %v3918_v47  ;;  %v5284_v36 = vld [vmem:[#allocation97_spill] sm:$0xff]  ;;  %v4485_v42 = vpop.f32.mrb[78].mxu0  ;;  %v5290_v47 = vld [vmem:[#allocation99_spill] sm:$0xff] }
 0x2a2   : > { %5270 = vst [vmem:[#allocation84_spill] sm:$0xff] %v4440_v29  ;;  %5272 = vst [vmem:[#allocation85_spill] sm:$0xff] %v4444_v18  ;;  %v5279_v29 = vld [vmem:[#allocation95_spill] sm:$0xff]  ;;  %v4477_v19 = vadd.f32 %v5284_v36, %v4199_v10  ;;  %v5286_v18 = vld [vmem:[#allocation98_spill] sm:$0xff]  ;;  %v4529_v37 = vadd.f32 %v3926_v43, %v4201_v57  ;;  %v4550_v43 = vadd.f32 %v3979_v5, %v4199_v10 }
 0x2a3   : > { %5274 = vst [vmem:[#allocation86_spill] sm:$0xff] %v4449_v45  ;;  %5278 = vst [vmem:[#allocation89_spill] sm:$0xff] %v4457_v3  ;;  %v4463_v12 = vadd.f32 %v5279_v29, %v4199_v10  ;;  %v4471_v45 = vadd.f32 %v5282_v28, %v4215_v63  ;;  %v4481_v29 = vadd.f32 %v5286_v18, %v4215_v63  ;;  %v1325_v28 = vcvt.f32.s32 %v3932_v52 }
 0x2a4   : > { %5281 = vst [vmem:[#allocation90_spill] sm:$0xff] %v4467_v48  ;;  %5285 = vst [vmem:[#allocation92_spill] sm:$0xff] %v4477_v19  ;;  %v4487_v48 = vshll.u32 %v1297_v31, 16  ;;  %v4497_v19 = vpop.f32.mrb[79].mxu0  ;;  %v4499_v18 = vshll.u32 %v1311_v24, 16  ;;  %v1353_v31 = vcvt.f32.s32 %v3971_v34  ;;  %v1367_v52 = vcvt.f32.s32 %v3973_v20 }
 0x2a5   : > { %5280 = vst [vmem:[#allocation88_spill] sm:$0xff] %v4463_v12  ;;  %5283 = vst [vmem:[#allocation91_spill] sm:$0xff] %v4471_v45  ;;  %v4483_v12 = vpop.f32.mrb[76].mxu1  ;;  %v4493_v45 = vadd.f32 %v5290_v47, %v4201_v57  ;;  %v4511_v47 = vadd.f32 %v3912_v9, %v4201_v57  ;;  %v4525_v34 = vadd.f32 %v3924_v33, %v4199_v10  ;;  %v4533_v20 = vshll.u32 %v1325_v28, 16 }
 0x2a6   : > { %5287 = vst [vmem:[#allocation94_spill] sm:$0xff] %v4481_v29  ;;  %5288 = vst [vmem:[#allocation93_spill] sm:$0xff] %v4483_v12  ;;  %v4495_v36 = vpop.f32.mrb[77].mxu1  ;;  %v1661_v29 = vcvt.f32.s32 %v3950_v2  ;;  %v4519_v2 = vshll.u32 %v1633_v1, 16  ;;  %v5302_v1 = vld [vmem:[#allocation101_spill] sm:$0xff]  ;;  %v4552_v28 = vshll.u32 %v1367_v52, 16  ;;  %v4570_v5 = vadd.f32 %v3942_v56, %v4215_v63 }
 0x2a7   : > { %5289 = vst [vmem:[#allocation95_spill] sm:$0xff] %v4485_v42  ;;  %5291 = vst [vmem:[#allocation96_spill] sm:$0xff] %v4493_v45  ;;  %v1675_v42 = vcvt.f32.s32 %v3952_v50  ;;  %v4517_v45 = vpop.f32.mrb[78].mxu1  ;;  %v4521_v50 = vshll.u32 %v1647_v17, 16  ;;  %v4540_v17 = vadd.f32 %v5302_v1, %v4199_v10  ;;  %v5306_v52 = vld [vmem:[#allocation102_spill] sm:$0xff] }
 0x2a8   : > { %5292 = vst [vmem:[#allocation97_spill] sm:$0xff] %v4495_v36  ;;  %5293 = vst [vmem:[#allocation98_spill] sm:$0xff] %v4497_v19  ;;  %v5296_v19 = vld [vmem:[#allocation100_spill] sm:$0xff]  ;;  %v4531_v9 = vpop.f32.mrb[79].mxu1  ;;  %v5330_v36 = vld [vmem:[#allocation37_spill] sm:$0xff] }
 0x2a9   : > { %5294 = vst [vmem:[#allocation99_spill] sm:$0xff] %v4507_v30  ;;  %5295 = vst [vmem:[#allocation115_spill] sm:$0xff] %v4511_v47  ;;  %v4515_v24 = vadd.f32 %v5296_v19, %v4215_v63  ;;  %v4535_v19 = vshll.u32 %v1339_v49, 16  ;;  %v4544_v33 = vshll.u32 %v1675_v42, 16  ;;  %v4556_v49 = vadd.f32 %v3940_v23, %v4201_v57 }
 0x2aa   : > { %5298 = vst [vmem:[#allocation116_spill] sm:$0xff] %v4517_v45  ;;  %5299 = vst [vmem:[#allocation117_spill] sm:$0xff] %v4525_v34  ;;  %v1689_v45 = vcvt.f32.s32 %v3989_v7  ;;  %v4546_v34 = vshll.u32 %v1353_v31, 16  ;;  %v4560_v7 = vadd.f32 %v3983_v61, %v4201_v57  ;;  %v1381_v42 = vcvt.f32.s32 %v3994_v22  ;;  %v5310_v22 = vld [vmem:[#allocation104_spill] sm:$0xff] }
 0x2ab   : > { %5297 = vst [vmem:[#allocation100_spill] sm:$0xff] %v4515_v24  ;;  %5300 = vst [vmem:[#allocation118_spill] sm:$0xff] %v4529_v37  ;;  %v4542_v24 = vshll.u32 %v1661_v29, 16  ;;  %v4564_v29 = vadd.f32 %v3985_v32, %v4215_v63  ;;  %v1395_v31 = vcvt.f32.s32 %v3996_v55  ;;  %v4574_v23 = vadd.f32 %v5306_v52, %v4199_v10  ;;  %v5312_v55 = vld [vmem:[#allocation105_spill] sm:$0xff] }
 0x2ac   : > { %5301 = vst [vmem:[#allocation119_spill] sm:$0xff] %v4531_v9  ;;  %5303 = vst [vmem:[#allocation101_spill] sm:$0xff] %v4540_v17  ;;  %v4576_v1 = vshll.u32 %v1689_v45, 16  ;;  %v1409_v61 = vcvt.f32.s32 %v4007_v26  ;;  %v5308_v9 = vld [vmem:[#allocation103_spill] sm:$0xff]  ;;  %v4589_v56 = vadd.f32 %v5312_v55, %v4215_v63  ;;  %v4593_v52 = vadd.f32 %v3962_v62, %v4199_v10  ;;  %v5316_v26 = vld [vmem:[#allocation106_spill] sm:$0xff] }
 0x2ad   : > { %5304 = vst [vmem:[#allocation120_spill] sm:$0xff] %v4556_v49  ;;  %5305 = vst [vmem:[#allocation121_spill] sm:$0xff] %v4570_v5  ;;  %v4581_v32 = vadd.f32 %v5308_v9, %v4215_v63  ;;  %v4585_v49 = vadd.f32 %v5310_v22, %v4201_v57  ;;  %v4597_v45 = vadd.f32 %v3964_v53, %v4215_v63  ;;  %v1437_v22 = vcvt.f32.s32 %v4025_v59  ;;  %v5318_v55 = vld [vmem:[#allocation107_spill] sm:$0xff]  ;;  %v5320_v53 = vld [vmem:[#allocation108_spill] sm:$0xff] }
 0x2ae   : > { %5307 = vst [vmem:[#allocation102_spill] sm:$0xff] %v4574_v23  ;;  %5313 = vst [vmem:[#allocation105_spill] sm:$0xff] %v4589_v56  ;;  %v4601_v9 = vadd.f32 %v5316_v26, %v4201_v57  ;;  %v1423_v23 = vcvt.f32.s32 %v4020_v25  ;;  %v4610_v62 = vshll.u32 %v1381_v42, 16  ;;  %v4620_v26 = vadd.f32 %v4002_v13, %v4199_v10 }
 0x2af   : > { %5309 = vst [vmem:[#allocation103_spill] sm:$0xff] %v4581_v32  ;;  %5311 = vst [vmem:[#allocation104_spill] sm:$0xff] %v4585_v49  ;;  %v1451_v49 = vcvt.f32.s32 %v4032_v15  ;;  %v4608_v32 = vadd.f32 %v5318_v55, %v4215_v63  ;;  %v4622_v25 = vshll.u32 %v1409_v61, 16  ;;  %v1465_v59 = vcvt.f32.s32 %v4047_v38  ;;  %v5321_v61 = vld [vmem:[#allocation110_spill] sm:$0xff] }
 0x2b0   : > { %5314 = vst [vmem:[#allocation122_spill] sm:$0xff] %v4593_v52  ;;  %5315 = vst [vmem:[#allocation123_spill] sm:$0xff] %v4597_v45  ;;  %v4612_v52 = vshll.u32 %v1395_v31, 16  ;;  %v4616_v45 = vadd.f32 %v5320_v53, %v4215_v63  ;;  %v4627_v15 = vadd.f32 %v4004_v40, %v4201_v57  ;;  %v4631_v42 = vadd.f32 %v4009_v41, %v4199_v10  ;;  %v5322_v41 = vld [vmem:[#allocation109_spill] sm:$0xff] }
 0x2b1   : > { %5317 = vst [vmem:[#allocation106_spill] sm:$0xff] %v4601_v9  ;;  %5319 = vst [vmem:[#allocation107_spill] sm:$0xff] %v4608_v32  ;;  %v1479_v31 = vcvt.f32.s32 %v4052_v14  ;;  %v1493_v55 = vcvt.f32.s32 %v4057_v21  ;;  %v4637_v13 = vadd.f32 %v4015_v6, %v4201_v57  ;;  %v4641_v53 = vadd.f32 %v5321_v61, %v4215_v63  ;;  %v1281_v14 = vpop.xlane.xlu0 %1280 }
 0x2b2   : > { %v4643_v38 = vshll.u32 %v1423_v23, 16  ;;  %v4645_v40 = vshll.u32 %v1437_v22, 16  ;;  %v4647_v9 = vshll.u32 %v1451_v49, 16  ;;  %v4651_v32 = vadd.f32 %v5322_v41, %v4215_v63  ;;  %v5323_v41 = vld [vmem:[#allocation111_spill] sm:$0xff] }
 0x2b3   : > { %v4655_v21 = vadd.f32 %v4029_v39, %v4199_v10  ;;  %v4659_v6 = vadd.f32 %v4034_v4, %v4201_v57  ;;  %v4663_v23 = vadd.f32 %v4038_v27, %v4199_v10  ;;  %v4667_v49 = vadd.f32 %v4042_v51, %v4201_v57  ;;  %v5324_v39 = vld [vmem:[#allocation112_spill] sm:$0xff] }
 0x2b4   : > { %v4669_v22 = vshll.u32 %v1465_v59, 16  ;;  %v1282_v61 = vcvt.f32.s32 %v1281_v14  ;;  %v4673_v17 = vadd.f32 %v5323_v41, %v4215_v63  ;;  %v4677_v56 = vadd.f32 %v5324_v39, %v4215_v63  ;;  %v5327_v59 = vld [vmem:[#allocation114_spill] sm:$0xff]  ;;  %v5328_v39 = vld [vmem:[#allocation35_spill] sm:$0xff] }
 0x2b5   : > { %v4679_v4 = vshll.u32 %v1479_v31, 16  ;;  %v4681_v37 = vshll.u32 %v1493_v55, 16  ;;  %v1507_v27 = vcvt.f32.s32 %v4066_v44  ;;  %v4686_v51 = vadd.f32 %v4061_v8, %v4199_v10  ;;  %v5329_v55 = vld [vmem:[#allocation36_spill] sm:$0xff]  ;;  %v1617_v12 = vpop.xlane.xlu0 %1616  ;;  %v5331_v8 = vld [vmem:[#allocation41_spill] sm:$0xff] }
 0x2b6   : > { %v1521_v14 = vcvt.f32.s32 %v5327_v59  ;;  %v1535_v47 = vcvt.f32.s32 %v4076_v35  ;;  %v1549_v41 = vcvt.f32.s32 %v4081_v0  ;;  %v1285_v30 = vadd.s32 %v4435_v58, %v1282_v61  ;;  %v5332_v58 = vld [vmem:[#allocation46_spill] sm:$0xff] }
 0x2b7   : > { %5325 = vst [vmem:[#allocation108_spill] sm:$0xff] %v4679_v4  ;;  %5326 = vst [vmem:[#allocation110_spill] sm:$0xff] %v4681_v37  ;;  %v1563_v63 = vcvt.f32.s32 %v5328_v39  ;;  %v1577_v31 = vcvt.f32.s32 %v4091_v11  ;;  %v1591_v5 = vcvt.f32.s32 %v5329_v55  ;;  %v1605_v44 = vcvt.f32.s32 %v5330_v36  ;;  %v5333_v36 = vld [vmem:[#allocation113_spill] sm:$0xff] }
 0x2b8   : > { %vm1720_vm2 = vcmp.eq.s32.totalorder %v1285_v30, 0  ;;  %vm1880_vm3 = vcmp.eq.s32.totalorder %v1285_v30, 1  ;;  %vm2040_vm4 = vcmp.eq.s32.totalorder %v1285_v30, 2  ;;  %vm2200_vm5 = vcmp.eq.s32.totalorder %v1285_v30, 3 }
 0x2b9   : > { %v1816_v59 = vsel %vm1720_vm2, %v5331_v8, 0.0  ;;  %v1976_v35 = vsel %vm1880_vm3, %v4255_v60, 0.0  ;;  %v2136_v0 = vsel %vm2040_vm4, %v4259_v54, 0.0  ;;  %v2296_v61 = vsel %vm2200_vm5, %v5332_v58, 0.0  ;;  %v1295_v54 = vpop.xlane.xlu1 %1294  ;;  %v1309_v37 = vpop.xlane.xlu0 %1308 }
 0x2ba   : > { %v4700_v39 = vshll.u32 %v1507_v27, 16  ;;  %v2008_v11 = vadd.f32 %v1976_v35, %v1816_v59  ;;  %v1618_v55 = vcvt.f32.s32 %v1617_v12  ;;  %v4704_v10 = vadd.f32 %v5333_v36, %v4201_v57 }
 0x2bb   : > { %v4706_v3 = vshll.u32 %v1521_v14, 16  ;;  %v4708_v30 = vshll.u32 %v1535_v47, 16  ;;  %v4710_v8 = vshll.u32 %v1549_v41, 16  ;;  %v4712_v60 = vshll.u32 %v1563_v63, 16  ;;  %v5337_v14 = vld [vmem:[#allocation39_spill] sm:$0xff] }
 0x2bc   : > { %v2168_v4 = vadd.f32 %v2136_v0, %v2008_v11  ;;  %v1621_v27 = vadd.s32 %v4459_v46, %v1618_v55  ;;  %v1296_v58 = vcvt.f32.s32 %v1295_v54  ;;  %v1310_v59 = vcvt.f32.s32 %v1309_v37  ;;  %v5338_v46 = vld [vmem:[#allocation44_spill] sm:$0xff]  ;;  %v5340_v54 = vld [vmem:[#allocation38_spill] sm:$0xff] }
 0x2bd   : > { %v4722_v12 = vshll.u32 %v1577_v31, 16  ;;  %v4724_v47 = vshll.u32 %v1591_v5, 16  ;;  %v4726_v63 = vshll.u32 %v1605_v44, 16  ;;  %v1703_v41 = vcvt.f32.s32 %v5337_v14  ;;  %v1631_v55 = vpop.xlane.xlu1 %1630  ;;  %v1645_v31 = vpop.xlane.xlu0 %1644 }
 0x2be   : > { %v2328_v35 = vadd.f32 %v2296_v61, %v2168_v4  ;;  %vm1744_vm6 = vcmp.eq.s32.totalorder %v1621_v27, 0  ;;  %vm1904_vm7 = vcmp.eq.s32.totalorder %v1621_v27, 1  ;;  %vm2064_vm8 = vcmp.eq.s32.totalorder %v1621_v27, 2 }
 0x2bf   : > { %5334 = vst [vmem:[#allocation109_spill] sm:$0xff] %v4722_v12  ;;  %5335 = vst [vmem:[#allocation111_spill] sm:$0xff] %v4724_v47  ;;  %v1840_v37 = vsel %vm1744_vm6, %v5338_v46, 0.0  ;;  %v2000_v0 = vsel %vm1904_vm7, %v4550_v43, 0.0  ;;  %v2160_v11 = vsel %vm2064_vm8, %v4560_v7, 0.0  ;;  %vm2224_vm9 = vcmp.eq.s32.totalorder %v1621_v27, 3 }
 0x2c0   : > { %5336 = vst [vmem:[#allocation112_spill] sm:$0xff] %v4726_v63  ;;  %2360 = vst [vmem:[%s4720_s5] sm:$0xff] %v2328_v35  ;;  %v2032_v5 = vadd.f32 %v2000_v0, %v1840_v37  ;;  %v2320_v44 = vsel %vm2224_vm9, %v4564_v29, 0.0  ;;  %v1299_v36 = vadd.s32 %v4487_v48, %v1296_v58  ;;  %v1313_v4 = vadd.s32 %v4499_v18, %v1310_v59  ;;  %v5341_v7 = vld [vmem:[#allocation42_spill] sm:$0xff]  ;;  %v5342_v35 = vld [vmem:[#allocation31_spill] sm:$0xff] }
 0x2c1   : > { %v4736_v61 = vshll.u32 %v1703_v41, 16  ;;  %v1632_v46 = vcvt.f32.s32 %v1631_v55  ;;  %v1646_v63 = vcvt.f32.s32 %v1645_v31  ;;  %v5343_v29 = vld [vmem:[#allocation32_spill] sm:$0xff]  ;;  %v1323_v48 = vpop.xlane.xlu1 %1322  ;;  %v1337_v18 = vpop.xlane.xlu0 %1336  ;;  %v5344_v41 = vld [vmem:[#allocation34_spill] sm:$0xff] }
 0x2c2   : > { %v2192_v43 = vadd.f32 %v2160_v11, %v2032_v5  ;;  %vm1721_vm10 = vcmp.eq.s32.totalorder %v1299_v36, 0  ;;  %vm1881_vm11 = vcmp.eq.s32.totalorder %v1299_v36, 1  ;;  %vm2041_vm12 = vcmp.eq.s32.totalorder %v1299_v36, 2  ;;  %v5345_v55 = vld [vmem:[#allocation2_spill] sm:$0xff]  ;;  %v5346_v5 = vld [vmem:[#allocation33_spill] sm:$0xff] }
 0x2c3   : > { %5339 = vst [vmem:[#allocation114_spill] sm:$0xff] %v4736_v61  ;;  %v1817_v27 = vsel %vm1721_vm10, %v5341_v7, 0.0  ;;  %v1977_v37 = vsel %vm1881_vm11, %v5342_v35, 0.0  ;;  %v2137_v0 = vsel %vm2041_vm12, %v5343_v29, 0.0  ;;  %vm2201_vm13 = vcmp.eq.s32.totalorder %v1299_v36, 3  ;;  %v5347_v35 = vld [vmem:[#allocation47_spill] sm:$0xff] }
 0x2c4   : > { %v2352_v58 = vadd.f32 %v2320_v44, %v2192_v43  ;;  %v2009_v59 = vadd.f32 %v1977_v37, %v1817_v27  ;;  %v2297_v14 = vsel %vm2201_vm13, %v5344_v41, 0.0  ;;  %vm1722_vm14 = vcmp.eq.s32.totalorder %v1313_v4, 0  ;;  %v5348_v29 = vld [vmem:[#allocation54_spill] sm:$0xff] }
 0x2c5   : > { %v1818_v11 = vsel %vm1722_vm14, %v5345_v55, 0.0  ;;  %vm1882_vm15 = vcmp.eq.s32.totalorder %v1313_v4, 1  ;;  %vm2042_vm0 = vcmp.eq.s32.totalorder %v1313_v4, 2  ;;  %vm2202_vm1 = vcmp.eq.s32.totalorder %v1313_v4, 3  ;;  %v1659_v37 = vpop.xlane.xlu1 %1658  ;;  %v1673_v41 = vpop.xlane.xlu0 %1672 }
 0x2c6   : > { %2384 = vst [vmem:[%s4720_s5 + $0xc0] sm:$0xff] %v2352_v58  ;;  %v2169_v31 = vadd.f32 %v2137_v0, %v2009_v59  ;;  %v1978_v7 = vsel %vm1882_vm15, %v5346_v5, 0.0  ;;  %v2138_v61 = vsel %vm2042_vm0, %v5347_v35, 0.0  ;;  %v2298_v36 = vsel %vm2202_vm1, %v5348_v29, 0.0  ;;  %v5349_v59 = vld [vmem:[#allocation43_spill] sm:$0xff] }
 0x2c7   : > { %v2010_v47 = vadd.f32 %v1978_v7, %v1818_v11  ;;  %v1635_v44 = vadd.s32 %v4519_v2, %v1632_v46  ;;  %v1649_v43 = vadd.s32 %v4521_v50, %v1646_v63  ;;  %v1324_v27 = vcvt.f32.s32 %v1323_v48 }
 0x2c8   : > { %v2329_v55 = vadd.f32 %v2297_v14, %v2169_v31  ;;  %v1338_v12 = vcvt.f32.s32 %v1337_v18  ;;  %v1660_v4 = vcvt.f32.s32 %v1659_v37  ;;  %v1674_v58 = vcvt.f32.s32 %v1673_v41 }
 0x2c9   : > { %v2170_v0 = vadd.f32 %v2138_v61, %v2010_v47  ;;  %vm1745_vm2 = vcmp.eq.s32.totalorder %v1635_v44, 0  ;;  %vm1905_vm3 = vcmp.eq.s32.totalorder %v1635_v44, 1  ;;  %vm2065_vm4 = vcmp.eq.s32.totalorder %v1635_v44, 2  ;;  %v4755_v46 = vpop.xlane.xlu1 %1350  ;;  %v5350_v47 = vld [vmem:[#allocation45_spill] sm:$0xff]  ;;  %v4758_v48 = vpop.xlane.xlu0 %1364 }
 0x2ca   : > { %2361 = vst [vmem:[%s4720_s5 + $0x8] sm:$0xff] %v2329_v55  ;;  %v1841_v5 = vsel %vm1745_vm2, %v5349_v59, 0.0  ;;  %v2001_v11 = vsel %vm1905_vm3, %v4620_v26, 0.0  ;;  %v2161_v2 = vsel %vm2065_vm4, %v4627_v15, 0.0  ;;  %vm2225_vm5 = vcmp.eq.s32.totalorder %v1635_v44, 3  ;;  %v5354_v55 = vld [vmem:[#allocation51_spill] sm:$0xff] }
 0x2cb   : > { %v2330_v50 = vadd.f32 %v2298_v36, %v2170_v0  ;;  %v2033_v63 = vadd.f32 %v2001_v11, %v1841_v5  ;;  %v2321_v14 = vsel %vm2225_vm5, %v4616_v45, 0.0  ;;  %vm1746_vm6 = vcmp.eq.s32.totalorder %v1649_v43, 0  ;;  %v5356_v5 = vld [vmem:[#allocation50_spill] sm:$0xff] }
 0x2cc   : > { %v1842_v61 = vsel %vm1746_vm6, %v5350_v47, 0.0  ;;  %vm1906_vm7 = vcmp.eq.s32.totalorder %v1649_v43, 1  ;;  %vm2066_vm8 = vcmp.eq.s32.totalorder %v1649_v43, 2  ;;  %vm2226_vm9 = vcmp.eq.s32.totalorder %v1649_v43, 3 }
 0x2cd   : > { %2362 = vst [vmem:[%s4720_s5 + $0x10] sm:$0xff] %v2330_v50  ;;  %v2193_v18 = vadd.f32 %v2161_v2, %v2033_v63  ;;  %v2002_v26 = vsel %vm1906_vm7, %v4631_v42, 0.0  ;;  %v2162_v15 = vsel %vm2066_vm8, %v4637_v13, 0.0  ;;  %v2322_v31 = vsel %vm2226_vm9, %v4641_v53, 0.0  ;;  %v4770_v42 = vpop.xlane.xlu1 %1686  ;;  %v5357_v2 = vld [vmem:[#allocation52_spill] sm:$0xff]  ;;  %v5358_v63 = vld [vmem:[#allocation59_spill] sm:$0xff] }
 0x2ce   : > { %v2034_v45 = vadd.f32 %v2002_v26, %v1842_v61  ;;  %v1327_v7 = vadd.s32 %v4533_v20, %v1324_v27  ;;  %v1341_v35 = vadd.s32 %v4535_v19, %v1338_v12  ;;  %v1663_v29 = vadd.s32 %v4542_v24, %v1660_v4  ;;  %v5351_v20 = vld [vmem:[#allocation3_spill] sm:$0xff]  ;;  %v5352_v19 = vld [vmem:[#allocation48_spill] sm:$0xff]  ;;  %v5353_v24 = vld [vmem:[#allocation49_spill] sm:$0xff] }
 0x2cf   : > { %v2353_v36 = vadd.f32 %v2321_v14, %v2193_v18  ;;  %v1677_v44 = vadd.s32 %v4544_v33, %v1674_v58  ;;  %v1352_v43 = vcvt.f32.s32 %v4755_v46  ;;  %v1366_v37 = vcvt.f32.s32 %v4758_v48  ;;  %v5355_v58 = vld [vmem:[#allocation4_spill] sm:$0xff]  ;;  %v5359_v48 = vld [vmem:[#allocation5_spill] sm:$0xff] }
 0x2d0   : > { %v2194_v41 = vadd.f32 %v2162_v15, %v2034_v45  ;;  %vm1723_vm10 = vcmp.eq.s32.totalorder %v1327_v7, 0  ;;  %vm1883_vm11 = vcmp.eq.s32.totalorder %v1327_v7, 1  ;;  %vm2043_vm12 = vcmp.eq.s32.totalorder %v1327_v7, 2 }
 0x2d1   : > { %2385 = vst [vmem:[%s4720_s5 + $0xc8] sm:$0xff] %v2353_v36  ;;  %v1819_v13 = vsel %vm1723_vm10, %v5351_v20, 0.0  ;;  %v1979_v53 = vsel %vm1883_vm11, %v5352_v19, 0.0  ;;  %v2139_v12 = vsel %vm2043_vm12, %v5353_v24, 0.0  ;;  %vm2203_vm13 = vcmp.eq.s32.totalorder %v1327_v7, 3  ;;  %v1379_v47 = vpop.xlane.xlu1 %1378 }
 0x2d2   : > { %v2354_v33 = vadd.f32 %v2322_v31, %v2194_v41  ;;  %v2011_v27 = vadd.f32 %v1979_v53, %v1819_v13  ;;  %v2299_v4 = vsel %vm2203_vm13, %v5354_v55, 0.0  ;;  %vm1724_vm14 = vcmp.eq.s32.totalorder %v1341_v35, 0 }
 0x2d3   : > { %v1820_v0 = vsel %vm1724_vm14, %v5355_v58, 0.0  ;;  %vm1884_vm15 = vcmp.eq.s32.totalorder %v1341_v35, 1  ;;  %vm2044_vm0 = vcmp.eq.s32.totalorder %v1341_v35, 2  ;;  %vm2204_vm1 = vcmp.eq.s32.totalorder %v1341_v35, 3  ;;  %v5360_v35 = vld [vmem:[#allocation7_spill] sm:$0xff]  ;;  %v5365_v58 = vld [vmem:[#allocation8_spill] sm:$0xff] }
 0x2d4   : > { %2386 = vst [vmem:[%s4720_s5 + $0xd0] sm:$0xff] %v2354_v33  ;;  %v2171_v59 = vadd.f32 %v2139_v12, %v2011_v27  ;;  %v1980_v11 = vsel %vm1884_vm15, %v5356_v5, 0.0  ;;  %v2140_v50 = vsel %vm2044_vm0, %v5357_v2, 0.0  ;;  %v2300_v14 = vsel %vm2204_vm1, %v5358_v63, 0.0  ;;  %v1393_v33 = vpop.xlane.xlu0 %1392  ;;  %v5366_v2 = vld [vmem:[#allocation56_spill] sm:$0xff] }
 0x2d5   : > { %v2012_v46 = vadd.f32 %v1980_v11, %v1820_v0  ;;  %vm1747_vm2 = vcmp.eq.s32.totalorder %v1663_v29, 0  ;;  %vm1907_vm3 = vcmp.eq.s32.totalorder %v1663_v29, 1  ;;  %vm2067_vm4 = vcmp.eq.s32.totalorder %v1663_v29, 2  ;;  %v1407_v27 = vpop.xlane.xlu1 %1406  ;;  %v5367_v63 = vld [vmem:[#allocation60_spill] sm:$0xff] }
 0x2d6   : > { %v2331_v61 = vadd.f32 %v2299_v4, %v2171_v59  ;;  %v1843_v18 = vsel %vm1747_vm2, %v5359_v48, 0.0  ;;  %v2003_v26 = vsel %vm1907_vm3, %v4655_v21, 0.0  ;;  %v2163_v15 = vsel %vm2067_vm4, %v4659_v6, 0.0  ;;  %v5364_v4 = vld [vmem:[#allocation57_spill] sm:$0xff] }
 0x2d7   : > { %v2172_v31 = vadd.f32 %v2140_v50, %v2012_v46  ;;  %v2035_v45 = vadd.f32 %v2003_v26, %v1843_v18  ;;  %vm2227_vm5 = vcmp.eq.s32.totalorder %v1663_v29, 3  ;;  %vm1748_vm6 = vcmp.eq.s32.totalorder %v1677_v44, 0  ;;  %v5368_v46 = vld [vmem:[#allocation66_spill] sm:$0xff] }
 0x2d8   : > { %2363 = vst [vmem:[%s4720_s5 + $0x18] sm:$0xff] %v2331_v61  ;;  %v2323_v7 = vsel %vm2227_vm5, %v4651_v32, 0.0  ;;  %v1844_v36 = vsel %vm1748_vm6, %v5360_v35, 0.0  ;;  %vm1908_vm7 = vcmp.eq.s32.totalorder %v1677_v44, 1  ;;  %vm2068_vm8 = vcmp.eq.s32.totalorder %v1677_v44, 2  ;;  %v1421_v59 = vpop.xlane.xlu0 %1420 }
 0x2d9   : > { %v2332_v41 = vadd.f32 %v2300_v14, %v2172_v31  ;;  %v2195_v20 = vadd.f32 %v2163_v15, %v2035_v45  ;;  %v2004_v13 = vsel %vm1908_vm7, %v4663_v23, 0.0  ;;  %v2164_v21 = vsel %vm2068_vm8, %v4667_v49, 0.0  ;;  %v5361_v23 = vld [vmem:[#allocation6_spill] sm:$0xff]  ;;  %v1435_v5 = vpop.xlane.xlu1 %1434 }
 0x2da   : > { %v2036_v6 = vadd.f32 %v2004_v13, %v1844_v36  ;;  %vm2228_vm9 = vcmp.eq.s32.totalorder %v1677_v44, 3  ;;  %v1355_v19 = vadd.s32 %v4546_v34, %v1352_v43  ;;  %v1369_v29 = vadd.s32 %v4552_v28, %v1366_v37  ;;  %v5362_v34 = vld [vmem:[#allocation53_spill] sm:$0xff]  ;;  %v5363_v28 = vld [vmem:[#allocation55_spill] sm:$0xff] }
 0x2db   : > { %2364 = vst [vmem:[%s4720_s5 + $0x20] sm:$0xff] %v2332_v41  ;;  %v2355_v53 = vadd.f32 %v2323_v7, %v2195_v20  ;;  %v2324_v32 = vsel %vm2228_vm9, %v4677_v56, 0.0  ;;  %v1688_v24 = vcvt.f32.s32 %v4770_v42  ;;  %v1380_v12 = vcvt.f32.s32 %v1379_v47  ;;  %v5369_v36 = vld [vmem:[#allocation9_spill] sm:$0xff] }
 0x2dc   : > { %v2196_v55 = vadd.f32 %v2164_v21, %v2036_v6  ;;  %vm1725_vm10 = vcmp.eq.s32.totalorder %v1355_v19, 0  ;;  %vm1885_vm11 = vcmp.eq.s32.totalorder %v1355_v19, 1  ;;  %vm2045_vm12 = vcmp.eq.s32.totalorder %v1355_v19, 2  ;;  %v5370_v6 = vld [vmem:[#allocation11_spill] sm:$0xff] }
 0x2dd   : > { %2387 = vst [vmem:[%s4720_s5 + $0xd8] sm:$0xff] %v2355_v53  ;;  %v1821_v49 = vsel %vm1725_vm10, %v5361_v23, 0.0  ;;  %v1981_v44 = vsel %vm1885_vm11, %v5362_v34, 0.0  ;;  %v2141_v43 = vsel %vm2045_vm12, %v5363_v28, 0.0  ;;  %vm2205_vm13 = vcmp.eq.s32.totalorder %v1355_v19, 3 }
 0x2de   : > { %v2356_v37 = vadd.f32 %v2324_v32, %v2196_v55  ;;  %v2013_v56 = vadd.f32 %v1981_v44, %v1821_v49  ;;  %v2301_v42 = vsel %vm2205_vm13, %v5364_v4, 0.0  ;;  %vm1726_vm14 = vcmp.eq.s32.totalorder %v1369_v29, 0  ;;  %v5371_v32 = vld [vmem:[#allocation58_spill] sm:$0xff] }
 0x2df   : > { %v1822_v0 = vsel %vm1726_vm14, %v5365_v58, 0.0  ;;  %vm1886_vm15 = vcmp.eq.s32.totalorder %v1369_v29, 1  ;;  %vm2046_vm0 = vcmp.eq.s32.totalorder %v1369_v29, 2  ;;  %vm2206_vm1 = vcmp.eq.s32.totalorder %v1369_v29, 3  ;;  %v4813_v29 = vpop.xlane.xlu0 %1448  ;;  %v5376_v58 = vld [vmem:[#allocation64_spill] sm:$0xff] }
 0x2e0   : > { %2388 = vst [vmem:[%s4720_s5 + $0xe0] sm:$0xff] %v2356_v37  ;;  %v2173_v11 = vadd.f32 %v2141_v43, %v2013_v56  ;;  %v1982_v50 = vsel %vm1886_vm15, %v5366_v2, 0.0  ;;  %v2142_v14 = vsel %vm2046_vm0, %v5367_v63, 0.0  ;;  %v2302_v47 = vsel %vm2206_vm1, %v5368_v46, 0.0  ;;  %v5374_v56 = vld [vmem:[#allocation10_spill] sm:$0xff] }
 0x2e1   : > { %v2014_v61 = vadd.f32 %v1982_v50, %v1822_v0  ;;  %v1691_v48 = vadd.s32 %v4576_v1, %v1688_v24  ;;  %v1383_v18 = vadd.s32 %v4610_v62, %v1380_v12  ;;  %v1394_v26 = vcvt.f32.s32 %v1393_v33  ;;  %v5373_v12 = vld [vmem:[#allocation63_spill] sm:$0xff]  ;;  %v5379_v50 = vld [vmem:[#allocation65_spill] sm:$0xff] }
 0x2e2   : > { %v2333_v15 = vadd.f32 %v2301_v42, %v2173_v11  ;;  %v1408_v31 = vcvt.f32.s32 %v1407_v27  ;;  %v1422_v45 = vcvt.f32.s32 %v1421_v59  ;;  %v1436_v7 = vcvt.f32.s32 %v1435_v5  ;;  %v1463_v27 = vpop.xlane.xlu1 %1462  ;;  %v5375_v42 = vld [vmem:[#allocation62_spill] sm:$0xff]  ;;  %v5377_v59 = vld [vmem:[#allocation71_spill] sm:$0xff]  ;;  %v5378_v5 = vld [vmem:[#allocation13_spill] sm:$0xff] }
 0x2e3   : > { %v2174_v35 = vadd.f32 %v2142_v14, %v2014_v61  ;;  %vm1749_vm2 = vcmp.eq.s32.totalorder %v1691_v48, 0  ;;  %vm1909_vm3 = vcmp.eq.s32.totalorder %v1691_v48, 1  ;;  %vm2069_vm4 = vcmp.eq.s32.totalorder %v1691_v48, 2  ;;  %v5380_v14 = vld [vmem:[#allocation67_spill] sm:$0xff] }
 0x2e4   : > { %2365 = vst [vmem:[%s4720_s5 + $0x28] sm:$0xff] %v2333_v15  ;;  %v1845_v41 = vsel %vm1749_vm2, %v5369_v36, 0.0  ;;  %v2005_v20 = vsel %vm1909_vm3, %v4686_v51, 0.0  ;;  %v2165_v13 = vsel %vm2069_vm4, %v4704_v10, 0.0  ;;  %vm2229_vm5 = vcmp.eq.s32.totalorder %v1691_v48, 3  ;;  %v5372_v51 = vld [vmem:[#allocation61_spill] sm:$0xff] }
 0x2e5   : > { %v2334_v1 = vadd.f32 %v2302_v47, %v2174_v35  ;;  %v2037_v62 = vadd.f32 %v2005_v20, %v1845_v41  ;;  %v2325_v21 = vsel %vm2229_vm5, %v4673_v17, 0.0  ;;  %vm1727_vm6 = vcmp.eq.s32.totalorder %v1383_v18, 0  ;;  %v5381_v47 = vld [vmem:[#allocation69_spill] sm:$0xff] }
 0x2e6   : > { %v1823_v19 = vsel %vm1727_vm6, %v5370_v6, 0.0  ;;  %vm1887_vm7 = vcmp.eq.s32.totalorder %v1383_v18, 1  ;;  %vm2047_vm8 = vcmp.eq.s32.totalorder %v1383_v18, 2  ;;  %vm2207_vm9 = vcmp.eq.s32.totalorder %v1383_v18, 3  ;;  %v5385_v20 = vld [vmem:[#allocation77_spill] sm:$0xff]  ;;  %v1491_v6 = vpop.xlane.xlu1 %1490 }
 0x2e7   : > { %2366 = vst [vmem:[%s4720_s5 + $0x30] sm:$0xff] %v2334_v1  ;;  %v2197_v53 = vadd.f32 %v2165_v13, %v2037_v62  ;;  %v1983_v24 = vsel %vm1887_vm7, %v5371_v32, 0.0  ;;  %v2143_v10 = vsel %vm2047_vm8, %v5372_v51, 0.0  ;;  %v2303_v33 = vsel %vm2207_vm9, %v5373_v12, 0.0  ;;  %v5386_v1 = vld [vmem:[#allocation14_spill] sm:$0xff] }
 0x2e8   : > { %v2015_v55 = vadd.f32 %v1983_v24, %v1823_v19  ;;  %v1397_v17 = vadd.s32 %v4612_v52, %v1394_v26  ;;  %v1411_v23 = vadd.s32 %v4622_v25, %v1408_v31  ;;  %v1425_v49 = vadd.s32 %v4643_v38, %v1422_v45  ;;  %v5382_v26 = vld [vmem:[#allocation15_spill] sm:$0xff]  ;;  %v5383_v31 = vld [vmem:[#allocation68_spill] sm:$0xff]  ;;  %v5388_v24 = vld [vmem:[#allocation73_spill] sm:$0xff] }
 0x2e9   : > { %v2357_v34 = vadd.f32 %v2325_v21, %v2197_v53  ;;  %v1439_v44 = vadd.s32 %v4645_v40, %v1436_v7  ;;  %v1450_v28 = vcvt.f32.s32 %v4813_v29  ;;  %v1464_v43 = vcvt.f32.s32 %v1463_v27  ;;  %v5384_v7 = vld [vmem:[#allocation72_spill] sm:$0xff]  ;;  %v1477_v21 = vpop.xlane.xlu0 %1476  ;;  %v5387_v53 = vld [vmem:[#allocation70_spill] sm:$0xff] }
 0x2ea   : > { %v2175_v37 = vadd.f32 %v2143_v10, %v2015_v55  ;;  %vm1728_vm10 = vcmp.eq.s32.totalorder %v1397_v17, 0  ;;  %vm1888_vm11 = vcmp.eq.s32.totalorder %v1397_v17, 1  ;;  %vm2048_vm12 = vcmp.eq.s32.totalorder %v1397_v17, 2  ;;  %v5389_v55 = vld [vmem:[#allocation76_spill] sm:$0xff] }
 0x2eb   : > { %2389 = vst [vmem:[%s4720_s5 + $0xe8] sm:$0xff] %v2357_v34  ;;  %v1824_v4 = vsel %vm1728_vm10, %v5374_v56, 0.0  ;;  %v1984_v52 = vsel %vm1888_vm11, %v5375_v42, 0.0  ;;  %v2144_v25 = vsel %vm2048_vm12, %v5376_v58, 0.0  ;;  %vm2208_vm13 = vcmp.eq.s32.totalorder %v1397_v17, 3  ;;  %v5392_v42 = vld [vmem:[#allocation74_spill] sm:$0xff] }
 0x2ec   : > { %v2335_v38 = vadd.f32 %v2303_v33, %v2175_v37  ;;  %v2016_v0 = vadd.f32 %v1984_v52, %v1824_v4  ;;  %v2304_v40 = vsel %vm2208_vm13, %v5377_v59, 0.0  ;;  %vm1729_vm14 = vcmp.eq.s32.totalorder %v1411_v23, 0  ;;  %v5390_v37 = vld [vmem:[#allocation19_spill] sm:$0xff]  ;;  %v5393_v58 = vld [vmem:[#allocation20_spill] sm:$0xff]  ;;  %v5394_v59 = vld [vmem:[#allocation78_spill] sm:$0xff] }
 0x2ed   : > { %v1825_v11 = vsel %vm1729_vm14, %v5378_v5, 0.0  ;;  %vm1889_vm15 = vcmp.eq.s32.totalorder %v1411_v23, 1  ;;  %vm2049_vm0 = vcmp.eq.s32.totalorder %v1411_v23, 2  ;;  %vm2209_vm1 = vcmp.eq.s32.totalorder %v1411_v23, 3  ;;  %v5391_v4 = vld [vmem:[#allocation75_spill] sm:$0xff] }
 0x2ee   : > { %2367 = vst [vmem:[%s4720_s5 + $0x38] sm:$0xff] %v2335_v38  ;;  %v2176_v2 = vadd.f32 %v2144_v25, %v2016_v0  ;;  %v1985_v63 = vsel %vm1889_vm15, %v5379_v50, 0.0  ;;  %v2145_v46 = vsel %vm2049_vm0, %v5380_v14, 0.0  ;;  %v2305_v61 = vsel %vm2209_vm1, %v5381_v47, 0.0  ;;  %v1519_v38 = vpop.xlane.xlu1 %1518  ;;  %v5395_v5 = vld [vmem:[#allocation79_spill] sm:$0xff] }
 0x2ef   : > { %v2017_v48 = vadd.f32 %v1985_v63, %v1825_v11  ;;  %vm1730_vm2 = vcmp.eq.s32.totalorder %v1425_v49, 0  ;;  %vm1890_vm3 = vcmp.eq.s32.totalorder %v1425_v49, 1  ;;  %vm2050_vm4 = vcmp.eq.s32.totalorder %v1425_v49, 2 }
 0x2f0   : > { %v2336_v18 = vadd.f32 %v2304_v40, %v2176_v2  ;;  %v1826_v15 = vsel %vm1730_vm2, %v5382_v26, 0.0  ;;  %v1986_v45 = vsel %vm1890_vm3, %v5383_v31, 0.0  ;;  %v2146_v35 = vsel %vm2050_vm4, %v5384_v7, 0.0  ;;  %v5396_v2 = vld [vmem:[#allocation81_spill] sm:$0xff] }
 0x2f1   : > { %v2177_v36 = vadd.f32 %v2145_v46, %v2017_v48  ;;  %v2018_v41 = vadd.f32 %v1986_v45, %v1826_v15  ;;  %vm2210_vm5 = vcmp.eq.s32.totalorder %v1425_v49, 3  ;;  %vm1731_vm6 = vcmp.eq.s32.totalorder %v1439_v44, 0  ;;  %v5398_v46 = vld [vmem:[#allocation108_spill] sm:$0xff] }
 0x2f2   : > { %2368 = vst [vmem:[%s4720_s5 + $0x40] sm:$0xff] %v2336_v18  ;;  %v2306_v13 = vsel %vm2210_vm5, %v5385_v20, 0.0  ;;  %v1827_v62 = vsel %vm1731_vm6, %v5386_v1, 0.0  ;;  %vm1891_vm7 = vcmp.eq.s32.totalorder %v1439_v44, 1  ;;  %vm2051_vm8 = vcmp.eq.s32.totalorder %v1439_v44, 2  ;;  %v5402_v20 = vld [vmem:[#allocation80_spill] sm:$0xff] }
 0x2f3   : > { %v2337_v19 = vadd.f32 %v2305_v61, %v2177_v36  ;;  %v2178_v29 = vadd.f32 %v2146_v35, %v2018_v41  ;;  %v1987_v32 = vsel %vm1891_vm7, %v5387_v53, 0.0  ;;  %v2147_v51 = vsel %vm2051_vm8, %v5388_v24, 0.0  ;;  %v5399_v61 = vld [vmem:[#allocation110_spill] sm:$0xff]  ;;  %v5400_v35 = vld [vmem:[#allocation16_spill] sm:$0xff]  ;;  %v5401_v36 = vld [vmem:[#allocation83_spill] sm:$0xff] }
 0x2f4   : > { %v2019_v10 = vadd.f32 %v1987_v32, %v1827_v62  ;;  %vm2211_vm9 = vcmp.eq.s32.totalorder %v1439_v44, 3  ;;  %v1453_v12 = vadd.s32 %v4647_v9, %v1450_v28  ;;  %v1467_v33 = vadd.s32 %v4669_v22, %v1464_v43  ;;  %v1505_v22 = vpop.xlane.xlu0 %1504  ;;  %v1547_v53 = vpop.xlane.xlu1 %1546  ;;  %v5405_v24 = vld [vmem:[#allocation82_spill] sm:$0xff] }
 0x2f5   : > { %2369 = vst [vmem:[%s4720_s5 + $0x48] sm:$0xff] %v2337_v19  ;;  %v2338_v27 = vadd.f32 %v2306_v13, %v2178_v29  ;;  %v2307_v17 = vsel %vm2211_vm9, %v5389_v55, 0.0  ;;  %v1478_v23 = vcvt.f32.s32 %v1477_v21  ;;  %v1492_v49 = vcvt.f32.s32 %v1491_v6  ;;  %v5403_v21 = vld [vmem:[#allocation89_spill] sm:$0xff]  ;;  %v5404_v19 = vld [vmem:[#allocation22_spill] sm:$0xff] }
 0x2f6   : > { %v2179_v34 = vadd.f32 %v2147_v51, %v2019_v10  ;;  %vm1732_vm10 = vcmp.eq.s32.totalorder %v1453_v12, 0  ;;  %vm1892_vm11 = vcmp.eq.s32.totalorder %v1453_v12, 1  ;;  %vm2052_vm12 = vcmp.eq.s32.totalorder %v1453_v12, 2  ;;  %v5406_v10 = vld [vmem:[#allocation84_spill] sm:$0xff] }
 0x2f7   : > { %2370 = vst [vmem:[%s4720_s5 + $0x50] sm:$0xff] %v2338_v27  ;;  %v1828_v56 = vsel %vm1732_vm10, %v5390_v37, 0.0  ;;  %v1988_v44 = vsel %vm1892_vm11, %v5391_v4, 0.0  ;;  %v2148_v9 = vsel %vm2052_vm12, %v5392_v42, 0.0  ;;  %vm2212_vm13 = vcmp.eq.s32.totalorder %v1453_v12, 3  ;;  %v5410_v42 = vld [vmem:[#allocation97_spill] sm:$0xff] }
 0x2f8   : > { %v2339_v28 = vadd.f32 %v2307_v17, %v2179_v34  ;;  %v2020_v43 = vadd.f32 %v1988_v44, %v1828_v56  ;;  %v2308_v52 = vsel %vm2212_vm13, %v4433_v16, 0.0  ;;  %vm1733_vm14 = vcmp.eq.s32.totalorder %v1467_v33, 0  ;;  %v1533_v18 = vpop.xlane.xlu0 %1532  ;;  %v5409_v34 = vld [vmem:[#allocation93_spill] sm:$0xff] }
 0x2f9   : > { %v1829_v25 = vsel %vm1733_vm14, %v5393_v58, 0.0  ;;  %vm1893_vm15 = vcmp.eq.s32.totalorder %v1467_v33, 1  ;;  %vm2053_vm0 = vcmp.eq.s32.totalorder %v1467_v33, 2  ;;  %vm2213_vm1 = vcmp.eq.s32.totalorder %v1467_v33, 3  ;;  %v5407_v33 = vld [vmem:[#allocation85_spill] sm:$0xff] }
 0x2fa   : > { %2371 = vst [vmem:[%s4720_s5 + $0x58] sm:$0xff] %v2339_v28  ;;  %v2180_v0 = vadd.f32 %v2148_v9, %v2020_v43  ;;  %v1989_v40 = vsel %vm1893_vm15, %v5394_v59, 0.0  ;;  %v2149_v11 = vsel %vm2053_vm0, %v5395_v5, 0.0  ;;  %v2309_v50 = vsel %vm2213_vm1, %v5396_v2, 0.0  ;;  %v5412_v28 = vld [vmem:[#allocation86_spill] sm:$0xff]  ;;  %v5415_v59 = vld [vmem:[#allocation24_spill] sm:$0xff] }
 0x2fb   : > { %v5397_v63 = vcvt.f32.s32 %v5340_v54  ;;  %v2021_v16 = vadd.f32 %v1989_v40, %v1829_v25  ;;  %v1481_v47 = vadd.s32 %v5398_v46, %v1478_v23  ;;  %v1495_v48 = vadd.s32 %v5399_v61, %v1492_v49  ;;  %v5408_v49 = vld [vmem:[#allocation17_spill] sm:$0xff]  ;;  %v5416_v2 = vld [vmem:[#allocation88_spill] sm:$0xff]  ;;  %v5418_v46 = vld [vmem:[#allocation91_spill] sm:$0xff] }
 0x2fc   : > { %v2340_v26 = vadd.f32 %v2308_v52, %v2180_v0  ;;  %v1506_v15 = vcvt.f32.s32 %v1505_v22  ;;  %v1520_v31 = vcvt.f32.s32 %v1519_v38  ;;  %v1534_v45 = vcvt.f32.s32 %v1533_v18  ;;  %v5413_v52 = vld [vmem:[#allocation87_spill] sm:$0xff]  ;;  %v5414_v38 = vld [vmem:[#allocation94_spill] sm:$0xff]  ;;  %v1561_v5 = vpop.xlane.xlu0 %1560 }
 0x2fd   : > { %v4858_v14 = vshll.u32 %v5397_v63, 16  ;;  %v2181_v7 = vadd.f32 %v2149_v11, %v2021_v16  ;;  %vm1734_vm2 = vcmp.eq.s32.totalorder %v1481_v47, 0  ;;  %vm1894_vm3 = vcmp.eq.s32.totalorder %v1481_v47, 1  ;;  %v5417_v63 = vld [vmem:[#allocation90_spill] sm:$0xff] }
 0x2fe   : > { %vm2054_vm4 = vcmp.eq.s32.totalorder %v1481_v47, 2  ;;  %2372 = vst [vmem:[%s4720_s5 + $0x60] sm:$0xff] %v2340_v26  ;;  %v1830_v54 = vsel %vm1734_vm2, %v5400_v35, 0.0  ;;  %v1990_v41 = vsel %vm1894_vm3, %v5401_v36, 0.0  ;;  %vm2214_vm5 = vcmp.eq.s32.totalorder %v1481_v47, 3  ;;  %v5419_v26 = vld [vmem:[#allocation25_spill] sm:$0xff] }
 0x2ff   : > { %v2150_v13 = vsel %vm2054_vm4, %v5402_v20, 0.0  ;;  %v2341_v1 = vadd.f32 %v2309_v50, %v2181_v7  ;;  %v2022_v62 = vadd.f32 %v1990_v41, %v1830_v54  ;;  %v2310_v6 = vsel %vm2214_vm5, %v5403_v21, 0.0  ;;  %v5421_v7 = vld [vmem:[#allocation96_spill] sm:$0xff] }
 0x300   : > { %vm1735_vm6 = vcmp.eq.s32.totalorder %v1495_v48, 0  ;;  %vm1895_vm7 = vcmp.eq.s32.totalorder %v1495_v48, 1  ;;  %vm2055_vm8 = vcmp.eq.s32.totalorder %v1495_v48, 2  ;;  %vm2215_vm9 = vcmp.eq.s32.totalorder %v1495_v48, 3  ;;  %v1575_v48 = vpop.xlane.xlu1 %1574  ;;  %v1589_v20 = vpop.xlane.xlu0 %1588 }
 0x301   : > { %v1831_v29 = vsel %vm1735_vm6, %v5404_v19, 0.0  ;;  %2373 = vst [vmem:[%s4720_s5 + $0x68] sm:$0xff] %v2341_v1  ;;  %v2182_v32 = vadd.f32 %v2150_v13, %v2022_v62  ;;  %v1991_v51 = vsel %vm1895_vm7, %v5405_v24, 0.0  ;;  %v2151_v12 = vsel %vm2055_vm8, %v5406_v10, 0.0  ;;  %v5422_v13 = vld [vmem:[#allocation121_spill] sm:$0xff]  ;;  %v5424_v24 = vld [vmem:[#allocation99_spill] sm:$0xff] }
 0x302   : > { %v2311_v27 = vsel %vm2215_vm9, %v5407_v33, 0.0  ;;  %v2023_v55 = vadd.f32 %v1991_v51, %v1831_v29  ;;  %v1509_v17 = vadd.s32 %v4700_v39, %v1506_v15  ;;  %v1523_v23 = vadd.s32 %v4706_v3, %v1520_v31  ;;  %v5411_v39 = vld [vmem:[#allocation23_spill] sm:$0xff]  ;;  %v5420_v31 = vld [vmem:[#allocation92_spill] sm:$0xff] }
 0x303   : > { %v4876_v37 = vadd.f32 %v5409_v34, %v5408_v49  ;;  %v2342_v56 = vadd.f32 %v2310_v6, %v2182_v32  ;;  %v1537_v4 = vadd.s32 %v4708_v30, %v1534_v45  ;;  %v1548_v44 = vcvt.f32.s32 %v1547_v53  ;;  %v5423_v53 = vld [vmem:[#allocation26_spill] sm:$0xff] }
 0x304   : > { %v4881_v9 = vadd.f32 %v5410_v42, %v4201_v57  ;;  %v2183_v22 = vadd.f32 %v2151_v12, %v2023_v55  ;;  %vm1736_vm10 = vcmp.eq.s32.totalorder %v1509_v17, 0  ;;  %vm1896_vm11 = vcmp.eq.s32.totalorder %v1509_v17, 1  ;;  %v5425_v12 = vld [vmem:[#allocation115_spill] sm:$0xff]  ;;  %v5429_v42 = vld [vmem:[#allocation98_spill] sm:$0xff] }
 0x305   : > { %vm2056_vm12 = vcmp.eq.s32.totalorder %v1509_v17, 2  ;;  %2374 = vst [vmem:[%s4720_s5 + $0x70] sm:$0xff] %v2342_v56  ;;  %v1832_v3 = vsel %vm1736_vm10, %v5411_v39, 0.0  ;;  %v1992_v43 = vsel %vm1896_vm11, %v5412_v28, 0.0  ;;  %vm2216_vm13 = vcmp.eq.s32.totalorder %v1509_v17, 3  ;;  %v1603_v17 = vpop.xlane.xlu1 %1602  ;;  %v5427_v56 = vld [vmem:[#allocation109_spill] sm:$0xff] }
 0x306   : > { %v2152_v58 = vsel %vm2056_vm12, %v5413_v52, 0.0  ;;  %v2343_v25 = vadd.f32 %v2311_v27, %v2183_v22  ;;  %v2024_v30 = vadd.f32 %v1992_v43, %v1832_v3  ;;  %v2312_v0 = vsel %vm2216_vm13, %v5414_v38, 0.0  ;;  %v5426_v27 = vld [vmem:[#allocation100_spill] sm:$0xff]  ;;  %v5431_v43 = vld [vmem:[#allocation111_spill] sm:$0xff] }
 0x307   : > { %vm1737_vm14 = vcmp.eq.s32.totalorder %v1523_v23, 0  ;;  %vm1897_vm15 = vcmp.eq.s32.totalorder %v1523_v23, 1  ;;  %vm2057_vm0 = vcmp.eq.s32.totalorder %v1523_v23, 2  ;;  %vm2217_vm1 = vcmp.eq.s32.totalorder %v1523_v23, 3  ;;  %v1701_v23 = vpop.xlane.xlu0 %1700  ;;  %v5430_v39 = vld [vmem:[#allocation116_spill] sm:$0xff] }
 0x308   : > { %v1833_v40 = vsel %vm1737_vm14, %v5415_v59, 0.0  ;;  %2375 = vst [vmem:[%s4720_s5 + $0x78] sm:$0xff] %v2343_v25  ;;  %v2184_v11 = vadd.f32 %v2152_v58, %v2024_v30  ;;  %v1993_v50 = vsel %vm1897_vm15, %v5416_v2, 0.0  ;;  %v2153_v16 = vsel %vm2057_vm0, %v5417_v63, 0.0  ;;  %v5432_v30 = vld [vmem:[#allocation27_spill] sm:$0xff] }
 0x309   : > { %v2313_v47 = vsel %vm2217_vm1, %v5418_v46, 0.0  ;;  %v2025_v61 = vadd.f32 %v1993_v50, %v1833_v40  ;;  %vm1738_vm2 = vcmp.eq.s32.totalorder %v1537_v4, 0  ;;  %vm1898_vm3 = vcmp.eq.s32.totalorder %v1537_v4, 1  ;;  %v5434_v40 = vld [vmem:[#allocation118_spill] sm:$0xff]  ;;  %v5436_v50 = vld [vmem:[#allocation28_spill] sm:$0xff] }
 0x30a   : > { %vm2058_vm4 = vcmp.eq.s32.totalorder %v1537_v4, 2  ;;  %v2344_v18 = vadd.f32 %v2312_v0, %v2184_v11  ;;  %v1834_v15 = vsel %vm1738_vm2, %v5419_v26, 0.0  ;;  %v1994_v45 = vsel %vm1898_vm3, %v5420_v31, 0.0  ;;  %v5433_v0 = vld [vmem:[#allocation117_spill] sm:$0xff]  ;;  %v5439_v26 = vld [vmem:[#allocation103_spill] sm:$0xff]  ;;  %v1715_v31 = vpop.xlane.xlu1 %1714 }
 0x30b   : > { %v2154_v35 = vsel %vm2058_vm4, %v5421_v7, 0.0  ;;  %v2185_v54 = vadd.f32 %v2153_v16, %v2025_v61  ;;  %v2026_v36 = vadd.f32 %v1994_v45, %v1834_v15  ;;  %vm2218_vm5 = vcmp.eq.s32.totalorder %v1537_v4, 3  ;;  %v5435_v11 = vld [vmem:[#allocation105_spill] sm:$0xff] }
 0x30c   : > { %v1551_v41 = vadd.s32 %v4710_v8, %v1548_v44  ;;  %2376 = vst [vmem:[%s4720_s5 + $0x80] sm:$0xff] %v2344_v18  ;;  %v2314_v1 = vsel %vm2218_vm5, %v5422_v13, 0.0  ;;  %v1562_v62 = vcvt.f32.s32 %v1561_v5  ;;  %v1576_v21 = vcvt.f32.s32 %v1575_v48  ;;  %v5428_v44 = vld [vmem:[#allocation21_spill] sm:$0xff]  ;;  %v5438_v48 = vld [vmem:[#allocation120_spill] sm:$0xff] }
 0x30d   : > { %v1590_v6 = vcvt.f32.s32 %v1589_v20  ;;  %v2345_v19 = vadd.f32 %v2313_v47, %v2185_v54  ;;  %v2186_v29 = vadd.f32 %v2154_v35, %v2026_v36  ;;  %v4908_v22 = vadd.f32 %v5429_v42, %v5428_v44  ;;  %v5437_v16 = vld [vmem:[#allocation101_spill] sm:$0xff]  ;;  %v5441_v36 = vld [vmem:[#allocation102_spill] sm:$0xff]  ;;  %v5442_v13 = vld [vmem:[#allocation104_spill] sm:$0xff] }
 0x30e   : > { %vm1739_vm6 = vcmp.eq.s32.totalorder %v1551_v41, 0  ;;  %vm1899_vm7 = vcmp.eq.s32.totalorder %v1551_v41, 1  ;;  %vm2059_vm8 = vcmp.eq.s32.totalorder %v1551_v41, 2  ;;  %vm2219_vm9 = vcmp.eq.s32.totalorder %v1551_v41, 3  ;;  %v5440_v35 = vld [vmem:[#allocation29_spill] sm:$0xff] }
 0x30f   : > { %v1835_v32 = vsel %vm1739_vm6, %v5423_v53, 0.0  ;;  %v1995_v51 = vsel %vm1899_vm7, %v5424_v24, 0.0  ;;  %2377 = vst [vmem:[%s4720_s5 + $0x88] sm:$0xff] %v2345_v19  ;;  %v2346_v8 = vadd.f32 %v2314_v1, %v2186_v29  ;;  %v2155_v33 = vsel %vm2059_vm8, %v5425_v12, 0.0  ;;  %v5445_v53 = vld [vmem:[#allocation114_spill] sm:$0xff] }
 0x310   : > { %v2027_v10 = vadd.f32 %v1995_v51, %v1835_v32  ;;  %v2315_v55 = vsel %vm2219_vm9, %v5426_v27, 0.0  ;;  %v1565_v34 = vadd.s32 %v4712_v60, %v1562_v62  ;;  %v1579_v4 = vadd.s32 %v5427_v56, %v1576_v21  ;;  %v5443_v62 = vld [vmem:[#allocation107_spill] sm:$0xff]  ;;  %v5447_v12 = vld [vmem:[#allocation30_spill] sm:$0xff] }
 0x311   : > { %v4912_v3 = vadd.f32 %v5430_v39, %v5408_v49  ;;  %2378 = vst [vmem:[%s4720_s5 + $0x90] sm:$0xff] %v2346_v8  ;;  %v1593_v52 = vadd.s32 %v5431_v43, %v1590_v6  ;;  %v1604_v58 = vcvt.f32.s32 %v1603_v17  ;;  %v1702_v25 = vcvt.f32.s32 %v1701_v23  ;;  %v5444_v6 = vld [vmem:[#allocation112_spill] sm:$0xff]  ;;  %v5446_v51 = vld [vmem:[#allocation119_spill] sm:$0xff]  ;;  %v5448_v27 = vld [vmem:[#allocation122_spill] sm:$0xff] }
 0x312   : > { %v2187_v28 = vadd.f32 %v2155_v33, %v2027_v10  ;;  %vm1740_vm10 = vcmp.eq.s32.totalorder %v1565_v34, 0  ;;  %vm1900_vm11 = vcmp.eq.s32.totalorder %v1565_v34, 1  ;;  %vm2060_vm12 = vcmp.eq.s32.totalorder %v1565_v34, 2  ;;  %v5449_v17 = vld [vmem:[#allocation106_spill] sm:$0xff]  ;;  %v5451_v39 = vld [vmem:[#allocation12_spill] sm:$0xff] }
 0x313   : > { %vm2220_vm13 = vcmp.eq.s32.totalorder %v1565_v34, 3  ;;  %v1836_v38 = vsel %vm1740_vm10, %v5432_v30, 0.0  ;;  %v1996_v59 = vsel %vm1900_vm11, %v5433_v0, 0.0  ;;  %v2156_v5 = vsel %vm2060_vm12, %v5434_v40, 0.0  ;;  %v5453_v0 = vld [vmem:[#allocation40_spill] sm:$0xff] }
 0x314   : > { %v2347_v60 = vadd.f32 %v2315_v55, %v2187_v28  ;;  %v2028_v49 = vadd.f32 %v1996_v59, %v1836_v38  ;;  %v2316_v2 = vsel %vm2220_vm13, %v5435_v11, 0.0  ;;  %vm1741_vm14 = vcmp.eq.s32.totalorder %v1579_v4, 0  ;;  %v5454_v59 = vld [vmem:[#allocation18_spill] sm:$0xff] }
 0x315   : > { %vm1901_vm15 = vcmp.eq.s32.totalorder %v1579_v4, 1  ;;  %v1837_v63 = vsel %vm1741_vm14, %v5436_v50, 0.0  ;;  %vm2061_vm0 = vcmp.eq.s32.totalorder %v1579_v4, 2  ;;  %vm2221_vm1 = vcmp.eq.s32.totalorder %v1579_v4, 3  ;;  %v5450_v4 = vld [vmem:[#allocation123_spill] sm:$0xff] }
 0x316   : > { %2379 = vst [vmem:[%s4720_s5 + $0x98] sm:$0xff] %v2347_v60  ;;  %v1997_v46 = vsel %vm1901_vm15, %v5437_v16, 0.0  ;;  %v2188_v47 = vadd.f32 %v2156_v5, %v2028_v49  ;;  %v2157_v18 = vsel %vm2061_vm0, %v5438_v48, 0.0  ;;  %v2317_v15 = vsel %vm2221_vm1, %v5439_v26, 0.0  ;;  %v5452_v60 = vld [vmem:[#allocation95_spill] sm:$0xff] }
 0x317   : > { %v2029_v61 = vadd.f32 %v1997_v46, %v1837_v63  ;;  %vm1742_vm2 = vcmp.eq.s32.totalorder %v1593_v52, 0  ;;  %vm1902_vm3 = vcmp.eq.s32.totalorder %v1593_v52, 1  ;;  %vm2062_vm4 = vcmp.eq.s32.totalorder %v1593_v52, 2 }
 0x318   : > { %vm2222_vm5 = vcmp.eq.s32.totalorder %v1593_v52, 3  ;;  %v2348_v45 = vadd.f32 %v2316_v2, %v2188_v47  ;;  %v1838_v54 = vsel %vm1742_vm2, %v5440_v35, 0.0  ;;  %v1998_v41 = vsel %vm1902_vm3, %v5441_v36, 0.0 }
 0x319   : > { %v2189_v7 = vadd.f32 %v2157_v18, %v2029_v61  ;;  %v2030_v20 = vadd.f32 %v1998_v41, %v1838_v54  ;;  %v2158_v1 = vsel %vm2062_vm4, %v5442_v13, 0.0  ;;  %v2318_v21 = vsel %vm2222_vm5, %v5443_v62, 0.0 }
 0x31a   : > { %v1607_v19 = vadd.s32 %v5444_v6, %v1604_v58  ;;  %2380 = vst [vmem:[%s4720_s5 + $0xa0] sm:$0xff] %v2348_v45  ;;  %v1705_v32 = vadd.s32 %v5445_v53, %v1702_v25  ;;  %v1716_v24 = vcvt.f32.s32 %v1715_v31  ;;  %v882_v8 = vadd.f32 %v5446_v51, %v4201_v57 }
 0x31b   : > { %v2349_v29 = vadd.f32 %v2317_v15, %v2189_v7  ;;  %v2190_v10 = vadd.f32 %v2158_v1, %v2030_v20  ;;  %v1106_v30 = vadd.f32 %v5452_v60, %v5428_v44  ;;  %v625_v40 = vadd.f32 %v5454_v59, %v5453_v0 }
 0x31c   : > { %vm1743_vm6 = vcmp.eq.s32.totalorder %v1607_v19, 0  ;;  %vm1903_vm7 = vcmp.eq.s32.totalorder %v1607_v19, 1  ;;  %vm2063_vm8 = vcmp.eq.s32.totalorder %v1607_v19, 2  ;;  %vm2223_vm9 = vcmp.eq.s32.totalorder %v1607_v19, 3 }
 0x31d   : > { %2381 = vst [vmem:[%s4720_s5 + $0xa8] sm:$0xff] %v2349_v29  ;;  %v1839_v33 = vsel %vm1743_vm6, %v5447_v12, 0.0  ;;  %v1999_v55 = vsel %vm1903_vm7, %v5448_v27, 0.0  ;;  %v2159_v23 = vsel %vm2063_vm8, %v5449_v17, 0.0  ;;  %v2350_v34 = vadd.f32 %v2318_v21, %v2190_v10 }
 0x31e   : > { %v2031_v56 = vadd.f32 %v1999_v55, %v1839_v33  ;;  %v2319_v42 = vsel %vm2223_vm9, %v5450_v4, 0.0  ;;  %vm1750_vm10 = vcmp.eq.s32.totalorder %v1705_v32, 0  ;;  %vm1910_vm11 = vcmp.eq.s32.totalorder %v1705_v32, 1 }
 0x31f   : > { %v1846_v57 = vsel %vm1750_vm10, %v5451_v39, 0.0  ;;  %vm2070_vm12 = vcmp.eq.s32.totalorder %v1705_v32, 2  ;;  %vm2230_vm13 = vcmp.eq.s32.totalorder %v1705_v32, 3  ;;  %2382 = vst [vmem:[%s4720_s5 + $0xb0] sm:$0xff] %v2350_v34  ;;  %v2006_v43 = vsel %vm1910_vm11, %v4876_v37, 0.0 }
 0x320   : > { %v2191_v28 = vadd.f32 %v2159_v23, %v2031_v56  ;;  %v2166_v52 = vsel %vm2070_vm12, %v4881_v9, 0.0  ;;  %v2326_v58 = vsel %vm2230_vm13, %v4908_v22, 0.0  ;;  %v2038_v25 = vadd.f32 %v2006_v43, %v1846_v57 }
 0x321   : > { %v1719_v38 = vadd.s32 %v4858_v14, %v1716_v24 }
 0x322   : > { %v2351_v5 = vadd.f32 %v2319_v42, %v2191_v28  ;;  %v2198_v49 = vadd.f32 %v2166_v52, %v2038_v25 }
 0x323   : > { %vm1751_vm14 = vcmp.eq.s32.totalorder %v1719_v38, 0  ;;  %vm1911_vm15 = vcmp.eq.s32.totalorder %v1719_v38, 1  ;;  %vm2071_vm0 = vcmp.eq.s32.totalorder %v1719_v38, 2  ;;  %vm2231_vm1 = vcmp.eq.s32.totalorder %v1719_v38, 3 }
 0x324   : > { %2383 = vst [vmem:[%s4720_s5 + $0xb8] sm:$0xff] %v2351_v5  ;;  %v1847_v37 = vsel %vm1751_vm14, %v625_v40, 0.0  ;;  %v2007_v9 = vsel %vm1911_vm15, %v4912_v3, 0.0  ;;  %v2167_v22 = vsel %vm2071_vm0, %v882_v8, 0.0  ;;  %v2358_v11 = vadd.f32 %v2326_v58, %v2198_v49 }
 0x325   : > { %v2039_v44 = vadd.f32 %v2007_v9, %v1847_v37  ;;  %v2327_v2 = vsel %vm2231_vm1, %v1106_v30, 0.0 }
 0x326   : > { %2390 = vst [vmem:[%s4720_s5 + $0xf0] sm:$0xff] %v2358_v11 }
 0x327   : > { %v2199_v14 = vadd.f32 %v2167_v22, %v2039_v44 }
 0x329   : > { %v2359_v50 = vadd.f32 %v2327_v2, %v2199_v14 }
 0x32b   : > { %2391 = vst [vmem:[%s4720_s5 + $0xf8] sm:$0xff] %v2359_v50 }
 0x32c PF: > { %s13_s12 = sadd.s32 1, %s2731_s12  }
 0x32d   : > { %p10_p4 = scmp.ge.s32.totalorder %s13_s12, 4  }
 0x32f   :  { %12 = sbr.rel (!%p10_p4) target bundleno = 1 (0x1), region = 62 }

</bundles_post_ra>
